<compile_context>
chip_gen: v7x
topology: tpu7x:2x2x1
jax: 0.10.0
libtpu: 0.0.40
codegen_flags: <defaults>
</compile_context>

<pallas_src>
import functools

import jax
import jax.numpy as jnp
from jax import lax
from jax.experimental import pallas as pl
from jax.experimental.pallas import tpu as pltpu

_GN_EPS = 1e-5


def _pick_gb(bg, cg, p, itemsize=4, max_block_bytes=8 << 20):
    """Largest Gb dividing BG s.t. rows stay sublane-aligned, blocks stay small,
    and the grid keeps >= 2 steps (both v7x TensorCores busy) when possible."""
    candidates = []
    for gb in range(1, bg + 1):
        if bg % gb:
            continue
        rows = gb * cg
        aligned = (rows % 8 == 0) or (gb == bg)
        fits = rows * p * itemsize <= max_block_bytes
        keeps_two_steps = (bg // gb >= 2) or (bg == 1)
        if aligned and fits and keeps_two_steps:
            candidates.append(gb)
    return max(candidates) if candidates else bg


def _ema_kernel(x_ref, rpool_ref, rindT_ref, cpool_ref, cindT_ref,
                w1big_ref, b1_ref, gamma_ref, beta_ref,
                w3big_ref, b3_ref, gsum_ref, gsumT_ref, o_ref):
    # x_ref/o_ref : (R, P)  R = Gb*Cg rows (slab-major, channel-minor), P = H*W
    # rpool/cpool : (P, H)/(P, W)   row/col mean projectors (indicator / W or H)
    # rindT/cindT : (H, P)/(W, P)   indicator expanders (broadcast back to P)
    # w1big/w3big : (R, R)/(9, R, R) block-diagonal kron(I_Gb, conv weight)
    # b1/gamma/beta/b3 : (R, 1) per-row (tiled per-channel) scalars
    # gsum/gsumT  : (Gb, R)/(R, Gb)  slab-membership indicators
    R, P = x_ref.shape
    H = rindT_ref.shape[0]
    W = cindT_ref.shape[0]
    padl = ((W + 2 + 127) // 128) * 128       # flat zero-extension for conv taps

    dot = functools.partial(jnp.dot, preferred_element_type=jnp.float32,
                            precision=lax.Precision.HIGHEST)

    x = x_ref[...].astype(jnp.float32)                                   # (R, P)

    # ---- directional average pools + shared 1x1 mix + sigmoid gates ------
    row_mean = dot(x, rpool_ref[...])                                    # (R, H)
    col_mean = dot(x, cpool_ref[...])                                    # (R, W)
    a_h = dot(w1big_ref[...], row_mean) + b1_ref[...]                    # (R, H)
    a_w = dot(w1big_ref[...], col_mean) + b1_ref[...]                    # (R, W)
    gate = (dot(jax.nn.sigmoid(a_h), rindT_ref[...]) *
            dot(jax.nn.sigmoid(a_w), cindT_ref[...]))                    # (R, P)

    # ---- per-channel GroupNorm of the gated tensor -> x1 ------------------
    y = x * gate
    mu = jnp.mean(y, axis=1, keepdims=True)
    d = y - mu
    var = jnp.mean(d * d, axis=1, keepdims=True)
    x1 = d * lax.rsqrt(var + _GN_EPS) * gamma_ref[...] + beta_ref[...]   # (R, P)

    # ---- 3x3 conv (padding=1) on the raw slab -> x2 -----------------------
    # Each shifted tap is built exactly once from a zero-extended flat copy
    # (the zero extension handles row over/underflow; the column mask handles
    # lateral wrap), then contracted over input channels with one block-
    # diagonal matmul on the MXU.
    zpad = jnp.zeros((R, padl), jnp.float32)
    xflatpad = jnp.concatenate([zpad, x, zpad], axis=1)                  # (R, P+2*padl)
    col = lax.broadcasted_iota(jnp.int32, (1, P), 1) % W                 # (1, P)
    x2 = jnp.zeros((R, P), jnp.float32)
    tap_idx = 0
    for dy in (-1, 0, 1):
        for dx in (-1, 0, 1):
            shift = dy * W + dx
            tap = xflatpad[:, padl + shift: padl + shift + P]            # (R, P)
            valid = jnp.logical_and(col + dx >= 0, col + dx < W)
            tap = jnp.where(valid, tap, 0.0)
            x2 = x2 + dot(w3big_ref[tap_idx], tap)
            tap_idx += 1
    x2 = x2 + b3_ref[...]                                                # (R, P)

    # ---- channel softmax of the pooled descriptors (per slab) -------------
    def group_softmax(pooled):                                           # (R, 1)
        e = jnp.exp(pooled - jnp.max(pooled))   # global shift: softmax-invariant
        z = dot(gsumT_ref[...], dot(gsum_ref[...], e))                   # per-row denom
        return e / z

    s1 = group_softmax(jnp.mean(x1, axis=1, keepdims=True))              # (R, 1)
    s2 = group_softmax(jnp.mean(x2, axis=1, keepdims=True))              # (R, 1)

    # ---- cross-branch spatial attention + final scaling -------------------
    wmap = dot(gsum_ref[...], s1 * x2 + s2 * x1)                         # (Gb, P)
    attn = dot(gsumT_ref[...], jax.nn.sigmoid(wmap))                     # (R, P)
    o_ref[...] = (x * attn).astype(o_ref.dtype)                          # single dense store


def ema_forward(x, w1, b1, gamma, beta, w3, b3, *, factor):
    """EMA forward. x: (B, C, H, W); w1: (Cg, Cg); w3: (Cg, Cg, 3, 3); Cg = C // factor."""
    B, C, H, W = x.shape
    assert C % factor == 0 and C // factor > 0
    Cg = C // factor
    BG = B * factor
    P = H * W

    Gb = _pick_gb(BG, Cg, P, jnp.dtype(x.dtype).itemsize)
    R = Gb * Cg
    grid = (BG // Gb,)

    f32 = jnp.float32
    eye_gb = jnp.eye(Gb, dtype=f32)
    w1big = jnp.kron(eye_gb, w1.astype(f32))                             # (R, R)
    w3big = jnp.stack([jnp.kron(eye_gb, w3[:, :, ky, kx].astype(f32))
                       for ky in range(3) for kx in range(3)])           # (9, R, R)
    b1_r = jnp.tile(b1.astype(f32), Gb)[:, None]                         # (R, 1)
    b3_r = jnp.tile(b3.astype(f32), Gb)[:, None]
    gamma_r = jnp.tile(gamma.astype(f32), Gb)[:, None]
    beta_r = jnp.tile(beta.astype(f32), Gb)[:, None]

    pos = jnp.arange(P)
    rind = (pos[:, None] // W == jnp.arange(H)[None, :]).astype(f32)     # (P, H)
    cind = (pos[:, None] % W == jnp.arange(W)[None, :]).astype(f32)      # (P, W)
    rpool, cpool = rind / W, cind / H
    rindT, cindT = rind.T, cind.T

    rows = jnp.arange(R)
    gsum = (rows[None, :] // Cg == jnp.arange(Gb)[:, None]).astype(f32)  # (Gb, R)
    gsumT = gsum.T

    x_rows = x.reshape(BG * Cg, P)            # slab-major, channel-minor rows (free reshape)

    const2 = lambda g: (0, 0)
    const3 = lambda g: (0, 0, 0)

    out_rows = pl.pallas_call(
        _ema_kernel,
        out_shape=jax.ShapeDtypeStruct((BG * Cg, P), x.dtype),
        grid_spec=pltpu.PrefetchScalarGridSpec(
            num_scalar_prefetch=0,
            grid=grid,
            in_specs=[
                pl.BlockSpec((R, P), lambda g: (g, 0)),      # x (lane-dense rows)
                pl.BlockSpec((P, H), const2),                # rpool
                pl.BlockSpec((H, P), const2),                # rindT
                pl.BlockSpec((P, W), const2),                # cpool
                pl.BlockSpec((W, P), const2),                # cindT
                pl.BlockSpec((R, R), const2),                # w1big
                pl.BlockSpec((R, 1), const2),                # b1
                pl.BlockSpec((R, 1), const2),                # gamma
                pl.BlockSpec((R, 1), const2),                # beta
                pl.BlockSpec((9, R, R), const3),             # w3big
                pl.BlockSpec((R, 1), const2),                # b3
                pl.BlockSpec((Gb, R), const2),               # gsum
                pl.BlockSpec((R, Gb), const2),               # gsumT
            ],
            out_specs=pl.BlockSpec((R, P), lambda g: (g, 0)),
        ),
        compiler_params=pltpu.CompilerParams(
            dimension_semantics=("parallel",),
            vmem_limit_bytes=32 * 1024 * 1024,   # sized for v7x; plenty of headroom
        ),
    )(x_rows, rpool, rindT, cpool, cindT, w1big, b1_r, gamma_r, beta_r,
      w3big, b3_r, gsum, gsumT)

    return out_rows.reshape(B, C, H, W)


def ema_reference(x, w1, b1, gamma, beta, w3, b3, *, factor, eps=_GN_EPS):
    """Pure-JAX reference matching the PyTorch EMA.forward."""
    B, C, H, W = x.shape
    Cg = C // factor
    BG = B * factor
    hi = lax.Precision.HIGHEST
    gx = x.reshape(BG, Cg, H, W).astype(jnp.float32)

    x_h = gx.mean(axis=3)                                    # (BG, Cg, H)
    x_w = gx.mean(axis=2)                                    # (BG, Cg, W)
    a_h = jax.nn.sigmoid(jnp.einsum('oi,bih->boh', w1, x_h, precision=hi)
                         + b1[None, :, None])
    a_w = jax.nn.sigmoid(jnp.einsum('oi,biw->bow', w1, x_w, precision=hi)
                         + b1[None, :, None])

    y = gx * a_h[:, :, :, None] * a_w[:, :, None, :]
    mu = y.mean(axis=(2, 3), keepdims=True)
    var = ((y - mu) ** 2).mean(axis=(2, 3), keepdims=True)
    x1 = (y - mu) * lax.rsqrt(var + eps) * gamma[None, :, None, None] \
        + beta[None, :, None, None]

    x2 = lax.conv_general_dilated(
        gx, w3, window_strides=(1, 1), padding=((1, 1), (1, 1)),
        dimension_numbers=('NCHW', 'OIHW', 'NCHW'),
        precision=hi) + b3[None, :, None, None]

    s1 = jax.nn.softmax(x1.mean(axis=(2, 3)), axis=-1)       # (BG, Cg)
    s2 = jax.nn.softmax(x2.mean(axis=(2, 3)), axis=-1)
    wmap = (jnp.einsum('bc,bchw->bhw', s1, x2, precision=hi)
            + jnp.einsum('bc,bchw->bhw', s2, x1, precision=hi))
    out = gx * jax.nn.sigmoid(wmap)[:, None, :, :]
    return out.reshape(B, C, H, W).astype(x.dtype)


if __name__ == "__main__":
    B, C, H, W = 2, 16, 16, 16
    factor = 4                       # groups; Cg = C // factor = 4
    Cg = C // factor

    key = jax.random.PRNGKey(0)
    kx, k1, k2, k3, k4, k5, k6 = jax.random.split(key, 7)

    x = jax.random.normal(kx, (B, C, H, W), dtype=jnp.float32)
    w1 = jax.random.normal(k1, (Cg, Cg), dtype=jnp.float32) * 0.2
    b1 = jax.random.normal(k2, (Cg,), dtype=jnp.float32) * 0.1
    gamma = 1.0 + 0.1 * jax.random.normal(k3, (Cg,), dtype=jnp.float32)
    beta = 0.1 * jax.random.normal(k4, (Cg,), dtype=jnp.float32)
    w3 = jax.random.normal(k5, (Cg, Cg, 3, 3), dtype=jnp.float32) * 0.1
    b3 = jax.random.normal(k6, (Cg,), dtype=jnp.float32) * 0.1

    fwd = jax.jit(functools.partial(ema_forward, factor=factor))
    out = jax.block_until_ready(fwd(x, w1, b1, gamma, beta, w3, b3))

    ref = ema_reference(x, w1, b1, gamma, beta, w3, b3, factor=factor)
    err = float(jnp.max(jnp.abs(out - ref)))
    assert out.shape == x.shape
    assert jnp.allclose(out, ref, atol=2e-3, rtol=2e-3), \
        f"mismatch vs reference, max abs err {err}"

    print("KERNEL_OK")
</pallas_src>

<mosaic_0001>
module attributes {stable_mosaic.version = 11 : i64} {
  func.func @_ema_kernel(%arg0: i32, %arg1: memref<16x256xf32, #tpu.memory_space<vmem>>, %arg2: memref<256x16xf32, #tpu.memory_space<vmem>>, %arg3: memref<16x256xf32, #tpu.memory_space<vmem>>, %arg4: memref<256x16xf32, #tpu.memory_space<vmem>>, %arg5: memref<16x256xf32, #tpu.memory_space<vmem>>, %arg6: memref<16x16xf32, #tpu.memory_space<vmem>>, %arg7: memref<16x1xf32, #tpu.memory_space<vmem>>, %arg8: memref<16x1xf32, #tpu.memory_space<vmem>>, %arg9: memref<16x1xf32, #tpu.memory_space<vmem>>, %arg10: memref<9x16x16xf32, #tpu.memory_space<vmem>>, %arg11: memref<16x1xf32, #tpu.memory_space<vmem>>, %arg12: memref<4x16xf32, #tpu.memory_space<vmem>>, %arg13: memref<16x4xf32, #tpu.memory_space<vmem>>, %arg14: memref<16x256xf32, #tpu.memory_space<vmem>>) attributes {dimension_semantics = [#tpu.dimension_semantics<parallel>], iteration_bounds = array<i64: 2>, scalar_prefetch = 0 : i64, scratch_operands = 0 : i64, tpu.core_type = #tpu.core_type<tc>, window_params = [{transform_indices = @transform_0, window_bounds = array<i64: 16, 256>}, {pipeline_mode = #tpu.pipeline_mode<synchronous>, transform_indices = @transform_1, window_bounds = array<i64: 256, 16>}, {pipeline_mode = #tpu.pipeline_mode<synchronous>, transform_indices = @transform_2, window_bounds = array<i64: 16, 256>}, {pipeline_mode = #tpu.pipeline_mode<synchronous>, transform_indices = @transform_3, window_bounds = array<i64: 256, 16>}, {pipeline_mode = #tpu.pipeline_mode<synchronous>, transform_indices = @transform_4, window_bounds = array<i64: 16, 256>}, {pipeline_mode = #tpu.pipeline_mode<synchronous>, transform_indices = @transform_5, window_bounds = array<i64: 16, 16>}, {pipeline_mode = #tpu.pipeline_mode<synchronous>, transform_indices = @transform_6, window_bounds = array<i64: 16, 1>}, {pipeline_mode = #tpu.pipeline_mode<synchronous>, transform_indices = @transform_7, window_bounds = array<i64: 16, 1>}, {pipeline_mode = #tpu.pipeline_mode<synchronous>, transform_indices = @transform_8, window_bounds = array<i64: 16, 1>}, {pipeline_mode = #tpu.pipeline_mode<synchronous>, transform_indices = @transform_9, window_bounds = array<i64: 9, 16, 16>}, {pipeline_mode = #tpu.pipeline_mode<synchronous>, transform_indices = @transform_10, window_bounds = array<i64: 16, 1>}, {pipeline_mode = #tpu.pipeline_mode<synchronous>, transform_indices = @transform_11, window_bounds = array<i64: 4, 16>}, {pipeline_mode = #tpu.pipeline_mode<synchronous>, transform_indices = @transform_12, window_bounds = array<i64: 16, 4>}, {transform_indices = @transform_13, window_bounds = array<i64: 16, 256>}]} {
    %c0 = arith.constant 0 : index
    %c0_0 = arith.constant 0 : index
    %0 = vector.load %arg1[%c0, %c0_0] : memref<16x256xf32, #tpu.memory_space<vmem>>, vector<16x256xf32>
    %c0_1 = arith.constant 0 : index
    %c0_2 = arith.constant 0 : index
    %1 = vector.load %arg2[%c0_1, %c0_2] : memref<256x16xf32, #tpu.memory_space<vmem>>, vector<256x16xf32>
    %cst = arith.constant dense<0.000000e+00> : vector<16x16xf32>
    %2 = tpu.matmul %0, %1, %cst {dimension_numbers = #tpu.dot_dimension_numbers<[1], [0], [0], [1], [0, 0, 1, 1], [], []>, precision = #tpu.contract_precision<fp32>} : vector<16x256xf32>, vector<256x16xf32>, vector<16x16xf32> -> vector<16x16xf32>
    %c0_3 = arith.constant 0 : index
    %c0_4 = arith.constant 0 : index
    %3 = vector.load %arg4[%c0_3, %c0_4] : memref<256x16xf32, #tpu.memory_space<vmem>>, vector<256x16xf32>
    %cst_5 = arith.constant dense<0.000000e+00> : vector<16x16xf32>
    %4 = tpu.matmul %0, %3, %cst_5 {dimension_numbers = #tpu.dot_dimension_numbers<[1], [0], [0], [1], [0, 0, 1, 1], [], []>, precision = #tpu.contract_precision<fp32>} : vector<16x256xf32>, vector<256x16xf32>, vector<16x16xf32> -> vector<16x16xf32>
    %c0_6 = arith.constant 0 : index
    %c0_7 = arith.constant 0 : index
    %5 = vector.load %arg6[%c0_6, %c0_7] : memref<16x16xf32, #tpu.memory_space<vmem>>, vector<16x16xf32>
    %cst_8 = arith.constant dense<0.000000e+00> : vector<16x16xf32>
    %6 = tpu.matmul %5, %2, %cst_8 {dimension_numbers = #tpu.dot_dimension_numbers<[1], [0], [0], [1], [0, 0, 1, 1], [], []>, precision = #tpu.contract_precision<fp32>} : vector<16x16xf32>, vector<16x16xf32>, vector<16x16xf32> -> vector<16x16xf32>
    %c0_9 = arith.constant 0 : index
    %c0_10 = arith.constant 0 : index
    %7 = vector.load %arg7[%c0_9, %c0_10] : memref<16x1xf32, #tpu.memory_space<vmem>>, vector<16x1xf32>
    %8 = vector.broadcast %7 : vector<16x1xf32> to vector<16x16xf32>
    %9 = arith.addf %6, %8 : vector<16x16xf32>
    %c0_11 = arith.constant 0 : index
    %c0_12 = arith.constant 0 : index
    %10 = vector.load %arg6[%c0_11, %c0_12] : memref<16x16xf32, #tpu.memory_space<vmem>>, vector<16x16xf32>
    %cst_13 = arith.constant dense<0.000000e+00> : vector<16x16xf32>
    %11 = tpu.matmul %10, %4, %cst_13 {dimension_numbers = #tpu.dot_dimension_numbers<[1], [0], [0], [1], [0, 0, 1, 1], [], []>, precision = #tpu.contract_precision<fp32>} : vector<16x16xf32>, vector<16x16xf32>, vector<16x16xf32> -> vector<16x16xf32>
    %c0_14 = arith.constant 0 : index
    %c0_15 = arith.constant 0 : index
    %12 = vector.load %arg7[%c0_14, %c0_15] : memref<16x1xf32, #tpu.memory_space<vmem>>, vector<16x1xf32>
    %13 = vector.broadcast %12 : vector<16x1xf32> to vector<16x16xf32>
    %14 = arith.addf %11, %13 : vector<16x16xf32>
    %15 = arith.negf %9 : vector<16x16xf32>
    %16 = math.exp %15 : vector<16x16xf32>
    %cst_16 = arith.constant 1.000000e+00 : f32
    %17 = vector.broadcast %cst_16 : f32 to vector<16x16xf32>
    %18 = arith.addf %17, %16 : vector<16x16xf32>
    %19 = arith.divf %17, %18 : vector<16x16xf32>
    %c0_17 = arith.constant 0 : index
    %c0_18 = arith.constant 0 : index
    %20 = vector.load %arg3[%c0_17, %c0_18] : memref<16x256xf32, #tpu.memory_space<vmem>>, vector<16x256xf32>
    %cst_19 = arith.constant dense<0.000000e+00> : vector<16x256xf32>
    %21 = tpu.matmul %19, %20, %cst_19 {dimension_numbers = #tpu.dot_dimension_numbers<[1], [0], [0], [1], [0, 0, 1, 1], [], []>, precision = #tpu.contract_precision<fp32>} : vector<16x16xf32>, vector<16x256xf32>, vector<16x256xf32> -> vector<16x256xf32>
    %22 = arith.negf %14 : vector<16x16xf32>
    %23 = math.exp %22 : vector<16x16xf32>
    %cst_20 = arith.constant 1.000000e+00 : f32
    %24 = vector.broadcast %cst_20 : f32 to vector<16x16xf32>
    %25 = arith.addf %24, %23 : vector<16x16xf32>
    %26 = arith.divf %24, %25 : vector<16x16xf32>
    %c0_21 = arith.constant 0 : index
    %c0_22 = arith.constant 0 : index
    %27 = vector.load %arg5[%c0_21, %c0_22] : memref<16x256xf32, #tpu.memory_space<vmem>>, vector<16x256xf32>
    %cst_23 = arith.constant dense<0.000000e+00> : vector<16x256xf32>
    %28 = tpu.matmul %26, %27, %cst_23 {dimension_numbers = #tpu.dot_dimension_numbers<[1], [0], [0], [1], [0, 0, 1, 1], [], []>, precision = #tpu.contract_precision<fp32>} : vector<16x16xf32>, vector<16x256xf32>, vector<16x256xf32> -> vector<16x256xf32>
    %29 = arith.mulf %21, %28 : vector<16x256xf32>
    %30 = arith.mulf %0, %29 : vector<16x256xf32>
    %cst_24 = arith.constant dense<0.000000e+00> : vector<16xf32>
    %31 = vector.multi_reduction <add>, %30, %cst_24 [1] : vector<16x256xf32> to vector<16xf32>
    %32 = vector.shape_cast %31 : vector<16xf32> to vector<16x1xf32>
    %cst_25 = arith.constant 2.560000e+02 : f32
    %33 = vector.broadcast %cst_25 : f32 to vector<16x1xf32>
    %34 = arith.divf %32, %33 : vector<16x1xf32>
    %35 = vector.broadcast %34 : vector<16x1xf32> to vector<16x256xf32>
    %36 = arith.subf %30, %35 : vector<16x256xf32>
    %37 = arith.mulf %36, %36 : vector<16x256xf32>
    %cst_26 = arith.constant dense<0.000000e+00> : vector<16xf32>
    %38 = vector.multi_reduction <add>, %37, %cst_26 [1] : vector<16x256xf32> to vector<16xf32>
    %39 = vector.shape_cast %38 : vector<16xf32> to vector<16x1xf32>
    %cst_27 = arith.constant 2.560000e+02 : f32
    %40 = vector.broadcast %cst_27 : f32 to vector<16x1xf32>
    %41 = arith.divf %39, %40 : vector<16x1xf32>
    %cst_28 = arith.constant 9.99999974E-6 : f32
    %42 = vector.broadcast %cst_28 : f32 to vector<16x1xf32>
    %43 = arith.addf %41, %42 : vector<16x1xf32>
    %44 = math.rsqrt %43 : vector<16x1xf32>
    %45 = vector.broadcast %44 : vector<16x1xf32> to vector<16x256xf32>
    %46 = arith.mulf %36, %45 : vector<16x256xf32>
    %c0_29 = arith.constant 0 : index
    %c0_30 = arith.constant 0 : index
    %47 = vector.load %arg8[%c0_29, %c0_30] : memref<16x1xf32, #tpu.memory_space<vmem>>, vector<16x1xf32>
    %48 = vector.broadcast %47 : vector<16x1xf32> to vector<16x256xf32>
    %49 = arith.mulf %46, %48 : vector<16x256xf32>
    %c0_31 = arith.constant 0 : index
    %c0_32 = arith.constant 0 : index
    %50 = vector.load %arg9[%c0_31, %c0_32] : memref<16x1xf32, #tpu.memory_space<vmem>>, vector<16x1xf32>
    %51 = vector.broadcast %50 : vector<16x1xf32> to vector<16x256xf32>
    %52 = arith.addf %49, %51 : vector<16x256xf32>
    %cst_33 = arith.constant 0.000000e+00 : f32
    %53 = vector.broadcast %cst_33 : f32 to vector<16x128xf32>
    %54 = tpu.concatenate %53, %0, %53 in 1 : vector<16x128xf32>, vector<16x256xf32>, vector<16x128xf32> -> vector<16x512xf32>
    %55 = tpu.iota {dimensions = array<i32: 1>} : vector<1x256xi32>
    %c16_i32 = arith.constant 16 : i32
    %c0_i32 = arith.constant 0 : i32
    %56 = arith.cmpi eq, %c16_i32, %c0_i32 : i32
    %c1_i32 = arith.constant 1 : i32
    %57 = arith.select %56, %c1_i32, %c16_i32 : i32
    %58 = vector.broadcast %57 : i32 to vector<1x256xi32>
    %59 = arith.remsi %55, %58 : vector<1x256xi32>
    %c0_i32_34 = arith.constant 0 : i32
    %60 = vector.broadcast %c0_i32_34 : i32 to vector<1x256xi32>
    %61 = arith.cmpi ne, %59, %60 : vector<1x256xi32>
    %c0_i32_35 = arith.constant 0 : i32
    %62 = vector.broadcast %c0_i32_35 : i32 to vector<1x256xi32>
    %63 = arith.cmpi slt, %59, %62 : vector<1x256xi32>
    %c0_i32_36 = arith.constant 0 : i32
    %64 = arith.cmpi slt, %57, %c0_i32_36 : i32
    %65 = vector.broadcast %64 : i1 to vector<1x256xi1>
    %66 = vector.broadcast %65 : vector<1x256xi1> to vector<1x256xi1>
    %67 = arith.xori %63, %66 : vector<1x256xi1>
    %68 = arith.andi %67, %61 : vector<1x256xi1>
    %69 = vector.broadcast %57 : i32 to vector<1x256xi32>
    %70 = arith.addi %59, %69 : vector<1x256xi32>
    %71 = arith.select %68, %70, %59 : vector<1x256xi1>, vector<1x256xi32>
    %cst_37 = arith.constant 0.000000e+00 : f32
    %72 = vector.broadcast %cst_37 : f32 to vector<16x256xf32>
    %73 = vector.extract_strided_slice %54 {offsets = [0, 111], sizes = [16, 256], strides = [1, 1]} : vector<16x512xf32> to vector<16x256xf32>
    %c-1_i32 = arith.constant -1 : i32
    %74 = vector.broadcast %c-1_i32 : i32 to vector<1x256xi32>
    %75 = arith.addi %71, %74 : vector<1x256xi32>
    %c0_i32_38 = arith.constant 0 : i32
    %76 = vector.broadcast %c0_i32_38 : i32 to vector<1x256xi32>
    %77 = arith.cmpi sge, %75, %76 : vector<1x256xi32>
    %c-1_i32_39 = arith.constant -1 : i32
    %78 = vector.broadcast %c-1_i32_39 : i32 to vector<1x256xi32>
    %79 = arith.addi %71, %78 : vector<1x256xi32>
    %c16_i32_40 = arith.constant 16 : i32
    %80 = vector.broadcast %c16_i32_40 : i32 to vector<1x256xi32>
    %81 = arith.cmpi slt, %79, %80 : vector<1x256xi32>
    %82 = arith.andi %77, %81 : vector<1x256xi1>
    %cst_41 = arith.constant 0.000000e+00 : f32
    %83 = vector.shape_cast %82 : vector<1x256xi1> to vector<1x256xi1>
    %84 = vector.broadcast %83 : vector<1x256xi1> to vector<16x256xi1>
    %85 = vector.broadcast %cst_41 : f32 to vector<16x256xf32>
    %86 = arith.select %84, %73, %85 : vector<16x256xi1>, vector<16x256xf32>
    %c0_42 = arith.constant 0 : index
    %c0_43 = arith.constant 0 : index
    %c0_44 = arith.constant 0 : index
    %87 = vector.load %arg10[%c0_42, %c0_43, %c0_44] : memref<9x16x16xf32, #tpu.memory_space<vmem>>, vector<1x16x16xf32>
    %88 = vector.shape_cast %87 : vector<1x16x16xf32> to vector<16x16xf32>
    %cst_45 = arith.constant dense<0.000000e+00> : vector<16x256xf32>
    %89 = tpu.matmul %88, %86, %cst_45 {dimension_numbers = #tpu.dot_dimension_numbers<[1], [0], [0], [1], [0, 0, 1, 1], [], []>, precision = #tpu.contract_precision<fp32>} : vector<16x16xf32>, vector<16x256xf32>, vector<16x256xf32> -> vector<16x256xf32>
    %90 = arith.addf %72, %89 : vector<16x256xf32>
    %91 = vector.extract_strided_slice %54 {offsets = [0, 112], sizes = [16, 256], strides = [1, 1]} : vector<16x512xf32> to vector<16x256xf32>
    %c0_i32_46 = arith.constant 0 : i32
    %92 = vector.broadcast %c0_i32_46 : i32 to vector<1x256xi32>
    %93 = arith.addi %71, %92 : vector<1x256xi32>
    %c0_i32_47 = arith.constant 0 : i32
    %94 = vector.broadcast %c0_i32_47 : i32 to vector<1x256xi32>
    %95 = arith.cmpi sge, %93, %94 : vector<1x256xi32>
    %c0_i32_48 = arith.constant 0 : i32
    %96 = vector.broadcast %c0_i32_48 : i32 to vector<1x256xi32>
    %97 = arith.addi %71, %96 : vector<1x256xi32>
    %c16_i32_49 = arith.constant 16 : i32
    %98 = vector.broadcast %c16_i32_49 : i32 to vector<1x256xi32>
    %99 = arith.cmpi slt, %97, %98 : vector<1x256xi32>
    %100 = arith.andi %95, %99 : vector<1x256xi1>
    %cst_50 = arith.constant 0.000000e+00 : f32
    %101 = vector.shape_cast %100 : vector<1x256xi1> to vector<1x256xi1>
    %102 = vector.broadcast %101 : vector<1x256xi1> to vector<16x256xi1>
    %103 = vector.broadcast %cst_50 : f32 to vector<16x256xf32>
    %104 = arith.select %102, %91, %103 : vector<16x256xi1>, vector<16x256xf32>
    %c1 = arith.constant 1 : index
    %c0_51 = arith.constant 0 : index
    %c0_52 = arith.constant 0 : index
    %105 = vector.load %arg10[%c1, %c0_51, %c0_52] : memref<9x16x16xf32, #tpu.memory_space<vmem>>, vector<1x16x16xf32>
    %106 = vector.shape_cast %105 : vector<1x16x16xf32> to vector<16x16xf32>
    %cst_53 = arith.constant dense<0.000000e+00> : vector<16x256xf32>
    %107 = tpu.matmul %106, %104, %cst_53 {dimension_numbers = #tpu.dot_dimension_numbers<[1], [0], [0], [1], [0, 0, 1, 1], [], []>, precision = #tpu.contract_precision<fp32>} : vector<16x16xf32>, vector<16x256xf32>, vector<16x256xf32> -> vector<16x256xf32>
    %108 = arith.addf %90, %107 : vector<16x256xf32>
    %109 = vector.extract_strided_slice %54 {offsets = [0, 113], sizes = [16, 256], strides = [1, 1]} : vector<16x512xf32> to vector<16x256xf32>
    %c1_i32_54 = arith.constant 1 : i32
    %110 = vector.broadcast %c1_i32_54 : i32 to vector<1x256xi32>
    %111 = arith.addi %71, %110 : vector<1x256xi32>
    %c0_i32_55 = arith.constant 0 : i32
    %112 = vector.broadcast %c0_i32_55 : i32 to vector<1x256xi32>
    %113 = arith.cmpi sge, %111, %112 : vector<1x256xi32>
    %c1_i32_56 = arith.constant 1 : i32
    %114 = vector.broadcast %c1_i32_56 : i32 to vector<1x256xi32>
    %115 = arith.addi %71, %114 : vector<1x256xi32>
    %c16_i32_57 = arith.constant 16 : i32
    %116 = vector.broadcast %c16_i32_57 : i32 to vector<1x256xi32>
    %117 = arith.cmpi slt, %115, %116 : vector<1x256xi32>
    %118 = arith.andi %113, %117 : vector<1x256xi1>
    %cst_58 = arith.constant 0.000000e+00 : f32
    %119 = vector.shape_cast %118 : vector<1x256xi1> to vector<1x256xi1>
    %120 = vector.broadcast %119 : vector<1x256xi1> to vector<16x256xi1>
    %121 = vector.broadcast %cst_58 : f32 to vector<16x256xf32>
    %122 = arith.select %120, %109, %121 : vector<16x256xi1>, vector<16x256xf32>
    %c2 = arith.constant 2 : index
    %c0_59 = arith.constant 0 : index
    %c0_60 = arith.constant 0 : index
    %123 = vector.load %arg10[%c2, %c0_59, %c0_60] : memref<9x16x16xf32, #tpu.memory_space<vmem>>, vector<1x16x16xf32>
    %124 = vector.shape_cast %123 : vector<1x16x16xf32> to vector<16x16xf32>
    %cst_61 = arith.constant dense<0.000000e+00> : vector<16x256xf32>
    %125 = tpu.matmul %124, %122, %cst_61 {dimension_numbers = #tpu.dot_dimension_numbers<[1], [0], [0], [1], [0, 0, 1, 1], [], []>, precision = #tpu.contract_precision<fp32>} : vector<16x16xf32>, vector<16x256xf32>, vector<16x256xf32> -> vector<16x256xf32>
    %126 = arith.addf %108, %125 : vector<16x256xf32>
    %127 = vector.extract_strided_slice %54 {offsets = [0, 127], sizes = [16, 256], strides = [1, 1]} : vector<16x512xf32> to vector<16x256xf32>
    %c-1_i32_62 = arith.constant -1 : i32
    %128 = vector.broadcast %c-1_i32_62 : i32 to vector<1x256xi32>
    %129 = arith.addi %71, %128 : vector<1x256xi32>
    %c0_i32_63 = arith.constant 0 : i32
    %130 = vector.broadcast %c0_i32_63 : i32 to vector<1x256xi32>
    %131 = arith.cmpi sge, %129, %130 : vector<1x256xi32>
    %c-1_i32_64 = arith.constant -1 : i32
    %132 = vector.broadcast %c-1_i32_64 : i32 to vector<1x256xi32>
    %133 = arith.addi %71, %132 : vector<1x256xi32>
    %c16_i32_65 = arith.constant 16 : i32
    %134 = vector.broadcast %c16_i32_65 : i32 to vector<1x256xi32>
    %135 = arith.cmpi slt, %133, %134 : vector<1x256xi32>
    %136 = arith.andi %131, %135 : vector<1x256xi1>
    %cst_66 = arith.constant 0.000000e+00 : f32
    %137 = vector.shape_cast %136 : vector<1x256xi1> to vector<1x256xi1>
    %138 = vector.broadcast %137 : vector<1x256xi1> to vector<16x256xi1>
    %139 = vector.broadcast %cst_66 : f32 to vector<16x256xf32>
    %140 = arith.select %138, %127, %139 : vector<16x256xi1>, vector<16x256xf32>
    %c3 = arith.constant 3 : index
    %c0_67 = arith.constant 0 : index
    %c0_68 = arith.constant 0 : index
    %141 = vector.load %arg10[%c3, %c0_67, %c0_68] : memref<9x16x16xf32, #tpu.memory_space<vmem>>, vector<1x16x16xf32>
    %142 = vector.shape_cast %141 : vector<1x16x16xf32> to vector<16x16xf32>
    %cst_69 = arith.constant dense<0.000000e+00> : vector<16x256xf32>
    %143 = tpu.matmul %142, %140, %cst_69 {dimension_numbers = #tpu.dot_dimension_numbers<[1], [0], [0], [1], [0, 0, 1, 1], [], []>, precision = #tpu.contract_precision<fp32>} : vector<16x16xf32>, vector<16x256xf32>, vector<16x256xf32> -> vector<16x256xf32>
    %144 = arith.addf %126, %143 : vector<16x256xf32>
    %145 = vector.extract_strided_slice %54 {offsets = [0, 128], sizes = [16, 256], strides = [1, 1]} : vector<16x512xf32> to vector<16x256xf32>
    %c0_i32_70 = arith.constant 0 : i32
    %146 = vector.broadcast %c0_i32_70 : i32 to vector<1x256xi32>
    %147 = arith.addi %71, %146 : vector<1x256xi32>
    %c0_i32_71 = arith.constant 0 : i32
    %148 = vector.broadcast %c0_i32_71 : i32 to vector<1x256xi32>
    %149 = arith.cmpi sge, %147, %148 : vector<1x256xi32>
    %c0_i32_72 = arith.constant 0 : i32
    %150 = vector.broadcast %c0_i32_72 : i32 to vector<1x256xi32>
    %151 = arith.addi %71, %150 : vector<1x256xi32>
    %c16_i32_73 = arith.constant 16 : i32
    %152 = vector.broadcast %c16_i32_73 : i32 to vector<1x256xi32>
    %153 = arith.cmpi slt, %151, %152 : vector<1x256xi32>
    %154 = arith.andi %149, %153 : vector<1x256xi1>
    %cst_74 = arith.constant 0.000000e+00 : f32
    %155 = vector.shape_cast %154 : vector<1x256xi1> to vector<1x256xi1>
    %156 = vector.broadcast %155 : vector<1x256xi1> to vector<16x256xi1>
    %157 = vector.broadcast %cst_74 : f32 to vector<16x256xf32>
    %158 = arith.select %156, %145, %157 : vector<16x256xi1>, vector<16x256xf32>
    %c4 = arith.constant 4 : index
    %c0_75 = arith.constant 0 : index
    %c0_76 = arith.constant 0 : index
    %159 = vector.load %arg10[%c4, %c0_75, %c0_76] : memref<9x16x16xf32, #tpu.memory_space<vmem>>, vector<1x16x16xf32>
    %160 = vector.shape_cast %159 : vector<1x16x16xf32> to vector<16x16xf32>
    %cst_77 = arith.constant dense<0.000000e+00> : vector<16x256xf32>
    %161 = tpu.matmul %160, %158, %cst_77 {dimension_numbers = #tpu.dot_dimension_numbers<[1], [0], [0], [1], [0, 0, 1, 1], [], []>, precision = #tpu.contract_precision<fp32>} : vector<16x16xf32>, vector<16x256xf32>, vector<16x256xf32> -> vector<16x256xf32>
    %162 = arith.addf %144, %161 : vector<16x256xf32>
    %163 = vector.extract_strided_slice %54 {offsets = [0, 129], sizes = [16, 256], strides = [1, 1]} : vector<16x512xf32> to vector<16x256xf32>
    %c1_i32_78 = arith.constant 1 : i32
    %164 = vector.broadcast %c1_i32_78 : i32 to vector<1x256xi32>
    %165 = arith.addi %71, %164 : vector<1x256xi32>
    %c0_i32_79 = arith.constant 0 : i32
    %166 = vector.broadcast %c0_i32_79 : i32 to vector<1x256xi32>
    %167 = arith.cmpi sge, %165, %166 : vector<1x256xi32>
    %c1_i32_80 = arith.constant 1 : i32
    %168 = vector.broadcast %c1_i32_80 : i32 to vector<1x256xi32>
    %169 = arith.addi %71, %168 : vector<1x256xi32>
    %c16_i32_81 = arith.constant 16 : i32
    %170 = vector.broadcast %c16_i32_81 : i32 to vector<1x256xi32>
    %171 = arith.cmpi slt, %169, %170 : vector<1x256xi32>
    %172 = arith.andi %167, %171 : vector<1x256xi1>
    %cst_82 = arith.constant 0.000000e+00 : f32
    %173 = vector.shape_cast %172 : vector<1x256xi1> to vector<1x256xi1>
    %174 = vector.broadcast %173 : vector<1x256xi1> to vector<16x256xi1>
    %175 = vector.broadcast %cst_82 : f32 to vector<16x256xf32>
    %176 = arith.select %174, %163, %175 : vector<16x256xi1>, vector<16x256xf32>
    %c5 = arith.constant 5 : index
    %c0_83 = arith.constant 0 : index
    %c0_84 = arith.constant 0 : index
    %177 = vector.load %arg10[%c5, %c0_83, %c0_84] : memref<9x16x16xf32, #tpu.memory_space<vmem>>, vector<1x16x16xf32>
    %178 = vector.shape_cast %177 : vector<1x16x16xf32> to vector<16x16xf32>
    %cst_85 = arith.constant dense<0.000000e+00> : vector<16x256xf32>
    %179 = tpu.matmul %178, %176, %cst_85 {dimension_numbers = #tpu.dot_dimension_numbers<[1], [0], [0], [1], [0, 0, 1, 1], [], []>, precision = #tpu.contract_precision<fp32>} : vector<16x16xf32>, vector<16x256xf32>, vector<16x256xf32> -> vector<16x256xf32>
    %180 = arith.addf %162, %179 : vector<16x256xf32>
    %181 = vector.extract_strided_slice %54 {offsets = [0, 143], sizes = [16, 256], strides = [1, 1]} : vector<16x512xf32> to vector<16x256xf32>
    %c-1_i32_86 = arith.constant -1 : i32
    %182 = vector.broadcast %c-1_i32_86 : i32 to vector<1x256xi32>
    %183 = arith.addi %71, %182 : vector<1x256xi32>
    %c0_i32_87 = arith.constant 0 : i32
    %184 = vector.broadcast %c0_i32_87 : i32 to vector<1x256xi32>
    %185 = arith.cmpi sge, %183, %184 : vector<1x256xi32>
    %c-1_i32_88 = arith.constant -1 : i32
    %186 = vector.broadcast %c-1_i32_88 : i32 to vector<1x256xi32>
    %187 = arith.addi %71, %186 : vector<1x256xi32>
    %c16_i32_89 = arith.constant 16 : i32
    %188 = vector.broadcast %c16_i32_89 : i32 to vector<1x256xi32>
    %189 = arith.cmpi slt, %187, %188 : vector<1x256xi32>
    %190 = arith.andi %185, %189 : vector<1x256xi1>
    %cst_90 = arith.constant 0.000000e+00 : f32
    %191 = vector.shape_cast %190 : vector<1x256xi1> to vector<1x256xi1>
    %192 = vector.broadcast %191 : vector<1x256xi1> to vector<16x256xi1>
    %193 = vector.broadcast %cst_90 : f32 to vector<16x256xf32>
    %194 = arith.select %192, %181, %193 : vector<16x256xi1>, vector<16x256xf32>
    %c6 = arith.constant 6 : index
    %c0_91 = arith.constant 0 : index
    %c0_92 = arith.constant 0 : index
    %195 = vector.load %arg10[%c6, %c0_91, %c0_92] : memref<9x16x16xf32, #tpu.memory_space<vmem>>, vector<1x16x16xf32>
    %196 = vector.shape_cast %195 : vector<1x16x16xf32> to vector<16x16xf32>
    %cst_93 = arith.constant dense<0.000000e+00> : vector<16x256xf32>
    %197 = tpu.matmul %196, %194, %cst_93 {dimension_numbers = #tpu.dot_dimension_numbers<[1], [0], [0], [1], [0, 0, 1, 1], [], []>, precision = #tpu.contract_precision<fp32>} : vector<16x16xf32>, vector<16x256xf32>, vector<16x256xf32> -> vector<16x256xf32>
    %198 = arith.addf %180, %197 : vector<16x256xf32>
    %199 = vector.extract_strided_slice %54 {offsets = [0, 144], sizes = [16, 256], strides = [1, 1]} : vector<16x512xf32> to vector<16x256xf32>
    %c0_i32_94 = arith.constant 0 : i32
    %200 = vector.broadcast %c0_i32_94 : i32 to vector<1x256xi32>
    %201 = arith.addi %71, %200 : vector<1x256xi32>
    %c0_i32_95 = arith.constant 0 : i32
    %202 = vector.broadcast %c0_i32_95 : i32 to vector<1x256xi32>
    %203 = arith.cmpi sge, %201, %202 : vector<1x256xi32>
    %c0_i32_96 = arith.constant 0 : i32
    %204 = vector.broadcast %c0_i32_96 : i32 to vector<1x256xi32>
    %205 = arith.addi %71, %204 : vector<1x256xi32>
    %c16_i32_97 = arith.constant 16 : i32
    %206 = vector.broadcast %c16_i32_97 : i32 to vector<1x256xi32>
    %207 = arith.cmpi slt, %205, %206 : vector<1x256xi32>
    %208 = arith.andi %203, %207 : vector<1x256xi1>
    %cst_98 = arith.constant 0.000000e+00 : f32
    %209 = vector.shape_cast %208 : vector<1x256xi1> to vector<1x256xi1>
    %210 = vector.broadcast %209 : vector<1x256xi1> to vector<16x256xi1>
    %211 = vector.broadcast %cst_98 : f32 to vector<16x256xf32>
    %212 = arith.select %210, %199, %211 : vector<16x256xi1>, vector<16x256xf32>
    %c7 = arith.constant 7 : index
    %c0_99 = arith.constant 0 : index
    %c0_100 = arith.constant 0 : index
    %213 = vector.load %arg10[%c7, %c0_99, %c0_100] : memref<9x16x16xf32, #tpu.memory_space<vmem>>, vector<1x16x16xf32>
    %214 = vector.shape_cast %213 : vector<1x16x16xf32> to vector<16x16xf32>
    %cst_101 = arith.constant dense<0.000000e+00> : vector<16x256xf32>
    %215 = tpu.matmul %214, %212, %cst_101 {dimension_numbers = #tpu.dot_dimension_numbers<[1], [0], [0], [1], [0, 0, 1, 1], [], []>, precision = #tpu.contract_precision<fp32>} : vector<16x16xf32>, vector<16x256xf32>, vector<16x256xf32> -> vector<16x256xf32>
    %216 = arith.addf %198, %215 : vector<16x256xf32>
    %217 = vector.extract_strided_slice %54 {offsets = [0, 145], sizes = [16, 256], strides = [1, 1]} : vector<16x512xf32> to vector<16x256xf32>
    %c1_i32_102 = arith.constant 1 : i32
    %218 = vector.broadcast %c1_i32_102 : i32 to vector<1x256xi32>
    %219 = arith.addi %71, %218 : vector<1x256xi32>
    %c0_i32_103 = arith.constant 0 : i32
    %220 = vector.broadcast %c0_i32_103 : i32 to vector<1x256xi32>
    %221 = arith.cmpi sge, %219, %220 : vector<1x256xi32>
    %c1_i32_104 = arith.constant 1 : i32
    %222 = vector.broadcast %c1_i32_104 : i32 to vector<1x256xi32>
    %223 = arith.addi %71, %222 : vector<1x256xi32>
    %c16_i32_105 = arith.constant 16 : i32
    %224 = vector.broadcast %c16_i32_105 : i32 to vector<1x256xi32>
    %225 = arith.cmpi slt, %223, %224 : vector<1x256xi32>
    %226 = arith.andi %221, %225 : vector<1x256xi1>
    %cst_106 = arith.constant 0.000000e+00 : f32
    %227 = vector.shape_cast %226 : vector<1x256xi1> to vector<1x256xi1>
    %228 = vector.broadcast %227 : vector<1x256xi1> to vector<16x256xi1>
    %229 = vector.broadcast %cst_106 : f32 to vector<16x256xf32>
    %230 = arith.select %228, %217, %229 : vector<16x256xi1>, vector<16x256xf32>
    %c8 = arith.constant 8 : index
    %c0_107 = arith.constant 0 : index
    %c0_108 = arith.constant 0 : index
    %231 = vector.load %arg10[%c8, %c0_107, %c0_108] : memref<9x16x16xf32, #tpu.memory_space<vmem>>, vector<1x16x16xf32>
    %232 = vector.shape_cast %231 : vector<1x16x16xf32> to vector<16x16xf32>
    %cst_109 = arith.constant dense<0.000000e+00> : vector<16x256xf32>
    %233 = tpu.matmul %232, %230, %cst_109 {dimension_numbers = #tpu.dot_dimension_numbers<[1], [0], [0], [1], [0, 0, 1, 1], [], []>, precision = #tpu.contract_precision<fp32>} : vector<16x16xf32>, vector<16x256xf32>, vector<16x256xf32> -> vector<16x256xf32>
    %234 = arith.addf %216, %233 : vector<16x256xf32>
    %c0_110 = arith.constant 0 : index
    %c0_111 = arith.constant 0 : index
    %235 = vector.load %arg11[%c0_110, %c0_111] : memref<16x1xf32, #tpu.memory_space<vmem>>, vector<16x1xf32>
    %236 = vector.broadcast %235 : vector<16x1xf32> to vector<16x256xf32>
    %237 = arith.addf %234, %236 : vector<16x256xf32>
    %cst_112 = arith.constant dense<0.000000e+00> : vector<16xf32>
    %238 = vector.multi_reduction <add>, %52, %cst_112 [1] : vector<16x256xf32> to vector<16xf32>
    %239 = vector.shape_cast %238 : vector<16xf32> to vector<16x1xf32>
    %cst_113 = arith.constant 2.560000e+02 : f32
    %240 = vector.broadcast %cst_113 : f32 to vector<16x1xf32>
    %241 = arith.divf %239, %240 : vector<16x1xf32>
    %242 = vector.shape_cast %241 : vector<16x1xf32> to vector<1x16x1xf32>
    %cst_114 = arith.constant dense<0xFF800000> : vector<1xf32>
    %243 = vector.multi_reduction <maximumf>, %242, %cst_114 [1, 2] : vector<1x16x1xf32> to vector<1xf32>
    %244 = vector.shape_cast %243 : vector<1xf32> to vector<1x1x1xf32>
    %245 = vector.extract %244[0, 0, 0] : f32 from vector<1x1x1xf32>
    %246 = vector.broadcast %245 : f32 to vector<16x1xf32>
    %247 = arith.subf %241, %246 : vector<16x1xf32>
    %248 = math.exp %247 : vector<16x1xf32>
    %c0_115 = arith.constant 0 : index
    %c0_116 = arith.constant 0 : index
    %249 = vector.load %arg13[%c0_115, %c0_116] : memref<16x4xf32, #tpu.memory_space<vmem>>, vector<16x4xf32>
    %c0_117 = arith.constant 0 : index
    %c0_118 = arith.constant 0 : index
    %250 = vector.load %arg12[%c0_117, %c0_118] : memref<4x16xf32, #tpu.memory_space<vmem>>, vector<4x16xf32>
    %cst_119 = arith.constant dense<0.000000e+00> : vector<4x1xf32>
    %251 = tpu.matmul %250, %248, %cst_119 {dimension_numbers = #tpu.dot_dimension_numbers<[1], [0], [0], [1], [0, 0, 1, 1], [], []>, precision = #tpu.contract_precision<fp32>} : vector<4x16xf32>, vector<16x1xf32>, vector<4x1xf32> -> vector<4x1xf32>
    %cst_120 = arith.constant dense<0.000000e+00> : vector<16x1xf32>
    %252 = tpu.matmul %249, %251, %cst_120 {dimension_numbers = #tpu.dot_dimension_numbers<[1], [0], [0], [1], [0, 0, 1, 1], [], []>, precision = #tpu.contract_precision<fp32>} : vector<16x4xf32>, vector<4x1xf32>, vector<16x1xf32> -> vector<16x1xf32>
    %253 = arith.divf %248, %252 : vector<16x1xf32>
    %cst_121 = arith.constant dense<0.000000e+00> : vector<16xf32>
    %254 = vector.multi_reduction <add>, %237, %cst_121 [1] : vector<16x256xf32> to vector<16xf32>
    %255 = vector.shape_cast %254 : vector<16xf32> to vector<16x1xf32>
    %cst_122 = arith.constant 2.560000e+02 : f32
    %256 = vector.broadcast %cst_122 : f32 to vector<16x1xf32>
    %257 = arith.divf %255, %256 : vector<16x1xf32>
    %258 = vector.shape_cast %257 : vector<16x1xf32> to vector<1x16x1xf32>
    %cst_123 = arith.constant dense<0xFF800000> : vector<1xf32>
    %259 = vector.multi_reduction <maximumf>, %258, %cst_123 [1, 2] : vector<1x16x1xf32> to vector<1xf32>
    %260 = vector.shape_cast %259 : vector<1xf32> to vector<1x1x1xf32>
    %261 = vector.extract %260[0, 0, 0] : f32 from vector<1x1x1xf32>
    %262 = vector.broadcast %261 : f32 to vector<16x1xf32>
    %263 = arith.subf %257, %262 : vector<16x1xf32>
    %264 = math.exp %263 : vector<16x1xf32>
    %c0_124 = arith.constant 0 : index
    %c0_125 = arith.constant 0 : index
    %265 = vector.load %arg13[%c0_124, %c0_125] : memref<16x4xf32, #tpu.memory_space<vmem>>, vector<16x4xf32>
    %c0_126 = arith.constant 0 : index
    %c0_127 = arith.constant 0 : index
    %266 = vector.load %arg12[%c0_126, %c0_127] : memref<4x16xf32, #tpu.memory_space<vmem>>, vector<4x16xf32>
    %cst_128 = arith.constant dense<0.000000e+00> : vector<4x1xf32>
    %267 = tpu.matmul %266, %264, %cst_128 {dimension_numbers = #tpu.dot_dimension_numbers<[1], [0], [0], [1], [0, 0, 1, 1], [], []>, precision = #tpu.contract_precision<fp32>} : vector<4x16xf32>, vector<16x1xf32>, vector<4x1xf32> -> vector<4x1xf32>
    %cst_129 = arith.constant dense<0.000000e+00> : vector<16x1xf32>
    %268 = tpu.matmul %265, %267, %cst_129 {dimension_numbers = #tpu.dot_dimension_numbers<[1], [0], [0], [1], [0, 0, 1, 1], [], []>, precision = #tpu.contract_precision<fp32>} : vector<16x4xf32>, vector<4x1xf32>, vector<16x1xf32> -> vector<16x1xf32>
    %269 = arith.divf %264, %268 : vector<16x1xf32>
    %c0_130 = arith.constant 0 : index
    %c0_131 = arith.constant 0 : index
    %270 = vector.load %arg12[%c0_130, %c0_131] : memref<4x16xf32, #tpu.memory_space<vmem>>, vector<4x16xf32>
    %271 = vector.broadcast %253 : vector<16x1xf32> to vector<16x256xf32>
    %272 = arith.mulf %271, %237 : vector<16x256xf32>
    %273 = vector.broadcast %269 : vector<16x1xf32> to vector<16x256xf32>
    %274 = arith.mulf %273, %52 : vector<16x256xf32>
    %275 = arith.addf %272, %274 : vector<16x256xf32>
    %cst_132 = arith.constant dense<0.000000e+00> : vector<4x256xf32>
    %276 = tpu.matmul %270, %275, %cst_132 {dimension_numbers = #tpu.dot_dimension_numbers<[1], [0], [0], [1], [0, 0, 1, 1], [], []>, precision = #tpu.contract_precision<fp32>} : vector<4x16xf32>, vector<16x256xf32>, vector<4x256xf32> -> vector<4x256xf32>
    %c0_133 = arith.constant 0 : index
    %c0_134 = arith.constant 0 : index
    %277 = vector.load %arg13[%c0_133, %c0_134] : memref<16x4xf32, #tpu.memory_space<vmem>>, vector<16x4xf32>
    %278 = arith.negf %276 : vector<4x256xf32>
    %279 = math.exp %278 : vector<4x256xf32>
    %cst_135 = arith.constant 1.000000e+00 : f32
    %280 = vector.broadcast %cst_135 : f32 to vector<4x256xf32>
    %281 = arith.addf %280, %279 : vector<4x256xf32>
    %282 = arith.divf %280, %281 : vector<4x256xf32>
    %cst_136 = arith.constant dense<0.000000e+00> : vector<16x256xf32>
    %283 = tpu.matmul %277, %282, %cst_136 {dimension_numbers = #tpu.dot_dimension_numbers<[1], [0], [0], [1], [0, 0, 1, 1], [], []>, precision = #tpu.contract_precision<fp32>} : vector<16x4xf32>, vector<4x256xf32>, vector<16x256xf32> -> vector<16x256xf32>
    %284 = arith.mulf %0, %283 : vector<16x256xf32>
    %c0_137 = arith.constant 0 : index
    %c0_138 = arith.constant 0 : index
    %285 = vector.load %arg14[%c0_137, %c0_138] : memref<16x256xf32, #tpu.memory_space<vmem>>, vector<16x256xf32>
    tpu.vector_store %arg14[%c0_137, %c0_138], %284 {strides = array<i32>} : memref<16x256xf32, #tpu.memory_space<vmem>>, vector<16x256xf32>,
    return
  }
  func.func @transform_0(%arg0: i32) -> (i32, i32) {
    %c0_i32 = arith.constant 0 : i32
    %c0_i32_0 = arith.constant 0 : i32
    return %arg0, %c0_i32 : i32, i32
  }
  func.func @transform_1(%arg0: i32) -> (i32, i32) {
    %c0_i32 = arith.constant 0 : i32
    %c0_i32_0 = arith.constant 0 : i32
    %c0_i32_1 = arith.constant 0 : i32
    return %c0_i32, %c0_i32_0 : i32, i32
  }
  func.func @transform_2(%arg0: i32) -> (i32, i32) {
    %c0_i32 = arith.constant 0 : i32
    %c0_i32_0 = arith.constant 0 : i32
    %c0_i32_1 = arith.constant 0 : i32
    return %c0_i32, %c0_i32_0 : i32, i32
  }
  func.func @transform_3(%arg0: i32) -> (i32, i32) {
    %c0_i32 = arith.constant 0 : i32
    %c0_i32_0 = arith.constant 0 : i32
    %c0_i32_1 = arith.constant 0 : i32
    return %c0_i32, %c0_i32_0 : i32, i32
  }
  func.func @transform_4(%arg0: i32) -> (i32, i32) {
    %c0_i32 = arith.constant 0 : i32
    %c0_i32_0 = arith.constant 0 : i32
    %c0_i32_1 = arith.constant 0 : i32
    return %c0_i32, %c0_i32_0 : i32, i32
  }
  func.func @transform_5(%arg0: i32) -> (i32, i32) {
    %c0_i32 = arith.constant 0 : i32
    %c0_i32_0 = arith.constant 0 : i32
    %c0_i32_1 = arith.constant 0 : i32
    return %c0_i32, %c0_i32_0 : i32, i32
  }
  func.func @transform_6(%arg0: i32) -> (i32, i32) {
    %c0_i32 = arith.constant 0 : i32
    %c0_i32_0 = arith.constant 0 : i32
    %c0_i32_1 = arith.constant 0 : i32
    return %c0_i32, %c0_i32_0 : i32, i32
  }
  func.func @transform_7(%arg0: i32) -> (i32, i32) {
    %c0_i32 = arith.constant 0 : i32
    %c0_i32_0 = arith.constant 0 : i32
    %c0_i32_1 = arith.constant 0 : i32
    return %c0_i32, %c0_i32_0 : i32, i32
  }
  func.func @transform_8(%arg0: i32) -> (i32, i32) {
    %c0_i32 = arith.constant 0 : i32
    %c0_i32_0 = arith.constant 0 : i32
    %c0_i32_1 = arith.constant 0 : i32
    return %c0_i32, %c0_i32_0 : i32, i32
  }
  func.func @transform_9(%arg0: i32) -> (i32, i32, i32) {
    %c0_i32 = arith.constant 0 : i32
    %c0_i32_0 = arith.constant 0 : i32
    %c0_i32_1 = arith.constant 0 : i32
    %c0_i32_2 = arith.constant 0 : i32
    return %c0_i32, %c0_i32_0, %c0_i32_1 : i32, i32, i32
  }
  func.func @transform_10(%arg0: i32) -> (i32, i32) {
    %c0_i32 = arith.constant 0 : i32
    %c0_i32_0 = arith.constant 0 : i32
    %c0_i32_1 = arith.constant 0 : i32
    return %c0_i32, %c0_i32_0 : i32, i32
  }
  func.func @transform_11(%arg0: i32) -> (i32, i32) {
    %c0_i32 = arith.constant 0 : i32
    %c0_i32_0 = arith.constant 0 : i32
    %c0_i32_1 = arith.constant 0 : i32
    return %c0_i32, %c0_i32_0 : i32, i32
  }
  func.func @transform_12(%arg0: i32) -> (i32, i32) {
    %c0_i32 = arith.constant 0 : i32
    %c0_i32_0 = arith.constant 0 : i32
    %c0_i32_1 = arith.constant 0 : i32
    return %c0_i32, %c0_i32_0 : i32, i32
  }
  func.func @transform_13(%arg0: i32) -> (i32, i32) {
    %c0_i32 = arith.constant 0 : i32
    %c0_i32_0 = arith.constant 0 : i32
    return %arg0, %c0_i32 : i32, i32
  }
}

</mosaic_0001>

<bundles_post_ra>
// kernel: tile.23
= control target key start
LH: loop header
LB: loop body
LE: loop exit
PB: predicated region body
PF: predicated region fallthrough
CT: control target
= control target key end

     0   :  { %s22_s0 = inlined_call_operand.vmem [shape: f32[4], index: 0, kind: input, shape index: {}]   ;;  %s23_s1 = inlined_call_operand.vmem [shape: f32[4,4], index: 1, kind: output, shape index: {}]  }
   0x1   :  { %v4_v0 = vld [vmem:[%s22_s0] ss:$0 sm:$0xff] }
   0x2   :  { %5 = vst [vmem:[%s23_s1] sm:$0xf] %v4_v0 }

// kernel: tile.0
= control target key start
LH: loop header
LB: loop body
LE: loop exit
PB: predicated region body
PF: predicated region fallthrough
CT: control target
= control target key end

     0   :  { %s34_s8 = smov 125   ;;  %vm7_vm0 = vcmask 7168   ;;  %s35_s11 = smov 126   ;;  %s61_s0 = inlined_call_operand.vmem [shape: f32[4,4], index: 0, kind: input, shape index: {}]   ;;  %s62_s1 = inlined_call_operand.vmem [shape: f32[16,1], index: 1, kind: output, shape index: {}]  }
   0x1   :  { %v4_v0 = vld [vmem:[%s61_s0] sm:$0xf]  ;;  %s33_s0 = smov 127  }
   0x2   :  { %5 = vst [vmem:[#allocation0] sm:$0xf] %v4_v0 }
   0x9   :  { %v9_v1 = vld [vmem:[#allocation0] sm:$0xf]  }
   0xa   :  { %v21_v2 = vld [vmem:[#allocation0] sm:$0xf]   ;;  %10 = vrot.lane.b32.xlu0 %v9_v1, %s33_s0 }
   0xb   :  { %22 = vrot.lane.b32.xlu1 %v21_v2, %s34_s8  ;;  %v6_v3 = vld [vmem:[#allocation0] sm:$0xf]  }
   0xc   :  { %v15_v4 = vld [vmem:[#allocation0] sm:$0xf]   ;;  %8 = vst.msk [vmem:[%s62_s1] ss:$4 sm:$0xf] %vm7_vm0, %v6_v3  }
   0xe   :  { %16 = vrot.lane.b32.xlu0 %v15_v4, %s35_s11 }
  0x7c   :  { %v11_v5 = vpop.permute.xlu0 %10  }
  0x7d   :  { %v23_v6 = vpop.permute.xlu1 %22   ;;  %27 = vst.msk [vmem:[%s62_s1 + $0x1] ss:$4 sm:$0xf] %vm7_vm0, %v11_v5  }
  0x7e   :  { %29 = vst.msk [vmem:[%s62_s1 + $0x3] ss:$4 sm:$0xf] %vm7_vm0, %v23_v6  }
  0x80   :  { %v17_v7 = vpop.permute.xlu0 %16  }
  0x81   :  { %28 = vst.msk [vmem:[%s62_s1 + $0x2] ss:$4 sm:$0xf] %vm7_vm0, %v17_v7  }

// kernel: ema_forward.1
= control target key start
LH: loop header
LB: loop body
LE: loop exit
PB: predicated region body
PF: predicated region fallthrough
CT: control target
= control target key end

     0   :  { %s15018_s25 = smov 0   ;;  %s17561_s0 = inlined_call_operand.vmem [shape: f32[32,256], index: 0, kind: input, shape index: {}]   ;;  %s17562_s1 = inlined_call_operand.vmem [shape: f32[256,16], index: 1, kind: input, shape index: {}]   ;;  %s17563_s2 = inlined_call_operand.vmem [shape: f32[16,256], index: 2, kind: input, shape index: {}]   ;;  %s17564_s3 = inlined_call_operand.vmem [shape: f32[256,16], index: 3, kind: input, shape index: {}]   ;;  %s17565_s4 = inlined_call_operand.vmem [shape: f32[16,256], index: 4, kind: input, shape index: {}]   ;;  %s17566_s5 = inlined_call_operand.vmem [shape: f32[16,16], index: 5, kind: input, shape index: {}]   ;;  %s17567_s6 = inlined_call_operand.vmem [shape: f32[16,1], index: 6, kind: input, shape index: {}]   ;;  %s17568_s7 = inlined_call_operand.vmem [shape: f32[16,1], index: 7, kind: input, shape index: {}]   ;;  %s17569_s8 = inlined_call_operand.vmem [shape: f32[16,1], index: 8, kind: input, shape index: {}]   ;;  %s17570_s9 = inlined_call_operand.vmem [shape: f32[9,16,16], index: 9, kind: input, shape index: {}]   ;;  %s17571_s10 = inlined_call_operand.vmem [shape: f32[16,1], index: 10, kind: input, shape index: {}]   ;;  %s17572_s11 = inlined_call_operand.vmem [shape: f32[4,16], index: 11, kind: input, shape index: {}]   ;;  %s17573_s12 = inlined_call_operand.vmem [shape: f32[16,4], index: 12, kind: input, shape index: {}]   ;;  %s17574_s13 = inlined_call_operand.vmem [shape: f32[32,256], index: 13, kind: output, shape index: {}]  }
   0x1 LB: > { %s12903_s26 = sadd.s32 4294967295, %s14934_s25   ;;  %p12907_p0 = scmp.ge.s32.totalorder %s14934_s25, 1  ;;  %s14934_s25 = sphi %s15018_s25, %s23_s25  }
   0x2   : > { %p389_p1 = scmp.lt.s32.totalorder %s14934_s25, 3 }
   0x4   : > { %p390_p2 = pnand %p12907_p0, %p389_p1 }
   0x6   : > { %393 = sbr.rel (%p390_p2) target bundleno = 3177 (0xc69), region = 72 }
   0xd   : > { %v469_v0 = vld [vmem:[%s17562_s1 + $0x80] sm:$0xff]  ;;  %v470_v1 = vld [vmem:[%s17562_s1 + $0x88] sm:$0xff]  ;;  %s15035_s16 = sshll.u32 %s12903_s26, 1  ;;  %v471_v7 = vld [vmem:[%s17562_s1 + $0x90] sm:$0xff]  ;;  %vm2367_vm0 = vcmask 130048   ;;  %s14938_s14 = smov 16  }
   0xe   : > { %v453_v2 = vld [vmem:[%s17562_s1] sm:$0xff]  ;;  %v534_v3 = vand.u32 4294901760, %v469_v0  ;;  %v537_v4 = vand.u32 4294901760, %v470_v1  ;;  %v454_v5 = vld [vmem:[%s17562_s1 + $0x8] sm:$0xff]  ;;  %v472_v8 = vld [vmem:[%s17562_s1 + $0x98] sm:$0xff]  ;;  %v540_v10 = vand.u32 4294901760, %v471_v7 }
   0xf   : > { %v486_v6 = vand.u32 4294901760, %v453_v2  ;;  %v489_v9 = vand.u32 4294901760, %v454_v5  ;;  %v543_v11 = vand.u32 4294901760, %v472_v8  ;;  %v455_v12 = vld [vmem:[%s17562_s1 + $0x10] sm:$0xff]  ;;  %v456_v13 = vld [vmem:[%s17562_s1 + $0x18] sm:$0xff]  ;;  %v473_v14 = vld [vmem:[%s17562_s1 + $0xa0] sm:$0xff] }
  0x10   : > { %v15055_v15 = vpack.c.bf16 %v537_v4, %v534_v3  ;;  %v474_v16 = vld [vmem:[%s17562_s1 + $0xa8] sm:$0xff]  ;;  %v457_v17 = vld [vmem:[%s17562_s1 + $0x20] sm:$0xff]  ;;  %p436_p3 = scmp.lt.s32.totalorder %s15035_s16, 3  ;;  %v475_v21 = vld [vmem:[%s17562_s1 + $0xb0] sm:$0xff]  ;;  %v492_v22 = vand.u32 4294901760, %v455_v12  ;;  %v495_v23 = vand.u32 4294901760, %v456_v13  ;;  %v15082_v30 = vsub.f32 %v469_v0, %v534_v3 }
  0x11   : > { %v458_v18 = vld [vmem:[%s17562_s1 + $0x28] sm:$0xff]  ;;  %v15067_v19 = vpack.c.bf16 %v489_v9, %v486_v6  ;;  %v15069_v20 = vpack.c.bf16 %v543_v11, %v540_v10  ;;  %v546_v24 = vand.u32 4294901760, %v473_v14  ;;  %v549_v25 = vand.u32 4294901760, %v474_v16  ;;  %v476_v28 = vld [vmem:[%s17562_s1 + $0xb8] sm:$0xff]  ;;  %v459_v29 = vld [vmem:[%s17562_s1 + $0x30] sm:$0xff]  ;;  %s14939_s18 = smov 17  }
  0x12   : > { %17715 = vst [vmem:[#allocation2_spill] sm:$0xff] %v15055_v15  ;;  %13745 = vmatprep.subr.bf16.mxu1 %v15055_v15  ;;  %v498_v26 = vand.u32 4294901760, %v457_v17  ;;  %v501_v27 = vand.u32 4294901760, %v458_v18  ;;  %v15084_v31 = vsub.f32 %v470_v1, %v537_v4  ;;  %v15087_v32 = vpack.c.bf16 %v495_v23, %v492_v22  ;;  %v460_v34 = vld [vmem:[%s17562_s1 + $0x38] sm:$0xff]  ;;  %s17953_s16 = smov (!%p436_p3, %s15035_s16), 3  ;;  %v477_v39 = vld [vmem:[%s17562_s1 + $0xc0] sm:$0xff] }
  0x13   : > { %17716 = vst [vmem:[#allocation3_spill] sm:$0xff] %v15067_v19  ;;  %17717 = vst [vmem:[#allocation4_spill] sm:$0xff] %v15069_v20  ;;  %13747 = vmatpush3.bf16.msra.mxu1 %v15067_v19  ;;  %v552_v33 = vand.u32 4294901760, %v475_v21  ;;  %v15097_v35 = vsub.f32 %v453_v2, %v486_v6  ;;  %v15099_v36 = vsub.f32 %v454_v5, %v489_v9  ;;  %v478_v40 = vld [vmem:[%s17562_s1 + $0xc8] sm:$0xff]  ;;  %v555_v43 = vand.u32 4294901760, %v476_v28  ;;  %v461_v45 = vld [vmem:[%s17562_s1 + $0x40] sm:$0xff] }
  0x14   : > { %13749 = vmatprep.subr.bf16.mxu1 %v15069_v20  ;;  %17718 = vst [vmem:[#allocation5_spill] sm:$0xff] %v15087_v32  ;;  %v15101_v37 = vsub.f32 %v471_v7, %v540_v10  ;;  %v15103_v38 = vpack.c.bf16 %v549_v25, %v546_v24  ;;  %v15111_v41 = vsub.f32 %v472_v8, %v543_v11  ;;  %v504_v44 = vand.u32 4294901760, %v459_v29  ;;  %v462_v46 = vld [vmem:[%s17562_s1 + $0x48] sm:$0xff]  ;;  %v479_v51 = vld [vmem:[%s17562_s1 + $0xd0] sm:$0xff]  ;;  %v480_v56 = vld [vmem:[%s17562_s1 + $0xd8] sm:$0xff]  ;;  %s12938_s30 = sshll.u32 %s17953_s16, 4 }
  0x15   : > { %v15113_v42 = vsub.f32 %v455_v12, %v492_v22  ;;  %v15122_v47 = vsub.f32 %v456_v13, %v495_v23  ;;  %v15124_v48 = vsub.f32 %v473_v14, %v546_v24  ;;  %v15126_v49 = vpack.c.bf16 %v501_v27, %v498_v26  ;;  %v463_v57 = vld [vmem:[%s17562_s1 + $0x50] sm:$0xff]  ;;  %v464_v58 = vld [vmem:[%s17562_s1 + $0x58] sm:$0xff]  ;;  %v481_v63 = vld [vmem:[%s17562_s1 + $0xe0] sm:$0xff]  ;;  %s15176_s26 = scalar_lea.vmem %s17561_s0, %s12938_s30  ;;  %s14940_s19 = smov 15  }
  0x16   : > { %17719 = vst [vmem:[#allocation6_spill] sm:$0xff] %v15103_v38  ;;  %v507_v50 = vand.u32 4294901760, %v460_v34  ;;  %v15132_v52 = vsub.f32 %v474_v16, %v549_v25  ;;  %v15134_v53 = vpack.c.bf16 %v555_v43, %v552_v33  ;;  %v558_v54 = vand.u32 4294901760, %v477_v39  ;;  %v482_v0 = vld [vmem:[%s17562_s1 + $0xe8] sm:$0xff]  ;;  %v465_v9 = vld [vmem:[%s17562_s1 + $0x60] sm:$0xff]  ;;  %s14941_s20 = smov 1  }
  0x17   : > { %13751 = vmatpush3.bf16.msra.mxu1 %v15087_v32  ;;  %17720 = vst [vmem:[#allocation7_spill] sm:$0xff] %v15126_v49  ;;  %v561_v55 = vand.u32 4294901760, %v478_v40  ;;  %v15146_v59 = vsub.f32 %v457_v17, %v498_v26  ;;  %v15148_v60 = vsub.f32 %v458_v18, %v501_v27  ;;  %v510_v61 = vand.u32 4294901760, %v461_v45  ;;  %v466_v10 = vld [vmem:[%s17562_s1 + $0x68] sm:$0xff]  ;;  %v449_v27 = vld [vmem:[%s15176_s26] sm:$0xff]  ;;  %s14942_s27 = smov 127  }
  0x18   : > { %13753 = vmatprep.subr.bf16.mxu1 %v15103_v38  ;;  %17721 = vst [vmem:[#allocation8_spill] sm:$0xff] %v15134_v53  ;;  %v513_v62 = vand.u32 4294901760, %v462_v46  ;;  %v15156_v1 = vsub.f32 %v475_v21, %v552_v33  ;;  %v15158_v2 = vsub.f32 %v476_v28, %v555_v43  ;;  %v15160_v3 = vpack.c.bf16 %v507_v50, %v504_v44  ;;  %v450_v26 = vld [vmem:[%s15176_s26 + $0x8] sm:$0xff]  ;;  %s14943_s17 = smov 113  }
  0x19   : > { %v15162_v4 = vsub.f32 %v459_v29, %v504_v44  ;;  %v564_v5 = vand.u32 4294901760, %v479_v51  ;;  %v567_v6 = vand.u32 4294901760, %v480_v56  ;;  %v516_v7 = vand.u32 4294901760, %v463_v57 }
  0x1a   : > { %17722 = vst [vmem:[#allocation9_spill] sm:$0xff] %v15160_v3  ;;  %v519_v8 = vand.u32 4294901760, %v464_v58  ;;  %v15179_v11 = vsub.f32 %v460_v34, %v507_v50  ;;  %v15181_v12 = vpack.c.bf16 %v561_v55, %v558_v54  ;;  %v570_v13 = vand.u32 4294901760, %v481_v63  ;;  %v15226_v50 = vld [vmem:[%s17562_s1 + $0x70] sm:$0xff] }
  0x1b   : > { %13755 = vmatpush3.bf16.msra.mxu1 %v15126_v49  ;;  %v573_v14 = vand.u32 4294901760, %v482_v0  ;;  %v15183_v16 = vsub.f32 %v477_v39, %v558_v54  ;;  %v15185_v17 = vsub.f32 %v478_v40, %v561_v55  ;;  %v15187_v18 = vpack.c.bf16 %v513_v62, %v510_v61  ;;  %v483_v39 = vld [vmem:[%s17562_s1 + $0xf0] sm:$0xff]  ;;  %v15212_v40 = vld [vmem:[%s17562_s1 + $0xf8] sm:$0xff] }
  0x1c   : > { %13757 = vmatprep.subr.bf16.mxu1 %v15134_v53  ;;  %17723 = vst [vmem:[#allocation10_spill] sm:$0xff] %v15181_v12  ;;  %v15189_v21 = vsub.f32 %v461_v45, %v510_v61  ;;  %v15191_v22 = vsub.f32 %v462_v46, %v513_v62  ;;  %v15193_v23 = vpack.c.bf16 %v567_v6, %v564_v5  ;;  %v522_v24 = vand.u32 4294901760, %v465_v9 }
  0x1d   : > { %17724 = vst [vmem:[#allocation11_spill] sm:$0xff] %v15187_v18  ;;  %v525_v25 = vand.u32 4294901760, %v466_v10  ;;  %v15198_v28 = vsub.f32 %v479_v51, %v564_v5  ;;  %v15200_v29 = vsub.f32 %v480_v56, %v567_v6  ;;  %v15202_v33 = vpack.c.bf16 %v519_v8, %v516_v7  ;;  %v15231_v51 = vld [vmem:[%s17562_s1 + $0x78] sm:$0xff] }
  0x1e   : > { %17725 = vst [vmem:[#allocation12_spill] sm:$0xff] %v15193_v23  ;;  %v15204_v34 = vsub.f32 %v463_v57, %v516_v7  ;;  %v15215_v43 = vsub.f32 %v464_v58, %v519_v8  ;;  %v15217_v44 = vpack.c.bf16 %v573_v14, %v570_v13  ;;  %v15219_v45 = vsub.f32 %v481_v63, %v570_v13 }
  0x1f   : > { %13759 = vmatpush3.bf16.msra.mxu1 %v15160_v3  ;;  %17726 = vst [vmem:[#allocation13_spill] sm:$0xff] %v15202_v33  ;;  %v15221_v46 = vsub.f32 %v482_v0, %v573_v14  ;;  %v15233_v54 = vand.u32 4294901760, %v450_v26  ;;  %v15235_v55 = vand.u32 4294901760, %v449_v27  ;;  %v17575_v56 = vand.u32 4294901760, %v15082_v30 }
  0x20   : > { %13761 = vmatprep.subr.bf16.mxu1 %v15181_v12  ;;  %17727 = vst [vmem:[#allocation14_spill] sm:$0xff] %v15217_v44  ;;  %v17576_v57 = vand.u32 4294901760, %v15084_v31  ;;  %v15239_v58 = vpack.c.bf16 %v525_v25, %v522_v24  ;;  %v15241_v61 = vsub.f32 %v465_v9, %v522_v24  ;;  %v576_v62 = vand.u32 4294901760, %v483_v39 }
  0x21   : > { %17728 = vst [vmem:[#allocation15_spill] sm:$0xff] %v15233_v54  ;;  %17729 = vst [vmem:[#allocation16_spill] sm:$0xff] %v15235_v55  ;;  %v17579_v63 = vand.u32 4294901760, %v15212_v40  ;;  %v15248_v6 = vsub.f32 %v450_v26, %v15233_v54  ;;  %v15251_v7 = vsub.f32 %v449_v27, %v15235_v55  ;;  %v728_v8 = vsub.f32 %v15082_v30, %v17575_v56 }
  0x22   : > { %17730 = vst [vmem:[#allocation17_spill] sm:$0xff] %v15239_v58  ;;  %v735_v9 = vsub.f32 %v15084_v31, %v17576_v57  ;;  %v17582_v13 = vand.u32 4294901760, %v15097_v35  ;;  %v17583_v14 = vand.u32 4294901760, %v15099_v36  ;;  %v17594_v5 = vand.u32 4294901760, %v15111_v41 }
  0x23   : > { %13763 = vmatpush3.bf16.msra.mxu1 %v15187_v18  ;;  %17731 = vst [vmem:[#allocation18_spill] sm:$0xff] %v15248_v6  ;;  %17732 = vst [vmem:[#allocation19_spill] sm:$0xff] %v15251_v7  ;;  %v15263_v24 = vand.u32 4294901760, %v15248_v6  ;;  %v15266_v26 = vand.u32 4294901760, %v15251_v7  ;;  %1931 = vmatprep.mubr.f32.mxu0 %v15248_v6  ;;  %v15271_v56 = vsub.f32 %v466_v10, %v525_v25  ;;  %v17737_v25 = vand.u32 4294901760, %v15101_v37 }
  0x24   : > { %13765 = vmatprep.subr.bf16.mxu1 %v15193_v23  ;;  %v15275_v57 = vpack.c.bf16 %v17579_v63, %v576_v62  ;;  %v616_v0 = vsub.f32 %v15097_v35, %v17582_v13  ;;  %v623_v23 = vsub.f32 %v15099_v36, %v17583_v14  ;;  %v15284_v27 = vsub.f32 %v483_v39, %v576_v62 }
  0x25   : > { %17733 = vst [vmem:[#allocation20_spill] sm:$0xff] %v15263_v24  ;;  %17734 = vst [vmem:[#allocation21_spill] sm:$0xff] %v15266_v26  ;;  %v584_v10 = vsub.f32 %v15248_v6, %v15263_v24  ;;  %v742_v63 = vsub.f32 %v15101_v37, %v17737_v25  ;;  %v749_v18 = vsub.f32 %v15111_v41, %v17594_v5  ;;  %v17738_v13 = vand.u32 4294901760, %v15226_v50 }
  0x26   : > { %17735 = vst [vmem:[#allocation22_spill] sm:$0xff] %v15275_v57  ;;  %17736 = vst [vmem:[#allocation23_spill] sm:$0xff] %v15284_v27  ;;  %v17739_v14 = vand.u32 4294901760, %v15231_v51  ;;  %v729_v39 = vand.u32 4294901760, %v728_v8  ;;  %v736_v62 = vand.u32 4294901760, %v735_v9  ;;  %v17601_v12 = vand.u32 4294901760, %v15113_v42 }
  0x27   : > { %13767 = vmatpush3.bf16.msra.mxu1 %v15202_v33  ;;  %v15302_v3 = vand.u32 4294901760, %v584_v10  ;;  %v590_v25 = vsub.f32 %v15251_v7, %v15266_v26  ;;  %v617_v53 = vand.u32 4294901760, %v616_v0  ;;  %v624_v49 = vand.u32 4294901760, %v623_v23 }
  0x28   : > { %13769 = vmatprep.subr.bf16.mxu1 %v15217_v44  ;;  %v15299_v33 = vpack.c.bf16 %v17739_v14, %v17738_v13  ;;  %v743_v5 = vand.u32 4294901760, %v742_v63  ;;  %v750_v38 = vand.u32 4294901760, %v749_v18  ;;  %v17602_v44 = vand.u32 4294901760, %v15122_v47 }
  0x29   : > { %17741 = vst [vmem:[#allocation25_spill] sm:$0xff] %v15302_v3  ;;  %v17605_v24 = vand.u32 4294901760, %v15124_v48  ;;  %586 = vmatprep.mubr.f32.mxu1 %v15302_v3  ;;  %v630_v8 = vsub.f32 %v15113_v42, %v17601_v12  ;;  %v17608_v9 = vand.u32 4294901760, %v15132_v52  ;;  %v17611_v13 = vand.u32 4294901760, %v15146_v59 }
  0x2a   : > { %17740 = vst [vmem:[#allocation24_spill] sm:$0xff] %v15299_v33  ;;  %v17612_v23 = vand.u32 4294901760, %v15148_v60  ;;  %v13776_v18 = vpack.c.bf16 %v736_v62, %v729_v39  ;;  %v637_v63 = vsub.f32 %v15122_v47, %v17602_v44  ;;  %v17619_v14 = vand.u32 4294901760, %v15156_v1 }
  0x2b   : > { %13771 = vmatpush3.bf16.msra.mxu1 %v15239_v58  ;;  %v756_v0 = vsub.f32 %v15124_v48, %v17605_v24  ;;  %v763_v10 = vsub.f32 %v15132_v52, %v17608_v9  ;;  %v644_v12 = vsub.f32 %v15146_v59, %v17611_v13  ;;  %v17625_v62 = vand.u32 4294901760, %v15158_v2 }
  0x2c   : > { %13773 = vmatprep.subr.bf16.mxu1 %v15275_v57  ;;  %v651_v39 = vsub.f32 %v15148_v60, %v17612_v23  ;;  %v15334_v44 = vand.u32 4294901760, %v590_v25  ;;  %v13778_v3 = vpack.c.bf16 %v624_v49, %v617_v53  ;;  %v770_v24 = vsub.f32 %v15156_v1, %v17619_v14 }
  0x2d   : > { %v17623_v26 = vand.u32 4294901760, %v15162_v4  ;;  %v13780_v9 = vpack.c.bf16 %v750_v38, %v743_v5  ;;  %v631_v57 = vand.u32 4294901760, %v630_v8  ;;  %v638_v13 = vand.u32 4294901760, %v637_v63 }
  0x2e   : > { %17742 = vst [vmem:[#allocation26_spill] sm:$0xff] %v15334_v44  ;;  %v777_v23 = vsub.f32 %v15158_v2, %v17625_v62  ;;  %v757_v58 = vand.u32 4294901760, %v756_v0  ;;  %v764_v25 = vand.u32 4294901760, %v763_v10  ;;  %v645_v32 = vand.u32 4294901760, %v644_v12 }
  0x2f   : > { %13775 = vmatpush3.bf16.msra.mxu1 %v15299_v33  ;;  %v17620_v49 = vand.u32 4294901760, %v15179_v11  ;;  %v652_v53 = vand.u32 4294901760, %v651_v39  ;;  %v771_v20 = vand.u32 4294901760, %v770_v24  ;;  %v658_v14 = vsub.f32 %v15162_v4, %v17623_v26 }
  0x30   : > { %13777 = vmatprep.subr.bf16.mxu1 %v13776_v18  ;;  %v17621_v38 = vand.u32 4294901760, %v15183_v16  ;;  %v778_v5 = vand.u32 4294901760, %v777_v23  ;;  %v17622_v18 = vand.u32 4294901760, %v15185_v17  ;;  %v17624_v12 = vand.u32 4294901760, %v15189_v21 }
  0x31   : > { %v665_v8 = vsub.f32 %v15179_v11, %v17620_v49  ;;  %v13782_v63 = vpack.c.bf16 %v638_v13, %v631_v57  ;;  %v17626_v0 = vand.u32 4294901760, %v15191_v22  ;;  %v17627_v10 = vand.u32 4294901760, %v15198_v28 }
  0x32   : > { %592 = vmatmul.mubr.f32.vlgmr.msra.gmra.mrb[0].mxu1 %v15334_v44  ;;  %v784_v24 = vsub.f32 %v15183_v16, %v17621_v38  ;;  %v13784_v23 = vpack.c.bf16 %v764_v25, %v757_v58  ;;  %v791_v39 = vsub.f32 %v15185_v17, %v17622_v18  ;;  %v672_v49 = vsub.f32 %v15189_v21, %v17624_v12 }
  0x33   : > { %13779 = vmatpush3.bf16.msra.mxu1 %v13778_v3  ;;  %v17628_v3 = vand.u32 4294901760, %v15200_v29  ;;  %v17743_v57 = vand.u32 4294901760, %v15212_v40  ;;  %v13786_v38 = vpack.c.bf16 %v652_v53, %v645_v32  ;;  %v679_v58 = vsub.f32 %v15191_v22, %v17626_v0 }
  0x34   : > { %13781 = vmatprep.subr.bf16.mxu1 %v13780_v9  ;;  %v17631_v9 = vand.u32 4294901760, %v15204_v34  ;;  %v13788_v25 = vpack.c.bf16 %v778_v5, %v771_v20  ;;  %v659_v18 = vand.u32 4294901760, %v658_v14  ;;  %v666_v26 = vand.u32 4294901760, %v665_v8  ;;  %v452_v5 = vld [vmem:[%s15176_s26 + $0x18] sm:$0xff]  ;;  %v451_v8 = vld [vmem:[%s15176_s26 + $0x10] sm:$0xff] }
  0x35   : > { %v15370_v13 = vsub.f32 %v15212_v40, %v17743_v57  ;;  %v798_v12 = vsub.f32 %v15198_v28, %v17627_v10  ;;  %v785_v62 = vand.u32 4294901760, %v784_v24  ;;  %v792_v40 = vand.u32 4294901760, %v791_v39 }
  0x36   : > { %v805_v32 = vsub.f32 %v15200_v29, %v17628_v3  ;;  %v17634_v53 = vand.u32 4294901760, %v15215_v43  ;;  %v673_v57 = vand.u32 4294901760, %v672_v49  ;;  %v680_v0 = vand.u32 4294901760, %v679_v58 }
  0x37   : > { %13783 = vmatpush3.bf16.msra.mxu1 %v13782_v63  ;;  %v17744_v10 = vand.u32 4294901760, %v15226_v50  ;;  %v17745_v24 = vand.u32 4294901760, %v15231_v51  ;;  %v686_v49 = vsub.f32 %v15204_v34, %v17631_v9  ;;  %v13790_v58 = vpack.c.bf16 %v666_v26, %v659_v18 }
  0x38   : > { %13785 = vmatprep.subr.bf16.mxu1 %v13784_v23  ;;  %v693_v23 = vsub.f32 %v15215_v43, %v17634_v53  ;;  %v799_v3 = vand.u32 4294901760, %v798_v12  ;;  %v17635_v14 = vand.u32 4294901760, %v15241_v61  ;;  %v806_v20 = vand.u32 4294901760, %v805_v32 }
  0x39   : > { %v15390_v63 = vsub.f32 %v15226_v50, %v17744_v10  ;;  %v15395_v39 = vsub.f32 %v15231_v51, %v17745_v24  ;;  %v17636_v50 = vand.u32 4294901760, %v15271_v56  ;;  %v13792_v10 = vpack.c.bf16 %v792_v40, %v785_v62 }
  0x3a   : > { %v15405_v44 = vand.u32 4294901760, %v452_v5  ;;  %v15407_v51 = vand.u32 4294901760, %v451_v8  ;;  %v13794_v24 = vpack.c.bf16 %v680_v0, %v673_v57  ;;  %v17748_v9 = vand.u32 4294901760, %v15219_v45 }
  0x3b   : > { %13787 = vmatpush3.bf16.msra.mxu1 %v13786_v38  ;;  %v17749_v26 = vand.u32 4294901760, %v15221_v46  ;;  %v825_v12 = vand.u32 4294901760, %v15284_v27  ;;  %v687_v53 = vand.u32 4294901760, %v686_v49  ;;  %v694_v38 = vand.u32 4294901760, %v693_v23 }
  0x3c   : > { %17746 = vst [vmem:[#allocation27_spill] sm:$0xff] %v15405_v44  ;;  %17747 = vst [vmem:[#allocation28_spill] sm:$0xff] %v15407_v51  ;;  %13789 = vmatprep.subr.bf16.mxu1 %v13788_v25  ;;  %v812_v33 = vsub.f32 %v15219_v45, %v17748_v9  ;;  %v15417_v62 = vsub.f32 %v452_v5, %v15405_v44  ;;  %v15420_v40 = vsub.f32 %v451_v8, %v15407_v51  ;;  %vm4629_vm1 = vcmask 138240  }
  0x3d   : > { %v819_v18 = vsub.f32 %v15221_v46, %v17749_v26  ;;  %v700_v0 = vsub.f32 %v15241_v61, %v17635_v14  ;;  %v707_v9 = vsub.f32 %v15271_v56, %v17636_v50  ;;  %v826_v25 = vsub.f32 %v15284_v27, %v825_v12 }
  0x3e   : > { %v832_v32 = vand.u32 4294901760, %v15370_v13  ;;  %v15431_v57 = vand.u32 4294901760, %v15417_v62  ;;  %v15434_v5 = vand.u32 4294901760, %v15420_v40  ;;  %v713_v8 = vand.u32 4294901760, %v15390_v63 }
  0x3f   : > { %13791 = vmatpush3.bf16.msra.mxu1 %v13790_v58  ;;  %v720_v49 = vand.u32 4294901760, %v15395_v39  ;;  %v13796_v23 = vpack.c.bf16 %v806_v20, %v799_v3  ;;  %v813_v26 = vand.u32 4294901760, %v812_v33  ;;  %v820_v14 = vand.u32 4294901760, %v819_v18 }
  0x40   : > { %13793 = vmatprep.subr.bf16.mxu1 %v13792_v10  ;;  %v833_v50 = vsub.f32 %v15370_v13, %v832_v32  ;;  %v13798_v19 = vpack.c.bf16 %v694_v38, %v687_v53  ;;  %v599_v58 = vsub.f32 %v15417_v62, %v15431_v57  ;;  %v605_v7 = vsub.f32 %v15420_v40, %v15434_v5 }
  0x41   : > { %v701_v15 = vand.u32 4294901760, %v700_v0  ;;  %v708_v27 = vand.u32 4294901760, %v707_v9  ;;  %v827_v6 = vand.u32 4294901760, %v826_v25  ;;  %v714_v51 = vsub.f32 %v15390_v63, %v713_v8 }
  0x42   : > { %v15444_v44 = vand.u32 4294901760, %v599_v58  ;;  %v15446_v3 = vand.u32 4294901760, %v605_v7  ;;  %v834_v33 = vand.u32 4294901760, %v833_v50  ;;  %v721_v20 = vsub.f32 %v15395_v39, %v720_v49 }
  0x43   : > { %13795 = vmatpush3.bf16.msra.mxu1 %v13794_v24  ;;  %v13800_v53 = vpack.c.bf16 %v820_v14, %v813_v26  ;;  %v13802_v10 = vpack.c.bf16 %v708_v27, %v701_v15  ;;  %v715_v38 = vand.u32 4294901760, %v714_v51  ;;  %v17752_v24 = vand.u32 4294901760, %v15082_v30 }
  0x44   : > { %17750 = vst [vmem:[#allocation29_spill] sm:$0xff] %v15444_v44  ;;  %17751 = vst [vmem:[#allocation30_spill] sm:$0xff] %v15446_v3  ;;  %13797 = vmatprep.subr.bf16.mxu1 %v13796_v23  ;;  %601 = vmatprep.mubr.f32.mxu1 %v15444_v44  ;;  %v13804_v18 = vpack.c.bf16 %v834_v33, %v827_v6  ;;  %v722_v0 = vand.u32 4294901760, %v721_v20  ;;  %v17753_v7 = vand.u32 4294901760, %v15084_v31  ;;  %v17754_v14 = vand.u32 4294901760, %v15097_v35 }
  0x45   : > { %607 = vmatmul.mubr.f32.gmra.mrb[2].mxu1 %v15446_v3  ;;  %v17755_v9 = vand.u32 4294901760, %v15099_v36  ;;  %v17757_v6 = vand.u32 4294901760, %v15111_v41  ;;  %v17758_v51 = vand.u32 4294901760, %v15113_v42  ;;  %v17759_v25 = vand.u32 4294901760, %v15122_v47 }
  0x46   : > { %837 = vmatprep.mubr.f32.mxu1 %v15233_v54  ;;  %v15456_v50 = vpack.c.bf16 %v17753_v7, %v17752_v24  ;;  %v17760_v26 = vand.u32 4294901760, %v15124_v48  ;;  %v17761_v58 = vand.u32 4294901760, %v15132_v52  ;;  %v17763_v20 = vand.u32 4294901760, %v15146_v59 }
  0x47   : > { %13799 = vmatpush3.bf16.msra.mxu1 %v13798_v19  ;;  %v15462_v15 = vpack.c.bf16 %v17755_v9, %v17754_v14  ;;  %v17756_v19 = vand.u32 4294901760, %v15101_v37  ;;  %v15474_v23 = vpack.c.bf16 %v17759_v25, %v17758_v51  ;;  %v17766_v7 = vand.u32 4294901760, %v15156_v1 }
  0x48   : > { %13801 = vmatprep.subr.bf16.mxu1 %v13800_v53  ;;  %v15480_v33 = vpack.c.bf16 %v17761_v58, %v17760_v26  ;;  %v17764_v53 = vand.u32 4294901760, %v15148_v60  ;;  %v17767_v14 = vand.u32 4294901760, %v15158_v2  ;;  %v17772_v25 = vand.u32 4294901760, %v15183_v16 }
  0x49   : > { %v15468_v27 = vpack.c.bf16 %v17757_v6, %v17756_v19  ;;  %v17769_v19 = vand.u32 4294901760, %v15162_v4  ;;  %v17770_v6 = vand.u32 4294901760, %v15179_v11  ;;  %v17773_v26 = vand.u32 4294901760, %v15185_v17 }
  0x4a   : > { %17762 = vst [vmem:[#allocation31_spill] sm:$0xff] %v15480_v33  ;;  %v15486_v24 = vpack.c.bf16 %v17764_v53, %v17763_v20  ;;  %v15492_v9 = vpack.c.bf16 %v17767_v14, %v17766_v7  ;;  %v17775_v20 = vand.u32 4294901760, %v15189_v21  ;;  %v17776_v53 = vand.u32 4294901760, %v15191_v22 }
  0x4b   : > { %v15498_v51 = vpack.c.bf16 %v17770_v6, %v17769_v19  ;;  %v15504_v58 = vpack.c.bf16 %v17773_v26, %v17772_v25  ;;  %v17778_v7 = vand.u32 4294901760, %v15198_v28  ;;  %v17779_v14 = vand.u32 4294901760, %v15200_v29  ;;  %13803 = vmatpush3.bf16.msra.mxu1 %v13802_v10  ;;  %v15550_v10 = vld [vmem:[%s17564_s3 + $0x88] sm:$0xff] }
  0x4c   : > { %17765 = vst [vmem:[#allocation32_spill] sm:$0xff] %v15486_v24  ;;  %17768 = vst [vmem:[#allocation33_spill] sm:$0xff] %v15492_v9  ;;  %v15510_v3 = vpack.c.bf16 %v17776_v53, %v17775_v20  ;;  %v17781_v19 = vand.u32 4294901760, %v15204_v34  ;;  %v17782_v6 = vand.u32 4294901760, %v15215_v43  ;;  %v17784_v25 = vand.u32 4294901760, %v15219_v45  ;;  %13805 = vmatprep.subr.bf16.mxu1 %v13804_v18 }
  0x4d   : > { %17771 = vst [vmem:[#allocation34_spill] sm:$0xff] %v15498_v51  ;;  %17774 = vst [vmem:[#allocation35_spill] sm:$0xff] %v15504_v58  ;;  %v15516_v44 = vpack.c.bf16 %v17779_v14, %v17778_v7  ;;  %v17785_v26 = vand.u32 4294901760, %v15221_v46  ;;  %v13806_v20 = vpack.c.bf16 %v722_v0, %v715_v38  ;;  %v17787_v53 = vand.u32 4294901760, %v15241_v61 }
  0x4e   : > { %17777 = vst [vmem:[#allocation36_spill] sm:$0xff] %v15510_v3  ;;  %v15522_v51 = vpack.c.bf16 %v17782_v6, %v17781_v19  ;;  %v17788_v3 = vand.u32 4294901760, %v15271_v56  ;;  %v15536_v14 = vpack.c.bf16 %v832_v32, %v825_v12  ;;  %v13808_v19 = vpack.c.bf16 %v15084_v31, %v15082_v30  ;;  %v15545_v6 = vld [vmem:[%s17564_s3 + $0x80] sm:$0xff]  ;;  %v15562_v30 = vld [vmem:[%s17564_s3 + $0x8] sm:$0xff] }
  0x4f   : > { %17780 = vst [vmem:[#allocation37_spill] sm:$0xff] %v15516_v44  ;;  %v15528_v58 = vpack.c.bf16 %v17785_v26, %v17784_v25  ;;  %v15538_v44 = vpack.c.bf16 %v720_v49, %v713_v8  ;;  %v17656_v12 = vand.u32 4294901760, %v15550_v10  ;;  %v15557_v32 = vld [vmem:[%s17564_s3] sm:$0xff]  ;;  %13807 = vmatpush3.bf16.msra.mxu1 %v13806_v20  ;;  %v13810_v31 = vpack.c.bf16 %v15099_v36, %v15097_v35  ;;  %v15585_v35 = vld [vmem:[%s17564_s3 + $0x90] sm:$0xff]  ;;  %v15590_v36 = vld [vmem:[%s17564_s3 + $0x98] sm:$0xff] }
  0x50   : > { %17783 = vst [vmem:[#allocation38_spill] sm:$0xff] %v15522_v51  ;;  %v15534_v7 = vpack.c.bf16 %v17788_v3, %v17787_v53  ;;  %17790 = vst [vmem:[#allocation41_spill] sm:$0xff] %v15536_v14  ;;  %v17661_v3 = vand.u32 4294901760, %v15545_v6  ;;  %v17655_v8 = vand.u32 4294901760, %v15557_v32  ;;  %v17654_v49 = vand.u32 4294901760, %v15562_v30  ;;  %13809 = vmatprep.subr.bf16.mxu1 %v13808_v19  ;;  %v15598_v25 = vld [vmem:[%s17564_s3 + $0x10] sm:$0xff] }
  0x51   : > { %17786 = vst [vmem:[#allocation39_spill] sm:$0xff] %v15528_v58  ;;  %17791 = vst [vmem:[#allocation42_spill] sm:$0xff] %v15538_v44  ;;  %v13812_v18 = vpack.c.bf16 %v15111_v41, %v15101_v37  ;;  %v17660_v37 = vand.u32 4294901760, %v15585_v35  ;;  %v17659_v41 = vand.u32 4294901760, %v15590_v36  ;;  %v15603_v26 = vld [vmem:[%s17564_s3 + $0x18] sm:$0xff]  ;;  %v17794_v20 = vld [vmem:[#allocation27_spill] sm:$0xff]  ;;  %v13814_v53 = vpack.c.bf16 %v15122_v47, %v15113_v42 }
  0x52   : > { %17789 = vst [vmem:[#allocation40_spill] sm:$0xff] %v15534_v7  ;;  %v15574_v38 = vpack.c.bf16 %v17656_v12, %v17661_v3  ;;  %v15580_v0 = vpack.c.bf16 %v17654_v49, %v17655_v8  ;;  %839 = vmatmul.mubr.f32.vlgmr.msra.gmra.mrb[4].mxu1 %v15235_v55  ;;  %v17658_v19 = vand.u32 4294901760, %v15598_v25  ;;  %v17657_v49 = vand.u32 4294901760, %v15603_v26  ;;  %v15627_v42 = vld [vmem:[%s17564_s3 + $0xa0] sm:$0xff]  ;;  %v15632_v47 = vld [vmem:[%s17564_s3 + $0xa8] sm:$0xff] }
  0x53   : > { %13811 = vmatpush3.bf16.msra.mxu1 %v13810_v31  ;;  %844 = vmatprep.mubr.f32.mxu1 %v17794_v20  ;;  %v13816_v8 = vpack.c.bf16 %v15132_v52, %v15124_v48  ;;  %v15616_v12 = vpack.c.bf16 %v17659_v41, %v17660_v37  ;;  %v17797_v48 = vld [vmem:[#allocation28_spill] sm:$0xff]  ;;  %v13818_v41 = vpack.c.bf16 %v15148_v60, %v15146_v59  ;;  %v17798_v37 = vld [vmem:[#allocation18_spill] sm:$0xff]  ;;  %v1426_v60 = vld [vmem:[%s17564_s3 + $0xb8] sm:$0xff]  ;;  %vm5793_vm4 = vcmask 121856  }
  0x54   : > { %17792 = vst [vmem:[#allocation43_spill] sm:$0xff] %v15574_v38  ;;  %17793 = vst [vmem:[#allocation44_spill] sm:$0xff] %v15580_v0  ;;  %13813 = vmatprep.subr.bf16.mxu1 %v13812_v18  ;;  %v15622_v31 = vpack.c.bf16 %v17657_v49, %v17658_v19  ;;  %v15640_v49 = vld [vmem:[%s17564_s3 + $0x20] sm:$0xff]  ;;  %v15645_v19 = vld [vmem:[%s17564_s3 + $0x28] sm:$0xff]  ;;  %v13820_v52 = vpack.c.bf16 %v15158_v2, %v15156_v1  ;;  %vm6369_vm7 = vcmask 7168   ;;  %vm7502_vm8 = vcmask 1039360  }
  0x55   : > { %17795 = vst [vmem:[#allocation45_spill] sm:$0xff] %v15616_v12  ;;  %v1448_v3 = vand.u32 4294901760, %v15640_v49  ;;  %v1451_v18 = vand.u32 4294901760, %v15645_v19  ;;  %v17800_v12 = vand.u32 4294901760, %v15632_v47  ;;  %v1425_v59 = vld [vmem:[%s17564_s3 + $0xb0] sm:$0xff]  ;;  %v1410_v2 = vld [vmem:[%s17564_s3 + $0x38] sm:$0xff] }
  0x56   : > { %17796 = vst [vmem:[#allocation46_spill] sm:$0xff] %v15622_v31  ;;  %846 = vmatmul.mubr.f32.gmra.mrb[6].mxu1 %v17797_v48  ;;  %v17799_v31 = vand.u32 4294901760, %v15627_v42  ;;  %v1409_v1 = vld [vmem:[%s17564_s3 + $0x30] sm:$0xff]  ;;  %v1427_v20 = vld [vmem:[%s17564_s3 + $0xc0] sm:$0xff]  ;;  %v17805_v14 = vld [vmem:[#allocation23_spill] sm:$0xff]  ;;  %vm8078_vm9 = vcmask 924672  }
  0x57   : > { %13815 = vmatpush3.bf16.msra.mxu1 %v13814_v53  ;;  %981 = vmatprep.mubr.f32.mxu1 %v17798_v37  ;;  %v15660_v53 = vpack.c.bf16 %v1451_v18, %v1448_v3  ;;  %v1505_v37 = vand.u32 4294901760, %v1426_v60  ;;  %v13836_v7 = vpack.c.bf16 %v15370_v13, %v17805_v14  ;;  %v17810_v13 = vand.u32 4294901760, %v15557_v32 }
  0x58   : > { %13817 = vmatprep.subr.bf16.mxu1 %v13816_v8  ;;  %v15658_v0 = vpack.c.bf16 %v17800_v12, %v17799_v31  ;;  %v1502_v8 = vand.u32 4294901760, %v1425_v59  ;;  %v13822_v12 = vpack.c.bf16 %v15179_v11, %v15162_v4  ;;  %v1454_v31 = vand.u32 4294901760, %v1409_v1 }
  0x59   : > { %17802 = vst [vmem:[#allocation48_spill] sm:$0xff] %v15660_v53  ;;  %v1457_v53 = vand.u32 4294901760, %v1410_v2  ;;  %v13826_v4 = vpack.c.bf16 %v15191_v22, %v15189_v21  ;;  %v1508_v11 = vand.u32 4294901760, %v1427_v20  ;;  %v13832_v21 = vpack.c.bf16 %v15221_v46, %v15219_v45 }
  0x5a   : > { %17801 = vst [vmem:[#allocation47_spill] sm:$0xff] %v15658_v0  ;;  %v13824_v0 = vpack.c.bf16 %v15185_v17, %v15183_v16  ;;  %v15678_v38 = vpack.c.bf16 %v1505_v37, %v1502_v8  ;;  %v1411_v16 = vld [vmem:[%s17564_s3 + $0x40] sm:$0xff]  ;;  %v1412_v17 = vld [vmem:[%s17564_s3 + $0x48] sm:$0xff]  ;;  %v13834_v22 = vpack.c.bf16 %v15271_v56, %v15241_v61  ;;  %v1429_v56 = vld [vmem:[%s17564_s3 + $0xd0] sm:$0xff]  ;;  %v15731_v14 = vsub.f32 %v15557_v32, %v17810_v13 }
  0x5b   : > { %13819 = vmatpush3.bf16.msra.mxu1 %v13818_v41  ;;  %v15680_v48 = vpack.c.bf16 %v1457_v53, %v1454_v31  ;;  %v1428_v41 = vld [vmem:[%s17564_s3 + $0xc8] sm:$0xff]  ;;  %v1460_v55 = vand.u32 4294901760, %v1411_v16  ;;  %v1463_v44 = vand.u32 4294901760, %v1412_v17  ;;  %v1430_v61 = vld [vmem:[%s17564_s3 + $0xd8] sm:$0xff]  ;;  %v17813_v13 = vand.u32 4294901760, %v15590_v36 }
  0x5c   : > { %13821 = vmatprep.subr.bf16.mxu1 %v13820_v52  ;;  %17803 = vst [vmem:[#allocation49_spill] sm:$0xff] %v15678_v38  ;;  %v1511_v52 = vand.u32 4294901760, %v1428_v41  ;;  %v13830_v38 = vpack.c.bf16 %v15215_v43, %v15204_v34  ;;  %v17808_v43 = vand.u32 4294901760, %v15550_v10  ;;  %vm8654_vm10 = vcmask 916480  }
  0x5d   : > { %17804 = vst [vmem:[#allocation50_spill] sm:$0xff] %v15680_v48  ;;  %v13828_v48 = vpack.c.bf16 %v15200_v29, %v15198_v28  ;;  %v17807_v29 = vand.u32 4294901760, %v15545_v6  ;;  %v15720_v46 = vpack.c.bf16 %v1463_v44, %v1460_v55  ;;  %v17812_v28 = vand.u32 4294901760, %v15585_v35 }
  0x5e   : > { %v15706_v58 = vpack.c.bf16 %v1511_v52, %v1508_v11  ;;  %v15718_v45 = vsub.f32 %v15550_v10, %v17808_v43  ;;  %v1414_v43 = vld [vmem:[%s17564_s3 + $0x58] sm:$0xff]  ;;  %v15812_v33 = vsub.f32 %v1412_v17, %v1463_v44  ;;  %v15829_v44 = vld [vmem:[%s17564_s3 + $0x70] sm:$0xff]  ;;  %vm9230_vm11 = vcmask 908288  }
  0x5f   : > { %13823 = vmatpush3.bf16.msra.mxu1 %v13822_v12  ;;  %v15713_v34 = vsub.f32 %v15545_v6, %v17807_v29  ;;  %17809 = vst [vmem:[#allocation51_spill] sm:$0xff] %v15720_v46  ;;  %v17811_v6 = vand.u32 4294901760, %v15562_v30  ;;  %v1517_v12 = vand.u32 4294901760, %v1430_v61  ;;  %v1413_v29 = vld [vmem:[%s17564_s3 + $0x50] sm:$0xff]  ;;  %v15747_v32 = vsub.f32 %v15585_v35, %v17812_v28 }
  0x60   : > { %13825 = vmatprep.subr.bf16.mxu1 %v13824_v0  ;;  %17806 = vst [vmem:[#allocation23_spill] sm:$0xff] %v15706_v58  ;;  %v1514_v0 = vand.u32 4294901760, %v1429_v56  ;;  %v1469_v46 = vand.u32 4294901760, %v1414_v43  ;;  %v17814_v58 = vand.u32 4294901760, %v15598_v25  ;;  %v17816_v35 = vand.u32 4294901760, %v15627_v42 }
  0x61   : > { %v15736_v10 = vsub.f32 %v15562_v30, %v17811_v6  ;;  %v15752_v30 = vsub.f32 %v15590_v36, %v17813_v13  ;;  %v1466_v6 = vand.u32 4294901760, %v1413_v29  ;;  %v17818_v13 = vand.u32 4294901760, %v15632_v47 }
  0x62   : > { %v15757_v51 = vsub.f32 %v15598_v25, %v17814_v58  ;;  %v15767_v28 = vsub.f32 %v15627_v42, %v17816_v35  ;;  %v15769_v36 = vpack.c.bf16 %v1517_v12, %v1514_v0  ;;  %v15777_v58 = vsub.f32 %v15640_v49, %v1448_v3  ;;  %v1431_v42 = vld [vmem:[%s17564_s3 + $0xe0] sm:$0xff] }
  0x63   : > { %13827 = vmatpush3.bf16.msra.mxu1 %v13826_v4  ;;  %v17815_v4 = vand.u32 4294901760, %v15603_v26  ;;  %v15780_v25 = vsub.f32 %v15645_v19, %v1451_v18  ;;  %v15790_v35 = vsub.f32 %v1425_v59, %v1502_v8  ;;  %v1415_v49 = vld [vmem:[%s17564_s3 + $0x60] sm:$0xff]  ;;  %v1416_v19 = vld [vmem:[%s17564_s3 + $0x68] sm:$0xff]  ;;  %v15800_v18 = vsub.f32 %v1409_v1, %v1454_v31  ;;  %v15834_v31 = vld [vmem:[%s17564_s3 + $0x78] sm:$0xff] }
  0x64   : > { %13829 = vmatprep.subr.bf16.mxu1 %v13828_v48  ;;  %17817 = vst [vmem:[#allocation52_spill] sm:$0xff] %v15769_v36  ;;  %v15774_v48 = vsub.f32 %v15632_v47, %v17818_v13  ;;  %v15792_v47 = vsub.f32 %v1426_v60, %v1505_v37  ;;  %v1520_v13 = vand.u32 4294901760, %v1431_v42  ;;  %v1472_v36 = vand.u32 4294901760, %v1415_v49 }
  0x65   : > { %v15762_v9 = vsub.f32 %v15603_v26, %v17815_v4  ;;  %v15782_v26 = vpack.c.bf16 %v1469_v46, %v1466_v6  ;;  %v1432_v4 = vld [vmem:[%s17564_s3 + $0xe8] sm:$0xff]  ;;  %v1475_v59 = vand.u32 4294901760, %v1416_v19  ;;  %v15804_v37 = vsub.f32 %v1427_v20, %v1508_v11  ;;  %v1434_v20 = vld [vmem:[%s17564_s3 + $0xf8] sm:$0xff] }
  0x66   : > { %v1523_v3 = vand.u32 4294901760, %v1432_v4  ;;  %v15806_v60 = vsub.f32 %v1428_v41, %v1511_v52  ;;  %v15808_v8 = vsub.f32 %v1411_v16, %v1460_v55  ;;  %v15814_v54 = vsub.f32 %v1429_v56, %v1514_v0 }
  0x67   : > { %17819 = vst [vmem:[#allocation53_spill] sm:$0xff] %v15782_v26  ;;  %13831 = vmatpush3.bf16.msra.mxu1 %v13830_v38  ;;  %v15802_v26 = vsub.f32 %v1410_v2, %v1457_v53  ;;  %v15816_v38 = vsub.f32 %v1430_v61, %v1517_v12  ;;  %v15818_v1 = vpack.c.bf16 %v1475_v59, %v1472_v36  ;;  %v1433_v53 = vld [vmem:[%s17564_s3 + $0xf0] sm:$0xff]  ;;  %v1529_v2 = vand.u32 4294901760, %v1434_v20 }
  0x68   : > { %13833 = vmatprep.subr.bf16.mxu1 %v13832_v21  ;;  %v15810_v24 = vpack.c.bf16 %v1523_v3, %v1520_v13  ;;  %v1526_v55 = vand.u32 4294901760, %v1433_v53  ;;  %v17678_v41 = vand.u32 4294901760, %v15713_v34  ;;  %v17679_v11 = vand.u32 4294901760, %v15718_v45 }
  0x69   : > { %17821 = vst [vmem:[#allocation55_spill] sm:$0xff] %v15818_v1  ;;  %v15838_v52 = vsub.f32 %v1413_v29, %v1466_v6  ;;  %v15840_v16 = vsub.f32 %v1414_v43, %v1469_v46  ;;  %v17684_v17 = vand.u32 4294901760, %v15829_v44  ;;  %v17680_v21 = vand.u32 4294901760, %v15834_v31  ;;  %v17838_v1 = vld [vmem:[#allocation7_spill] sm:$0xff] }
  0x6a   : > { %17820 = vst [vmem:[#allocation54_spill] sm:$0xff] %v15810_v24  ;;  %v15844_v56 = vsub.f32 %v1431_v42, %v1520_v13  ;;  %v15846_v61 = vsub.f32 %v1432_v4, %v1523_v3  ;;  %v15848_v0 = vpack.c.bf16 %v1529_v2, %v1526_v55  ;;  %v1678_v12 = vsub.f32 %v15713_v34, %v17678_v41 }
  0x6b   : > { %13835 = vmatpush3.bf16.msra.mxu1 %v13834_v22  ;;  %v15857_v22 = vpack.c.bf16 %v17680_v21, %v17684_v17  ;;  %v17683_v46 = vand.u32 4294901760, %v15731_v14  ;;  %v17681_v29 = vand.u32 4294901760, %v15736_v10  ;;  %v15864_v43 = vsub.f32 %v1415_v49, %v1472_v36  ;;  %v17825_v36 = vld [vmem:[#allocation2_spill] sm:$0xff]  ;;  %v17828_v17 = vld [vmem:[#allocation3_spill] sm:$0xff] }
  0x6c   : > { %13837 = vmatprep.subr.bf16.mxu1 %v13836_v7  ;;  %17822 = vst [vmem:[#allocation56_spill] sm:$0xff] %v15848_v0  ;;  %v1685_v7 = vsub.f32 %v15718_v45, %v17679_v11  ;;  %v1679_v6 = vand.u32 4294901760, %v1678_v12  ;;  %v17682_v42 = vand.u32 4294901760, %v15747_v32  ;;  %v17685_v4 = vand.u32 4294901760, %v15752_v30 }
  0x6d   : > { %17823 = vst [vmem:[#allocation57_spill] sm:$0xff] %v15857_v22  ;;  %v17824_v13 = vpack.c.bf16 %v15395_v39, %v15390_v63  ;;  %v15871_v3 = vsub.f32 %v1416_v19, %v1475_v59  ;;  %v15873_v41 = vsub.f32 %v1433_v53, %v1526_v55  ;;  %v1566_v21 = vsub.f32 %v15731_v14, %v17683_v46 }
  0x6e   : > { %v1686_v11 = vand.u32 4294901760, %v1685_v7  ;;  %v1573_v49 = vsub.f32 %v15736_v10, %v17681_v29  ;;  %v1692_v63 = vsub.f32 %v15747_v32, %v17682_v42  ;;  %v1699_v39 = vsub.f32 %v15752_v30, %v17685_v4  ;;  %v17827_v7 = vld [vmem:[#allocation19_spill] sm:$0xff] }
  0x6f   : > { %13839 = vmatpush3.bf16.msra.mxu1 %v17824_v13  ;;  %v17686_v19 = vand.u32 4294901760, %v15757_v51  ;;  %v15889_v59 = vsub.f32 %v1434_v20, %v1529_v2  ;;  %v1567_v55 = vand.u32 4294901760, %v1566_v21  ;;  %v17687_v12 = vand.u32 4294901760, %v15762_v9 }
  0x70   : > { %13841 = vmatprep.subr.bf16.mxu1 %v17825_v36  ;;  %v15891_v53 = vpack.c.bf16 %v1686_v11, %v1679_v6  ;;  %v1574_v13 = vand.u32 4294901760, %v1573_v49  ;;  %v14000_v29 = vpack.c.bf16 %v15718_v45, %v15713_v34  ;;  %v1693_v42 = vand.u32 4294901760, %v1692_v63  ;;  %v17829_v6 = vld [vmem:[#allocation4_spill] sm:$0xff] }
  0x71   : > { %v1700_v46 = vand.u32 4294901760, %v1699_v39  ;;  %v14002_v20 = vpack.c.bf16 %v15736_v10, %v15731_v14  ;;  %v1580_v2 = vsub.f32 %v15757_v51, %v17686_v19  ;;  %v1587_v11 = vsub.f32 %v15762_v9, %v17687_v12 }
  0x72   : > { %17826 = vst [vmem:[#allocation2_spill] sm:$0xff] %v15891_v53  ;;  %984 = vmatmul.mubr.f32.vlgmr.msra.gmra.mrb[8].mxu1 %v17827_v7  ;;  %v17689_v21 = vand.u32 4294901760, %v15767_v28  ;;  %v15909_v49 = vpack.c.bf16 %v1574_v13, %v1567_v55  ;;  %14001 = vmatprep.subr.bf16.mxu0 %v14000_v29  ;;  %v17690_v39 = vand.u32 4294901760, %v15774_v48  ;;  %v17691_v4 = vand.u32 4294901760, %v15777_v58  ;;  %v17832_v13 = vld [vmem:[#allocation5_spill] sm:$0xff] }
  0x73   : > { %13843 = vmatpush3.bf16.msra.mxu1 %v17828_v17  ;;  %990 = vmatprep.mubr.f32.mxu1 %v15417_v62  ;;  %v15911_v63 = vpack.c.bf16 %v1700_v46, %v1693_v42  ;;  %v1581_v53 = vand.u32 4294901760, %v1580_v2  ;;  %v1588_v19 = vand.u32 4294901760, %v1587_v11  ;;  %v17693_v22 = vand.u32 4294901760, %v15780_v25 }
  0x74   : > { %13845 = vmatprep.subr.bf16.mxu1 %v17829_v6  ;;  %17830 = vst [vmem:[#allocation19_spill] sm:$0xff] %v15909_v49  ;;  %14003 = vmatpush3.bf16.msra.mxu0 %v14002_v20  ;;  %v1706_v12 = vsub.f32 %v15767_v28, %v17689_v21  ;;  %v14004_v29 = vpack.c.bf16 %v15752_v30, %v15747_v32  ;;  %v17694_v55 = vand.u32 4294901760, %v15790_v35  ;;  %v17833_v20 = vld [vmem:[#allocation20_spill] sm:$0xff]  ;;  %vm14947_vm12 = vmmov 0  }
  0x75   : > { %17831 = vst [vmem:[#allocation3_spill] sm:$0xff] %v15911_v63  ;;  %v1713_v46 = vsub.f32 %v15774_v48, %v17690_v39  ;;  %v1594_v42 = vsub.f32 %v15777_v58, %v17691_v4  ;;  %v15931_v2 = vpack.c.bf16 %v1588_v19, %v1581_v53  ;;  %v14006_v11 = vpack.c.bf16 %v15762_v9, %v15757_v51  ;;  %v17835_v63 = vld [vmem:[#allocation6_spill] sm:$0xff] }
  0x76   : > { %993 = vmatmul.mubr.f32.gmra.mrb[10].mxu1 %v15420_v40  ;;  %v1707_v21 = vand.u32 4294901760, %v1706_v12  ;;  %v1601_v39 = vsub.f32 %v15780_v25, %v17693_v22  ;;  %14005 = vmatprep.subr.bf16.mxu0 %v14004_v29  ;;  %v1720_v0 = vsub.f32 %v15790_v35, %v17694_v55  ;;  %v17696_v19 = vand.u32 4294901760, %v15792_v47 }
  0x77   : > { %13847 = vmatpush3.bf16.msra.mxu1 %v17832_v13  ;;  %1097 = vmatprep.mubr.f32.mxu1 %v17833_v20  ;;  %17834 = vst [vmem:[#allocation4_spill] sm:$0xff] %v15931_v2  ;;  %v1714_v4 = vand.u32 4294901760, %v1713_v46  ;;  %v1595_v49 = vand.u32 4294901760, %v1594_v42  ;;  %v17836_v53 = vand.u32 4294901760, %v15829_v44  ;;  %v17697_v22 = vand.u32 4294901760, %v15800_v18 }
  0x78   : > { %13849 = vmatprep.subr.bf16.mxu1 %v17835_v63  ;;  %14007 = vmatpush3.bf16.msra.mxu0 %v14006_v11  ;;  %v1602_v12 = vand.u32 4294901760, %v1601_v39  ;;  %v17698_v2 = vand.u32 4294901760, %v15802_v26  ;;  %v14008_v46 = vpack.c.bf16 %v15774_v48, %v15767_v28  ;;  %v1721_v42 = vand.u32 4294901760, %v1720_v0  ;;  %v17840_v0 = vld [vmem:[#allocation8_spill] sm:$0xff] }
  0x79   : > { %v15946_v20 = vsub.f32 %v15829_v44, %v17836_v53  ;;  %v15950_v29 = vpack.c.bf16 %v1714_v4, %v1707_v21  ;;  %v1727_v55 = vsub.f32 %v15792_v47, %v17696_v19  ;;  %v14010_v39 = vpack.c.bf16 %v15780_v25, %v15777_v58 }
  0x7a   : > { %v15958_v44 = vpack.c.bf16 %v1602_v12, %v1595_v49  ;;  %v1608_v4 = vsub.f32 %v15800_v18, %v17697_v22  ;;  %v1615_v21 = vsub.f32 %v15802_v26, %v17698_v2  ;;  %14009 = vmatprep.subr.bf16.mxu0 %v14008_v46  ;;  %v17700_v53 = vand.u32 4294901760, %v15804_v37 }
  0x7b   : > { %17837 = vst [vmem:[#allocation5_spill] sm:$0xff] %v15950_v29  ;;  %13851 = vmatpush3.bf16.msra.mxu1 %v17838_v1  ;;  %v1728_v11 = vand.u32 4294901760, %v1727_v55  ;;  %v17701_v49 = vand.u32 4294901760, %v15806_v60  ;;  %v17841_v19 = vand.u32 4294901760, %v15834_v31  ;;  %v17702_v2 = vand.u32 4294901760, %v15812_v33 }
  0x7c   : > { %17839 = vst [vmem:[#allocation6_spill] sm:$0xff] %v15958_v44  ;;  %13853 = vmatprep.subr.bf16.mxu1 %v17840_v0  ;;  %14011 = vmatpush3.bf16.msra.mxu0 %v14010_v39  ;;  %v1609_v22 = vand.u32 4294901760, %v1608_v4  ;;  %v1616_v29 = vand.u32 4294901760, %v1615_v21  ;;  %v14012_v55 = vpack.c.bf16 %v15792_v47, %v15790_v35  ;;  %v1734_v46 = vsub.f32 %v15804_v37, %v17700_v53 }
  0x7d   : > { %v15975_v44 = vsub.f32 %v15834_v31, %v17841_v19  ;;  %v15978_v24 = vpack.c.bf16 %v1728_v11, %v1721_v42  ;;  %v1741_v12 = vsub.f32 %v15806_v60, %v17701_v49  ;;  %v17843_v31 = vld [vmem:[#allocation9_spill] sm:$0xff]  ;;  %v14014_v39 = vpack.c.bf16 %v15802_v26, %v15800_v18  ;;  %v17846_v11 = vld [vmem:[#allocation10_spill] sm:$0xff] }
  0x7e   : > { %v15989_v19 = vpack.c.bf16 %v1616_v29, %v1609_v22  ;;  %v17845_v42 = vand.u32 4294901760, %v15808_v8  ;;  %v1629_v21 = vsub.f32 %v15812_v33, %v17702_v2  ;;  %14013 = vmatprep.subr.bf16.mxu0 %v14012_v55  ;;  %v1735_v53 = vand.u32 4294901760, %v1734_v46  ;;  %v17848_v46 = vld [vmem:[#allocation11_spill] sm:$0xff] }
  0x7f   : > { %17842 = vst [vmem:[#allocation7_spill] sm:$0xff] %v15978_v24  ;;  %13855 = vmatpush3.bf16.msra.mxu1 %v17843_v31  ;;  %v1742_v49 = vand.u32 4294901760, %v1741_v12  ;;  %v17703_v24 = vand.u32 4294901760, %v15814_v54  ;;  %v17704_v22 = vand.u32 4294901760, %v15816_v38  ;;  %v17705_v31 = vand.u32 4294901760, %v15838_v52 }
  0x80   : > { %17844 = vst [vmem:[#allocation58_spill] sm:$0xff] %v15989_v19  ;;  %v1622_v4 = vsub.f32 %v15808_v8, %v17845_v42  ;;  %13857 = vmatprep.subr.bf16.mxu1 %v17846_v11  ;;  %14015 = vmatpush3.bf16.msra.mxu0 %v14014_v39  ;;  %v1630_v19 = vand.u32 4294901760, %v1629_v21  ;;  %v17706_v42 = vand.u32 4294901760, %v15840_v16  ;;  %v14016_v2 = vpack.c.bf16 %v15806_v60, %v15804_v37  ;;  %v17850_v21 = vld [vmem:[#allocation12_spill] sm:$0xff] }
  0x81   : > { %v16004_v0 = vpack.c.bf16 %v1742_v49, %v1735_v53  ;;  %v1748_v12 = vsub.f32 %v15814_v54, %v17703_v24  ;;  %v1755_v55 = vsub.f32 %v15816_v38, %v17704_v22  ;;  %v1636_v53 = vsub.f32 %v15838_v52, %v17705_v31 }
  0x82   : > { %v1623_v29 = vand.u32 4294901760, %v1622_v4  ;;  %v14018_v4 = vpack.c.bf16 %v15812_v33, %v15808_v8  ;;  %v1643_v49 = vsub.f32 %v15840_v16, %v17706_v42  ;;  %14017 = vmatprep.subr.bf16.mxu0 %v14016_v2  ;;  %v17710_v31 = vand.u32 4294901760, %v15871_v3 }
  0x83   : > { %17847 = vst [vmem:[#allocation59_spill] sm:$0xff] %v16004_v0  ;;  %13859 = vmatpush3.bf16.msra.mxu1 %v17848_v46  ;;  %v1749_v24 = vand.u32 4294901760, %v1748_v12  ;;  %v1756_v22 = vand.u32 4294901760, %v1755_v55  ;;  %v17707_v0 = vand.u32 4294901760, %v15844_v56  ;;  %v17709_v46 = vand.u32 4294901760, %v15864_v43  ;;  %v17852_v55 = vld [vmem:[#allocation13_spill] sm:$0xff] }
  0x84   : > { %v16015_v39 = vpack.c.bf16 %v1630_v19, %v1623_v29  ;;  %13861 = vmatprep.subr.bf16.mxu1 %v17850_v21  ;;  %v17708_v19 = vand.u32 4294901760, %v15846_v61  ;;  %14019 = vmatpush3.bf16.msra.mxu0 %v14018_v4  ;;  %v1637_v29 = vand.u32 4294901760, %v1636_v53  ;;  %v14020_v42 = vpack.c.bf16 %v15816_v38, %v15814_v54 }
  0x85   : > { %v16030_v11 = vpack.c.bf16 %v1756_v22, %v1749_v24  ;;  %v1762_v2 = vsub.f32 %v15844_v56, %v17707_v0  ;;  %v14022_v53 = vpack.c.bf16 %v15840_v16, %v15838_v52  ;;  %v1650_v24 = vsub.f32 %v15864_v43, %v17709_v46 }
  0x86   : > { %17849 = vst [vmem:[#allocation60_spill] sm:$0xff] %v16015_v39  ;;  %v1644_v39 = vand.u32 4294901760, %v1643_v49  ;;  %v1769_v12 = vsub.f32 %v15846_v61, %v17708_v19  ;;  %v1657_v22 = vsub.f32 %v15871_v3, %v17710_v31  ;;  %v17854_v49 = vld [vmem:[#allocation14_spill] sm:$0xff]  ;;  %14021 = vmatprep.subr.bf16.mxu0 %v14020_v42  ;;  %v17714_v46 = vand.u32 4294901760, %v15975_v44 }
  0x87   : > { %17851 = vst [vmem:[#allocation61_spill] sm:$0xff] %v16030_v11  ;;  %13863 = vmatpush3.bf16.msra.mxu1 %v17852_v55  ;;  %v1763_v0 = vand.u32 4294901760, %v1762_v2  ;;  %v17711_v11 = vand.u32 4294901760, %v15873_v41  ;;  %v17713_v55 = vand.u32 4294901760, %v15946_v20  ;;  %v14024_v31 = vpack.c.bf16 %v15846_v61, %v15844_v56 }
  0x88   : > { %v16041_v4 = vpack.c.bf16 %v1644_v39, %v1637_v29  ;;  %13865 = vmatprep.subr.bf16.mxu1 %v17854_v49  ;;  %v1770_v19 = vand.u32 4294901760, %v1769_v12  ;;  %v17712_v39 = vand.u32 4294901760, %v15889_v59  ;;  %14023 = vmatpush3.bf16.msra.mxu0 %v14022_v53  ;;  %v1651_v29 = vand.u32 4294901760, %v1650_v24  ;;  %v17856_v12 = vld [vmem:[#allocation17_spill] sm:$0xff] }
  0x89   : > { %v1776_v42 = vsub.f32 %v15873_v41, %v17711_v11  ;;  %v14026_v24 = vpack.c.bf16 %v15871_v3, %v15864_v43  ;;  %14025 = vmatprep.subr.bf16.mxu0 %v14024_v31  ;;  %v17860_v31 = vld [vmem:[#allocation21_spill] sm:$0xff]  ;;  %vm10300_vm13 = vcmask 31744   ;;  %vm10307_vm14 = vcmask 1043456  }
  0x8a   : > { %17853 = vst [vmem:[#allocation62_spill] sm:$0xff] %v16041_v4  ;;  %v1658_v4 = vand.u32 4294901760, %v1657_v22  ;;  %v16056_v21 = vpack.c.bf16 %v1770_v19, %v1763_v0  ;;  %v1783_v2 = vsub.f32 %v15889_v59, %v17712_v39  ;;  %v1664_v0 = vsub.f32 %v15946_v20, %v17713_v55  ;;  %v17858_v22 = vld [vmem:[#allocation22_spill] sm:$0xff] }
  0x8b   : > { %13867 = vmatpush3.bf16.msra.mxu1 %v17856_v12  ;;  %v1671_v19 = vsub.f32 %v15975_v44, %v17714_v46  ;;  %v1777_v11 = vand.u32 4294901760, %v1776_v42  ;;  %v17859_v12 = vld [vmem:[#allocation24_spill] sm:$0xff]  ;;  %v14030_v46 = vpack.c.bf16 %v15975_v44, %v15946_v20  ;;  %v17861_v42 = vand.u32 4294901760, %v15713_v34 }
  0x8c   : > { %17855 = vst [vmem:[#allocation14_spill] sm:$0xff] %v16056_v21  ;;  %v16067_v53 = vpack.c.bf16 %v1658_v4, %v1651_v29  ;;  %13869 = vmatprep.subr.bf16.mxu1 %v17858_v22  ;;  %v1784_v39 = vand.u32 4294901760, %v1783_v2  ;;  %14027 = vmatpush3.bf16.msra.mxu0 %v14026_v24  ;;  %v1665_v21 = vand.u32 4294901760, %v1664_v0  ;;  %v17864_v2 = vand.u32 4294901760, %v15736_v10 }
  0x8d   : > { %v1672_v4 = vand.u32 4294901760, %v1671_v19  ;;  %v17876_v19 = vld [vmem:[#allocation33_spill] sm:$0xff] }
  0x8e   : > { %17857 = vst [vmem:[#allocation63_spill] sm:$0xff] %v16067_v53  ;;  %v16078_v29 = vpack.c.bf16 %v1784_v39, %v1777_v11  ;;  %v14028_v53 = vpack.c.bf16 %v15889_v59, %v15873_v41  ;;  %v17862_v11 = vand.u32 4294901760, %v15718_v45  ;;  %v17867_v45 = vld [vmem:[#allocation15_spill] sm:$0xff] }
  0x8f   : > { %13871 = vmatpush3.bf16.msra.mxu1 %v17859_v12  ;;  %v16083_v55 = vpack.c.bf16 %v1672_v4, %v1665_v21  ;;  %v17863_v21 = vand.u32 4294901760, %v15731_v14  ;;  %v17868_v14 = vand.u32 4294901760, %v15757_v51  ;;  %v17874_v51 = vand.u32 4294901760, %v15777_v58  ;;  %v17882_v58 = vld [vmem:[#allocation35_spill] sm:$0xff] }
  0x90   : > { %13873 = vmatprep.subr.bf16.mxu1 %v15456_v50  ;;  %14029 = vmatprep.subr.bf16.mxu0 %v14028_v53  ;;  %v14064_v39 = vpack.c.bf16 %v17862_v11, %v17861_v42  ;;  %v17865_v50 = vand.u32 4294901760, %v15747_v32  ;;  %v17871_v32 = vand.u32 4294901760, %v15767_v28  ;;  %v17873_v53 = vld [vmem:[#allocation32_spill] sm:$0xff]  ;;  %v17877_v4 = vand.u32 4294901760, %v15790_v35  ;;  %v17879_v28 = vld [vmem:[#allocation34_spill] sm:$0xff] }
  0x91   : > { %14031 = vmatpush3.bf16.msra.mxu0 %v14030_v46  ;;  %v14066_v24 = vpack.c.bf16 %v17864_v2, %v17863_v21  ;;  %v17870_v46 = vld [vmem:[#allocation31_spill] sm:$0xff]  ;;  %v17878_v42 = vand.u32 4294901760, %v15792_v47  ;;  %v17884_v2 = vand.u32 4294901760, %v15806_v60  ;;  %v17885_v35 = vld [vmem:[#allocation36_spill] sm:$0xff]  ;;  %v17886_v47 = vand.u32 4294901760, %v15808_v8 }
  0x92   : > { %1101 = vmatmul.mubr.f32.vlgmr.msra.gmra.mrb[12].mxu1 %v17860_v31  ;;  %14065 = vmatprep.subr.bf16.mxu0 %v14064_v39  ;;  %v17881_v39 = vand.u32 4294901760, %v15802_v26  ;;  %v17889_v26 = vand.u32 4294901760, %v15814_v54  ;;  %v17892_v60 = vand.u32 4294901760, %v15838_v52  ;;  %v17894_v8 = vld [vmem:[#allocation39_spill] sm:$0xff]  ;;  %v17897_v54 = vld [vmem:[#allocation40_spill] sm:$0xff]  ;;  %v17900_v52 = vld [vmem:[#allocation41_spill] sm:$0xff] }
  0x93   : > { %13875 = vmatpush3.bf16.msra.mxu1 %v15462_v15  ;;  %1108 = vmatprep.mubr.f32.mxu1 %v15431_v57  ;;  %v17866_v15 = vand.u32 4294901760, %v15752_v30  ;;  %v17872_v30 = vand.u32 4294901760, %v15774_v48  ;;  %v14076_v11 = vpack.c.bf16 %v17878_v42, %v17877_v4  ;;  %v17880_v48 = vand.u32 4294901760, %v15800_v18  ;;  %v17888_v18 = vld [vmem:[#allocation37_spill] sm:$0xff]  ;;  %v17919_v4 = vld [vmem:[#allocation46_spill] sm:$0xff]  ;;  %v17921_v42 = vld [vmem:[#allocation47_spill] sm:$0xff] }
  0x94   : > { %13877 = vmatprep.subr.bf16.mxu1 %v15468_v27  ;;  %1934 = vmatmul.mubr.f32.vlgmr.msra.gmra.mrb[0].mxu0 %v17827_v7  ;;  %v17869_v27 = vand.u32 4294901760, %v15762_v9  ;;  %v17875_v9 = vand.u32 4294901760, %v15780_v25  ;;  %v17883_v25 = vand.u32 4294901760, %v15804_v37  ;;  %v17891_v37 = vld [vmem:[#allocation38_spill] sm:$0xff] }
  0x95   : > { %1940 = vmatprep.mubr.f32.mxu0 %v15417_v62  ;;  %14067 = vmatpush3.bf16.msra.mxu0 %v14066_v24  ;;  %v14068_v34 = vpack.c.bf16 %v17866_v15, %v17865_v50  ;;  %v14078_v21 = vpack.c.bf16 %v17881_v39, %v17880_v48  ;;  %v17887_v50 = vand.u32 4294901760, %v15812_v33  ;;  %v17895_v33 = vand.u32 4294901760, %v15844_v56  ;;  %v17903_v56 = vld [vmem:[#allocation42_spill] sm:$0xff]  ;;  %v17926_v48 = vld [vmem:[#allocation51_spill] sm:$0xff]  ;;  %v17927_v39 = vld [vmem:[#allocation52_spill] sm:$0xff] }
  0x96   : > { %1112 = vmatmul.mubr.f32.gmra.mrb[14].mxu1 %v15434_v5  ;;  %v14070_v10 = vpack.c.bf16 %v17869_v27, %v17868_v14  ;;  %v14074_v0 = vpack.c.bf16 %v17875_v9, %v17874_v51  ;;  %v14080_v24 = vpack.c.bf16 %v17884_v2, %v17883_v25  ;;  %v17893_v27 = vand.u32 4294901760, %v15840_v16  ;;  %v17930_v25 = vld [vmem:[#allocation55_spill] sm:$0xff]  ;;  %v17931_v2 = vld [vmem:[#allocation56_spill] sm:$0xff] }
  0x97   : > { %13879 = vmatpush3.bf16.msra.mxu1 %v15474_v23  ;;  %1278 = vmatprep.mubr.f32.mxu1 %v17867_v45  ;;  %v14072_v23 = vpack.c.bf16 %v17872_v30, %v17871_v32  ;;  %v14082_v15 = vpack.c.bf16 %v17887_v50, %v17886_v47  ;;  %v17899_v30 = vand.u32 4294901760, %v15871_v3  ;;  %v17901_v16 = vand.u32 4294901760, %v15873_v41  ;;  %v17907_v3 = vld [vmem:[#allocation27_spill] sm:$0xff]  ;;  %v17908_v41 = vld [vmem:[#allocation28_spill] sm:$0xff]  ;;  %v17934_v47 = vld [vmem:[#allocation26_spill] sm:$0xff] }
  0x98   : > { %13881 = vmatprep.subr.bf16.mxu1 %v17870_v46  ;;  %1943 = vmatmul.mubr.f32.gmra.mrb[2].mxu0 %v15420_v40  ;;  %v17896_v46 = vand.u32 4294901760, %v15846_v61  ;;  %v17904_v61 = vand.u32 4294901760, %v15946_v20  ;;  %v17905_v9 = vand.u32 4294901760, %v15975_v44  ;;  %v17913_v20 = vld [vmem:[#allocation12_spill] sm:$0xff]  ;;  %v17914_v44 = vld [vmem:[#allocation13_spill] sm:$0xff]  ;;  %v17935_v50 = vld [vmem:[#allocation19_spill] sm:$0xff] }
  0x99   : > { %14069 = vmatprep.subr.bf16.mxu0 %v14068_v34  ;;  %2228 = vmatprep.mubr.f32.mxu0 %v17867_v45  ;;  %v17890_v34 = vand.u32 4294901760, %v15816_v38  ;;  %v17898_v38 = vand.u32 4294901760, %v15864_v43  ;;  %v17906_v43 = vld [vmem:[#allocation16_spill] sm:$0xff] }
  0x9a   : > { %14071 = vmatpush3.bf16.msra.mxu0 %v14070_v10  ;;  %v14086_v10 = vpack.c.bf16 %v17893_v27, %v17892_v60  ;;  %v14088_v32 = vpack.c.bf16 %v17896_v46, %v17895_v33  ;;  %v17942_v60 = vld [vmem:[#allocation7_spill] sm:$0xff]  ;;  %v17943_v27 = vld [vmem:[#allocation58_spill] sm:$0xff]  ;;  %v17946_v33 = vld [vmem:[#allocation61_spill] sm:$0xff] }
  0x9b   : > { %13883 = vmatpush3.bf16.msra.mxu1 %v17873_v53  ;;  %14073 = vmatprep.subr.bf16.mxu0 %v14072_v23  ;;  %v14084_v14 = vpack.c.bf16 %v17890_v34, %v17889_v26  ;;  %v14090_v23 = vpack.c.bf16 %v17899_v30, %v17898_v38  ;;  %v17902_v53 = vand.u32 4294901760, %v15889_v59  ;;  %v17911_v59 = vld [vmem:[#allocation10_spill] sm:$0xff]  ;;  %v17939_v34 = vld [vmem:[#allocation4_spill] sm:$0xff] }
  0x9c   : > { %13885 = vmatprep.subr.bf16.mxu1 %v17876_v19  ;;  %v17918_v19 = vld [vmem:[#allocation45_spill] sm:$0xff]  ;;  %v17938_v26 = vld [vmem:[#allocation30_spill] sm:$0xff] }
  0x9d   : > { %v14092_v51 = vpack.c.bf16 %v17902_v53, %v17901_v16  ;;  %v17947_v38 = vld [vmem:[#allocation62_spill] sm:$0xff] }
  0x9e   : > { %14075 = vmatpush3.bf16.msra.mxu0 %v14074_v0  ;;  %v14094_v0 = vpack.c.bf16 %v17905_v9, %v17904_v61  ;;  %v17948_v30 = vld [vmem:[#allocation14_spill] sm:$0xff] }
  0x9f   : > { %13887 = vmatpush3.bf16.msra.mxu1 %v17879_v28  ;;  %14077 = vmatprep.subr.bf16.mxu0 %v14076_v11  ;;  %v17924_v11 = vld [vmem:[#allocation50_spill] sm:$0xff]  ;;  %v17925_v28 = vld [vmem:[#allocation23_spill] sm:$0xff] }
  0xa0   : > { %13889 = vmatprep.subr.bf16.mxu1 %v17882_v58  ;;  %v17929_v58 = vld [vmem:[#allocation54_spill] sm:$0xff] }
  0xa2   : > { %14079 = vmatpush3.bf16.msra.mxu0 %v14078_v21  ;;  %v17928_v21 = vld [vmem:[#allocation53_spill] sm:$0xff] }
  0xa3   : > { %13891 = vmatpush3.bf16.msra.mxu1 %v17885_v35  ;;  %14081 = vmatprep.subr.bf16.mxu0 %v14080_v24  ;;  %v17932_v24 = vld [vmem:[#allocation57_spill] sm:$0xff]  ;;  %v17933_v35 = vld [vmem:[#allocation2_spill] sm:$0xff] }
  0xa4   : > { %13893 = vmatprep.subr.bf16.mxu1 %v17888_v18  ;;  %v17937_v18 = vld [vmem:[#allocation3_spill] sm:$0xff] }
  0xa6   : > { %14083 = vmatpush3.bf16.msra.mxu0 %v14082_v15  ;;  %v17936_v15 = vld [vmem:[#allocation29_spill] sm:$0xff] }
  0xa7   : > { %13895 = vmatpush3.bf16.msra.mxu1 %v17891_v37  ;;  %14085 = vmatprep.subr.bf16.mxu0 %v14084_v14  ;;  %v17940_v14 = vld [vmem:[#allocation5_spill] sm:$0xff]  ;;  %v17941_v37 = vld [vmem:[#allocation6_spill] sm:$0xff] }
  0xa8   : > { %13897 = vmatprep.subr.bf16.mxu1 %v17894_v8  ;;  %v17945_v8 = vld [vmem:[#allocation60_spill] sm:$0xff] }
  0xaa   : > { %14087 = vmatpush3.bf16.msra.mxu0 %v14086_v10  ;;  %v17944_v10 = vld [vmem:[#allocation59_spill] sm:$0xff] }
  0xab   : > { %13899 = vmatpush3.bf16.msra.mxu1 %v17897_v54  ;;  %14089 = vmatprep.subr.bf16.mxu0 %v14088_v32 }
  0xac   : > { %13901 = vmatprep.subr.bf16.mxu1 %v17900_v52  ;;  %v17950_v52 = vld [vmem:[#allocation20_spill] sm:$0xff] }
  0xae   : > { %14091 = vmatpush3.bf16.msra.mxu0 %v14090_v23  ;;  %v17949_v23 = vld [vmem:[#allocation63_spill] sm:$0xff] }
  0xaf   : > { %13903 = vmatpush3.bf16.msra.mxu1 %v17903_v56  ;;  %14093 = vmatprep.subr.bf16.mxu0 %v14092_v51 }
  0xb0   : > { %13905 = vmatprep.subr.bf16.mxu1 %v17825_v36  ;;  %v17910_v36 = vld [vmem:[#allocation9_spill] sm:$0xff] }
  0xb2   : > { %1280 = vmatmul.mubr.f32.vlgmr.msra.gmra.mrb[16].mxu1 %v17906_v43  ;;  %14095 = vmatpush3.bf16.msra.mxu0 %v14094_v0 }
  0xb3   : > { %13907 = vmatpush3.bf16.msra.mxu1 %v17828_v17  ;;  %1285 = vmatprep.mubr.f32.mxu1 %v17907_v3  ;;  %v17909_v17 = vld [vmem:[#allocation8_spill] sm:$0xff] }
  0xb4   : > { %13909 = vmatprep.subr.bf16.mxu1 %v17829_v6  ;;  %v17912_v6 = vld [vmem:[#allocation11_spill] sm:$0xff] }
  0xb5   : > { %2230 = vmatmul.mubr.f32.vlgmr.msra.gmra.mrb[4].mxu0 %v17906_v43 }
  0xb6   : > { %1287 = vmatmul.mubr.f32.gmra.mrb[18].mxu1 %v17908_v41  ;;  %2235 = vmatprep.mubr.f32.mxu0 %v17907_v3 }
  0xb7   : > { %13911 = vmatpush3.bf16.msra.mxu1 %v17832_v13  ;;  %1389 = vmatprep.mubr.f32.mxu1 %v17867_v45  ;;  %v17915_v13 = vld [vmem:[#allocation17_spill] sm:$0xff] }
  0xb8   : > { %13913 = vmatprep.subr.bf16.mxu1 %v17835_v63  ;;  %v17917_v63 = vld [vmem:[#allocation44_spill] sm:$0xff] }
  0xb9   : > { %2237 = vmatmul.mubr.f32.gmra.mrb[6].mxu0 %v17908_v41 }
  0xbb   : > { %13915 = vmatpush3.bf16.msra.mxu1 %v17838_v1  ;;  %v17916_v1 = vld [vmem:[#allocation43_spill] sm:$0xff] }
  0xbc   : > { %13917 = vmatprep.subr.bf16.mxu1 %v17909_v17 }
  0xbf   : > { %13919 = vmatpush3.bf16.msra.mxu1 %v17910_v36 }
  0xc0   : > { %13921 = vmatprep.subr.bf16.mxu1 %v17911_v59  ;;  %v2353_v59 = vld [vmem:[%s17566_s5] sm:$0xff] }
  0xc3   : > { %13923 = vmatpush3.bf16.msra.mxu1 %v17912_v6  ;;  %v2369_v6 = vsel %vm2367_vm0, %v2353_v59, 0 }
  0xc4   : > { %13925 = vmatprep.subr.bf16.mxu1 %v17913_v20  ;;  %v16273_v20 = vand.u32 4294901760, %v2369_v6 }
  0xc6   : > { %13527 = vmatprep.mubr.f32.mxu0 %v16273_v20 }
  0xc7   : > { %13927 = vmatpush3.bf16.msra.mxu1 %v17914_v44 }
  0xc8   : > { %13929 = vmatprep.subr.bf16.mxu1 %v17854_v49  ;;  %v17920_v49 = vld [vmem:[#allocation25_spill] sm:$0xff] }
  0xcb   : > { %13931 = vmatpush3.bf16.msra.mxu1 %v17915_v13 }
  0xcc   : > { %13933 = vmatprep.subr.bf16.mxu1 %v17858_v22  ;;  %v17922_v22 = vld [vmem:[#allocation48_spill] sm:$0xff] }
  0xcf   : > { %13935 = vmatpush3.bf16.msra.mxu1 %v17859_v12  ;;  %v17923_v12 = vld [vmem:[#allocation49_spill] sm:$0xff] }
  0xd0   : > { %13937 = vmatprep.subr.bf16.mxu1 %v17916_v1 }
  0xd2   : > { %1391 = vmatmul.mubr.f32.vlgmr.msra.gmra.mrb[20].mxu1 %v17906_v43 }
  0xd3   : > { %13939 = vmatpush3.bf16.msra.mxu1 %v17917_v63  ;;  %1396 = vmatprep.mubr.f32.mxu1 %v17907_v3 }
  0xd4   : > { %13941 = vmatprep.subr.bf16.mxu1 %v17918_v19 }
  0xd6   : > { %1398 = vmatmul.mubr.f32.gmra.mrb[22].mxu1 %v17908_v41 }
  0xd7   : > { %13943 = vmatpush3.bf16.msra.mxu1 %v17919_v4  ;;  %1536 = vmatprep.mubr.f32.mxu1 %v17920_v49 }
  0xd8   : > { %13945 = vmatprep.subr.bf16.mxu1 %v17921_v42 }
  0xdb   : > { %13947 = vmatpush3.bf16.msra.mxu1 %v17922_v22 }
  0xdc   : > { %13949 = vmatprep.subr.bf16.mxu1 %v17923_v12 }
  0xdf   : > { %13951 = vmatpush3.bf16.msra.mxu1 %v17924_v11 }
  0xe0   : > { %13953 = vmatprep.subr.bf16.mxu1 %v17925_v28 }
  0xe3   : > { %13955 = vmatpush3.bf16.msra.mxu1 %v17926_v48 }
  0xe4   : > { %13957 = vmatprep.subr.bf16.mxu1 %v17927_v39 }
  0xe7   : > { %13959 = vmatpush3.bf16.msra.mxu1 %v17928_v21 }
  0xe8   : > { %13961 = vmatprep.subr.bf16.mxu1 %v17929_v58 }
  0xeb   : > { %13963 = vmatpush3.bf16.msra.mxu1 %v17930_v25 }
  0xec   : > { %13965 = vmatprep.subr.bf16.mxu1 %v17931_v2 }
  0xef   : > { %13967 = vmatpush3.bf16.msra.mxu1 %v17932_v24 }
  0xf0   : > { %13969 = vmatprep.subr.bf16.mxu1 %v17933_v35 }
  0xf2   : > { %1542 = vmatmul.mubr.f32.vlgmr.msra.gmra.mrb[24].mxu1 %v17934_v47 }
  0xf3   : > { %13971 = vmatpush3.bf16.msra.mxu1 %v17935_v50  ;;  %1551 = vmatprep.mubr.f32.mxu1 %v17936_v15  ;;  %v16291_v50 = vsub.f32 %v2369_v6, %v16273_v20 }
  0xf4   : > { %13973 = vmatprep.subr.bf16.mxu1 %v17937_v18 }
  0xf6   : > { %1557 = vmatmul.mubr.f32.gmra.mrb[26].mxu1 %v17938_v26 }
  0xf7   : > { %13975 = vmatpush3.bf16.msra.mxu1 %v17939_v34  ;;  %1787 = vmatprep.mubr.f32.mxu1 %v17867_v45  ;;  %v16294_v34 = vand.u32 4294901760, %v16291_v50 }
  0xf8   : > { %13977 = vmatprep.subr.bf16.mxu1 %v17940_v14 }
  0xfb   : > { %13979 = vmatpush3.bf16.msra.mxu1 %v17941_v37 }
  0xfc   : > { %13981 = vmatprep.subr.bf16.mxu1 %v17942_v60  ;;  %v2444_v60 = vsub.f32 %v16291_v50, %v16294_v34 }
  0xff   : > { %13983 = vmatpush3.bf16.msra.mxu1 %v17943_v27  ;;  %v2445_v27 = vand.u32 4294901760, %v2444_v60 }
 0x100   : > { %13985 = vmatprep.subr.bf16.mxu1 %v17944_v10 }
 0x103   : > { %13987 = vmatpush3.bf16.msra.mxu1 %v17945_v8 }
 0x104   : > { %13989 = vmatprep.subr.bf16.mxu1 %v17946_v33 }
 0x105   : > { %v12972_v46 = vpop.f32.mrb[0].mxu1 }
 0x106   : > { %v12973_v32 = vpop.f32.mrb[1].mxu1 }
 0x107   : > { %v12974_v54 = vadd.f32 %v12973_v32, %v12972_v46  ;;  %13991 = vmatpush3.bf16.msra.mxu1 %v17947_v38 }
 0x108   : > { %13993 = vmatprep.subr.bf16.mxu1 %v17948_v30 }
 0x10b   : > { %13995 = vmatpush3.bf16.msra.mxu1 %v17949_v23 }
 0x10c   : > { %13997 = vmatprep.subr.bf16.mxu1 %v16078_v29 }
 0x10f   : > { %13999 = vmatpush3.bf16.msra.mxu1 %v16083_v55 }
 0x110   : > { %14033 = vmatprep.subr.bf16.mxu1 %v17916_v1 }
 0x112   : > { %1789 = vmatmul.mubr.f32.vlgmr.msra.gmra.mrb[28].mxu1 %v17906_v43 }
 0x113   : > { %14035 = vmatpush3.bf16.msra.mxu1 %v17917_v63  ;;  %1794 = vmatprep.mubr.f32.mxu1 %v17907_v3 }
 0x114   : > { %14037 = vmatprep.subr.bf16.mxu1 %v17918_v19 }
 0x116   : > { %1796 = vmatmul.mubr.f32.gmra.mrb[30].mxu1 %v17908_v41 }
 0x117   : > { %14039 = vmatpush3.bf16.msra.mxu1 %v17919_v4  ;;  %2047 = vmatprep.mubr.f32.mxu1 %v17950_v52 }
 0x118   : > { %14041 = vmatprep.subr.bf16.mxu1 %v17921_v42  ;;  %v12975_v29 = vpop.f32.mrb[2].mxu1 }
 0x119   : > { %v12976_v55 = vpop.f32.mrb[3].mxu1 }
 0x11a   : > { %v12977_v16 = vadd.f32 %v12976_v55, %v12975_v29 }
 0x11b   : > { %14043 = vmatpush3.bf16.msra.mxu1 %v17922_v22 }
 0x11c   : > { %14045 = vmatprep.subr.bf16.mxu1 %v17923_v12 }
 0x11f   : > { %14047 = vmatpush3.bf16.msra.mxu1 %v17924_v11 }
 0x120   : > { %14049 = vmatprep.subr.bf16.mxu1 %v17925_v28 }
 0x123   : > { %14051 = vmatpush3.bf16.msra.mxu1 %v17926_v48 }
 0x124   : > { %14053 = vmatprep.subr.bf16.mxu1 %v17927_v39 }
 0x125   : > { %v13010_v53 = vpop.f32.mrb[4].mxu1 }
 0x126   : > { %v13011_v51 = vpop.f32.mrb[5].mxu1 }
 0x127   : > { %v13012_v56 = vadd.f32 %v13011_v51, %v13010_v53  ;;  %14055 = vmatpush3.bf16.msra.mxu1 %v17928_v21 }
 0x128   : > { %14057 = vmatprep.subr.bf16.mxu1 %v17929_v58 }
 0x129   : > { %v841_v61 = vadd.f32 %v13012_v56, %v12974_v54  ;;  %v13013_v9 = vpop.f32.mrb[6].mxu1  ;;  %v2354_v56 = vld [vmem:[%s17566_s5 + $0x8] sm:$0xff] }
 0x12a   : > { %v13014_v0 = vpop.f32.mrb[7].mxu1 }
 0x12b   : > { %v13015_v17 = vadd.f32 %v13014_v0, %v13013_v9  ;;  %14059 = vmatpush3.bf16.msra.mxu1 %v17930_v25  ;;  %v2372_v0 = vsel %vm2367_vm0, %v2354_v56, 0 }
 0x12c   : > { %14061 = vmatprep.subr.bf16.mxu1 %v17931_v2  ;;  %v16308_v6 = vand.u32 4294901760, %v2372_v0 }
 0x12d   : > { %v848_v36 = vadd.f32 %v13015_v17, %v12977_v16 }
 0x12f   : > { %14063 = vmatpush3.bf16.msra.mxu1 %v17932_v24 }
 0x130   : > { %14097 = vmatprep.subr.bf16.mxu1 %v17916_v1 }
 0x132   : > { %2051 = vmatmul.mubr.f32.vlgmr.msra.gmra.mrb[32].mxu1 %v17860_v31 }
 0x133   : > { %14099 = vmatpush3.bf16.msra.mxu1 %v17917_v63  ;;  %2058 = vmatprep.mubr.f32.mxu1 %v15431_v57 }
 0x134   : > { %14101 = vmatprep.subr.bf16.mxu1 %v17918_v19 }
 0x136   : > { %2062 = vmatmul.mubr.f32.gmra.mrb[34].mxu1 %v15434_v5 }
 0x137   : > { %14103 = vmatpush3.bf16.msra.mxu1 %v17919_v4  ;;  %2339 = vmatprep.mubr.f32.mxu1 %v17867_v45 }
 0x138   : > { %14105 = vmatprep.subr.bf16.mxu1 %v17921_v42 }
 0x13b   : > { %14107 = vmatpush3.bf16.msra.mxu1 %v17922_v22 }
 0x13c   : > { %14109 = vmatprep.subr.bf16.mxu1 %v17923_v12 }
 0x13f   : > { %14111 = vmatpush3.bf16.msra.mxu1 %v17924_v11 }
 0x140   : > { %14113 = vmatprep.subr.bf16.mxu1 %v17925_v28 }
 0x143   : > { %14115 = vmatpush3.bf16.msra.mxu1 %v17926_v48 }
 0x144   : > { %14117 = vmatprep.subr.bf16.mxu1 %v17927_v39 }
 0x145   : > { %v13048_v44 = vpop.f32.mrb[8].mxu1 }
 0x146   : > { %v13049_v13 = vpop.f32.mrb[9].mxu1 }
 0x147   : > { %v13050_v1 = vadd.f32 %v13049_v13, %v13048_v44  ;;  %14119 = vmatpush3.bf16.msra.mxu1 %v17928_v21 }
 0x148   : > { %14121 = vmatprep.subr.bf16.mxu1 %v17929_v58 }
 0x149   : > { %v986_v63 = vadd.f32 %v13050_v1, %v841_v61  ;;  %v13051_v19 = vpop.f32.mrb[10].mxu1 }
 0x14a   : > { %v13052_v4 = vpop.f32.mrb[11].mxu1 }
 0x14b   : > { %v13053_v42 = vadd.f32 %v13052_v4, %v13051_v19  ;;  %14123 = vmatpush3.bf16.msra.mxu1 %v17930_v25 }
 0x14c   : > { %14125 = vmatprep.subr.bf16.mxu1 %v17931_v2 }
 0x14d   : > { %v995_v22 = vadd.f32 %v13053_v42, %v848_v36 }
 0x14f   : > { %14127 = vmatpush3.bf16.msra.mxu1 %v17932_v24 }
 0x152   : > { %2341 = vmatmul.mubr.f32.vlgmr.msra.gmra.mrb[36].mxu1 %v17906_v43 }
 0x153   : > { %2346 = vmatprep.mubr.f32.mxu1 %v17907_v3 }
 0x156   : > { %2348 = vmatmul.mubr.f32.gmra.mrb[38].mxu1 %v17908_v41 }
 0x157   : > { %13520 = vmatprep.mubr.f32.mxu1 %v2445_v27 }
 0x165   : > { %v13086_v12 = vpop.f32.mrb[12].mxu1 }
 0x166   : > { %v13087_v11 = vpop.f32.mrb[13].mxu1 }
 0x167   : > { %v13088_v28 = vadd.f32 %v13087_v11, %v13086_v12  ;;  %v13276_v48 = vpop.f32.mrb[0].mxu0 }
 0x168   : > { %v13277_v58 = vpop.f32.mrb[1].mxu0 }
 0x169   : > { %v1103_v39 = vadd.f32 %v13088_v28, %v986_v63  ;;  %v13089_v21 = vpop.f32.mrb[14].mxu1  ;;  %v16288_v25 = vadd.f32 %v13277_v58, %v13276_v48  ;;  %v16311_v63 = vsub.f32 %v2372_v0, %v16308_v6 }
 0x16a   : > { %v13090_v35 = vpop.f32.mrb[15].mxu1 }
 0x16b   : > { %v13091_v2 = vadd.f32 %v13090_v35, %v13089_v21  ;;  %v13279_v24 = vpop.f32.mrb[2].mxu0  ;;  %v16314_v42 = vand.u32 4294901760, %v16311_v63 }
 0x16c   : > { %v13280_v14 = vpop.f32.mrb[3].mxu0 }
 0x16d   : > { %v1114_v18 = vadd.f32 %v13091_v2, %v995_v22  ;;  %v16296_v37 = vadd.f32 %v13280_v14, %v13279_v24  ;;  %v2454_v11 = vsub.f32 %v16311_v63, %v16314_v42 }
 0x16f   : > { %v16318_v35 = vand.u32 4294901760, %v2454_v11 }
 0x185   : > { %v13124_v10 = vpop.f32.mrb[16].mxu1 }
 0x186   : > { %v13125_v8 = vpop.f32.mrb[17].mxu1 }
 0x187   : > { %v13126_v33 = vadd.f32 %v13125_v8, %v13124_v10 }
 0x188   : > { %v13352_v46 = vpop.f32.mrb[4].mxu0 }
 0x189   : > { %v1282_v32 = vadd.f32 %v13126_v33, %v1103_v39  ;;  %v13127_v54 = vpop.f32.mrb[18].mxu1  ;;  %v13353_v38 = vpop.f32.mrb[5].mxu0 }
 0x18a   : > { %v13128_v30 = vpop.f32.mrb[19].mxu1  ;;  %v16300_v23 = vadd.f32 %v13353_v38, %v13352_v46  ;;  %v14936_v38 = vmov 0  }
 0x18b   : > { %v13129_v29 = vadd.f32 %v13128_v30, %v13127_v54  ;;  %v2355_v54 = vld [vmem:[%s17567_s6] sm:$0xff]  ;;  %14870 = vset.pattern.permute.xlu0 %v14936_v38  ;;  %14871 = vset.pattern.permute.xlu1 %v14936_v38  ;;  %v2356_v30 = vld [vmem:[%s17567_s6 + $0x8] sm:$0xff] }
 0x18c   : > { %v13355_v55 = vpop.f32.mrb[6].mxu0  ;;  %2359 = vperm.xlu0 %14870, %v2355_v54  }
 0x18d   : > { %v1289_v16 = vadd.f32 %v13129_v29, %v1114_v18  ;;  %v13356_v53 = vpop.f32.mrb[7].mxu0 }
 0x18e   : > { %v16302_v51 = vadd.f32 %v13356_v53, %v13355_v55 }
 0x190   : > { %2364 = vperm.xlu0 %14870, %v2356_v30  }
 0x1a5   : > { %v13162_v61 = vpop.f32.mrb[20].mxu1 }
 0x1a6   : > { %v13163_v9 = vpop.f32.mrb[21].mxu1 }
 0x1a7   : > { %v13164_v17 = vadd.f32 %v13163_v9, %v13162_v61 }
 0x1a9   : > { %v1393_v36 = vadd.f32 %v13164_v17, %v1282_v32  ;;  %v13165_v59 = vpop.f32.mrb[22].mxu1 }
 0x1aa   : > { %v13166_v44 = vpop.f32.mrb[23].mxu1 }
 0x1ab   : > { %v2375_v13 = vand.u32 4294901760, %v1393_v36  ;;  %v13167_v1 = vadd.f32 %v13166_v44, %v13165_v59 }
 0x1ad   : > { %v2463_v19 = vsub.f32 %v1393_v36, %v2375_v13  ;;  %v1400_v4 = vadd.f32 %v13167_v1, %v1289_v16 }
 0x1af   : > { %v2378_v22 = vand.u32 4294901760, %v1400_v4  ;;  %v2464_v12 = vand.u32 4294901760, %v2463_v19 }
 0x1b1   : > { %v14128_v28 = vpack.c.bf16 %v2378_v22, %v2375_v13  ;;  %v2470_v48 = vsub.f32 %v1400_v4, %v2378_v22  ;;  %v2465_v39 = vsub.f32 %v2463_v19, %v2464_v12 }
 0x1b3   : > { %14129 = vmatprep.subr.bf16.mxu1 %v14128_v28  ;;  %v2471_v21 = vand.u32 4294901760, %v2470_v48  ;;  %v14136_v58 = vpack.c.bf16 %v2470_v48, %v2463_v19  ;;  %v2466_v18 = vand.u32 4294901760, %v2465_v39 }
 0x1b4   : > { %14131 = vmatpush3.bf16.msra.mxu1 %v14128_v28 }
 0x1b5   : > { %v2472_v2 = vsub.f32 %v2470_v48, %v2471_v21  ;;  %v14144_v24 = vpack.c.bf16 %v2471_v21, %v2464_v12 }
 0x1b7   : > { %v2473_v14 = vand.u32 4294901760, %v2472_v2  ;;  %13521 = vmatmul.mubr.f32.vlgmr.msra.gmra.mrb[40].mxu1 %v16318_v35 }
 0x1b8   : > { %13562 = vmatprep.mubr.f32.mxu1 %v2445_v27 }
 0x1b9   : > { %v14132_v60 = vpack.c.bf16 %v2473_v14, %v2466_v18 }
 0x1bb   : > { %14133 = vmatprep.subr.bf16.mxu0 %v14132_v60 }
 0x1bc   : > { %14135 = vmatpush3.bf16.msra.mxu0 %v14132_v60 }
 0x1bd   : > { %14137 = vmatprep.subr.bf16.mxu0 %v14136_v58 }
 0x1bf   : > { %13528 = vmatmul.mubr.f32.vlgmr.msra.gmra.mrb[8].mxu0 %v16308_v6 }
 0x1c0   : > { %14139 = vmatpush3.bf16.msra.mxu0 %v14136_v58  ;;  %13534 = vmatprep.mubr.f32.mxu0 %v16291_v50 }
 0x1c1   : > { %14141 = vmatprep.subr.bf16.mxu0 %v14128_v28 }
 0x1c5   : > { %v13200_v10 = vpop.f32.mrb[24].mxu1 }
 0x1c6   : > { %v13201_v8 = vpop.f32.mrb[25].mxu1 }
 0x1c7   : > { %v13202_v33 = vadd.f32 %v13201_v8, %v13200_v10  ;;  %13535 = vmatmul.mubr.f32.vlgmr.msra.gmra.mrb[8].mxu0 %v16311_v63 }
 0x1c8   : > { %14143 = vmatpush3.bf16.msra.mxu0 %v14128_v28  ;;  %13541 = vmatprep.mubr.f32.mxu0 %v16294_v34 }
 0x1c9   : > { %14145 = vmatprep.subr.bf16.mxu0 %v14144_v24  ;;  %v13203_v27 = vpop.f32.mrb[26].mxu1 }
 0x1ca   : > { %v13204_v46 = vpop.f32.mrb[27].mxu1 }
 0x1cb   : > { %v13205_v32 = vadd.f32 %v13204_v46, %v13203_v27 }
 0x1cf   : > { %13542 = vmatmul.mubr.f32.vlgmr.msra.gmra.mrb[8].mxu0 %v16314_v42 }
 0x1d0   : > { %14147 = vmatpush3.bf16.msra.mxu0 %v14144_v24  ;;  %13548 = vmatprep.mubr.f32.mxu0 %v16273_v20 }
 0x1d1   : > { %14149 = vmatprep.subr.bf16.mxu0 %v14128_v28 }
 0x1d7   : > { %13549 = vmatmul.mubr.f32.vlgmr.msra.gmra.mrb[8].mxu0 %v16308_v6 }
 0x1d8   : > { %14151 = vmatpush3.bf16.msra.mxu0 %v14128_v28  ;;  %13555 = vmatprep.mubr.f32.mxu0 %v16273_v20 }
 0x1df   : > { %13556 = vmatmul.mubr.f32.vlgmr.msra.gmra.mrb[8].mxu0 %v16308_v6 }
 0x1e5   : > { %v13238_v29 = vpop.f32.mrb[28].mxu1 }
 0x1e6   : > { %v13239_v55 = vpop.f32.mrb[29].mxu1 }
 0x1e7   : > { %v13240_v16 = vadd.f32 %v13239_v55, %v13238_v29  ;;  %v3391_v29 = vld [vmem:[%s17563_s2 + $0x8] sm:$0xff]  ;;  %v3390_v55 = vld [vmem:[%s17563_s2] sm:$0xff] }
 0x1e9   : > { %v1791_v53 = vadd.f32 %v13240_v16, %v13202_v33  ;;  %v13241_v56 = vpop.f32.mrb[30].mxu1  ;;  %v3400_v16 = vand.u32 4294901760, %v3391_v29 }
 0x1ea   : > { %v13242_v61 = vpop.f32.mrb[31].mxu1 }
 0x1eb   : > { %v1936_v9 = vadd.f32 %v16288_v25, %v1791_v53  ;;  %v13243_v0 = vadd.f32 %v13242_v61, %v13241_v56  ;;  %v3392_v56 = vld [vmem:[%s17563_s2 + $0x10] sm:$0xff]  ;;  %v14937_v61 = vmov 0.0  }
 0x1ec   : > { %3468 = vmatprep.mubr.f32.mxu0 %v14937_v61 }
 0x1ed   : > { %v1798_v17 = vadd.f32 %v13243_v0, %v13205_v32 }
 0x1ef   : > { %v1945_v36 = vadd.f32 %v16296_v37, %v1798_v17 }
 0x205   : > { %v13314_v59 = vpop.f32.mrb[32].mxu1 }
 0x206   : > { %v13315_v44 = vpop.f32.mrb[33].mxu1 }
 0x207   : > { %v13316_v13 = vadd.f32 %v13315_v44, %v13314_v59 }
 0x209   : > { %v2053_v1 = vadd.f32 %v13316_v13, %v1936_v9  ;;  %v13317_v19 = vpop.f32.mrb[34].mxu1  ;;  %v3406_v9 = vand.u32 4294901760, %v3392_v56 }
 0x20a   : > { %v13318_v4 = vpop.f32.mrb[35].mxu1 }
 0x20b   : > { %v2232_v22 = vadd.f32 %v16300_v23, %v2053_v1  ;;  %v13319_v12 = vadd.f32 %v13318_v4, %v13317_v19  ;;  %v16365_v59 = vsub.f32 %v3392_v56, %v3406_v9 }
 0x20d   : > { %v2064_v11 = vadd.f32 %v13319_v12, %v1945_v36  ;;  %v3511_v1 = vand.u32 4294901760, %v16365_v59 }
 0x20f   : > { %v2239_v28 = vadd.f32 %v16302_v51, %v2064_v11 }
 0x225   : > { %v13390_v48 = vpop.f32.mrb[36].mxu1 }
 0x226   : > { %v13391_v39 = vpop.f32.mrb[37].mxu1 }
 0x227   : > { %v13392_v21 = vadd.f32 %v13391_v39, %v13390_v48 }
 0x229   : > { %v2343_v25 = vadd.f32 %v13392_v21, %v2232_v22  ;;  %v13393_v58 = vpop.f32.mrb[38].mxu1  ;;  %v3512_v22 = vsub.f32 %v16365_v59, %v3511_v1 }
 0x22a   : > { %v13394_v2 = vpop.f32.mrb[39].mxu1 }
 0x22b   : > { %v2877_v24 = vand.u32 4294901760, %v2343_v25  ;;  %v13395_v37 = vadd.f32 %v13394_v2, %v13393_v58 }
 0x22d   : > { %v2965_v18 = vsub.f32 %v2343_v25, %v2877_v24  ;;  %v2350_v14 = vadd.f32 %v13395_v37, %v2239_v28  ;;  %v3513_v28 = vand.u32 4294901760, %v3512_v22 }
 0x22f   : > { %v2880_v60 = vand.u32 4294901760, %v2350_v14  ;;  %v2966_v10 = vand.u32 4294901760, %v2965_v18 }
 0x231   : > { %v14152_v8 = vpack.c.bf16 %v2880_v60, %v2877_v24  ;;  %v2972_v33 = vsub.f32 %v2350_v14, %v2880_v60  ;;  %v2967_v23 = vsub.f32 %v2965_v18, %v2966_v10 }
 0x233   : > { %14153 = vmatprep.subr.bf16.mxu1 %v14152_v8  ;;  %v2973_v27 = vand.u32 4294901760, %v2972_v33  ;;  %v14160_v46 = vpack.c.bf16 %v2972_v33, %v2965_v18  ;;  %v2968_v54 = vand.u32 4294901760, %v2967_v23  ;;  %v16397_v18 = vpop.permute.xlu0 %2359 }
 0x234   : > { %14155 = vmatpush3.bf16.msra.mxu1 %v14152_v8 }
 0x235   : > { %v2974_v51 = vsub.f32 %v2972_v33, %v2973_v27  ;;  %v14168_v32 = vpack.c.bf16 %v2973_v27, %v2966_v10 }
 0x237   : > { %13563 = vmatmul.mubr.f32.vlgmr.msra.gmra.mrb[42].mxu1 %v16318_v35  ;;  %v2975_v38 = vand.u32 4294901760, %v2974_v51  ;;  %v3393_v35 = vld [vmem:[%s17563_s2 + $0x18] sm:$0xff]  ;;  %v16399_v14 = vpop.permute.xlu0 %2364 }
 0x238   : > { %13569 = vmatprep.mubr.f32.mxu1 %v16273_v20  ;;  %v3404_v53 = vand.u32 4294901760, %v3393_v35 }
 0x239   : > { %v14156_v30 = vpack.c.bf16 %v2975_v38, %v2968_v54 }
 0x23a   : > { %v16359_v0 = vpack.c.bf16 %v3404_v53, %v3400_v16 }
 0x23b   : > { %14157 = vmatprep.subr.bf16.mxu1 %v14156_v30 }
 0x23c   : > { %14159 = vmatpush3.bf16.msra.mxu1 %v14156_v30  ;;  %14177 = vmatprep.subr.bf16.mxu0 %v16359_v0 }
 0x23d   : > { %14161 = vmatprep.subr.bf16.mxu1 %v14160_v46 }
 0x23f   : > { %13570 = vmatmul.mubr.f32.vlgmr.msra.gmra.mrb[42].mxu1 %v16308_v6 }
 0x240   : > { %14163 = vmatpush3.bf16.msra.mxu1 %v14160_v46  ;;  %13576 = vmatprep.mubr.f32.mxu1 %v16291_v50  ;;  %v3402_v50 = vand.u32 4294901760, %v3390_v55 }
 0x241   : > { %14165 = vmatprep.subr.bf16.mxu1 %v14152_v8 }
 0x242   : > { %v16361_v17 = vpack.c.bf16 %v3406_v9, %v3402_v50  ;;  %v16363_v36 = vsub.f32 %v3390_v55, %v3402_v50  ;;  %v3952_v55 = vld [vmem:[%s17565_s4] sm:$0xff]  ;;  %v3954_v9 = vld [vmem:[%s17565_s4 + $0x10] sm:$0xff] }
 0x244   : > { %14179 = vmatpush1.bf16.msra.mxu0 %v16361_v17  ;;  %v14186_v25 = vpack.c.bf16 %v16365_v59, %v16363_v36 }
 0x247   : > { %13577 = vmatmul.mubr.f32.vlgmr.msra.gmra.mrb[42].mxu1 %v16311_v63  ;;  %v16375_v63 = vsub.f32 %v3393_v35, %v3404_v53  ;;  %v3955_v35 = vld [vmem:[%s17565_s4 + $0x18] sm:$0xff]  ;;  %v16417_v53 = vld [vmem:[%s15176_s26 + $0x10] sm:$0xff] }
 0x248   : > { %14167 = vmatpush3.bf16.msra.mxu1 %v14152_v8  ;;  %13583 = vmatprep.mubr.f32.mxu1 %v16294_v34  ;;  %v16373_v34 = vsub.f32 %v3391_v29, %v3400_v16  ;;  %v3953_v29 = vld [vmem:[%s17565_s4 + $0x8] sm:$0xff]  ;;  %v16413_v16 = vld [vmem:[%s15176_s26] sm:$0xff]  ;;  %v3966_v50 = vand.u32 4294901760, %v3955_v35 }
 0x249   : > { %14169 = vmatprep.subr.bf16.mxu1 %v14168_v32  ;;  %v3505_v13 = vand.u32 4294901760, %v16375_v63  ;;  %4656 = vrot.lane.b32.xlu1 %v16413_v16, %s14938_s14  ;;  %v3962_v56 = vand.u32 4294901760, %v3953_v29 }
 0x24a   : > { %v3493_v44 = vand.u32 4294901760, %v16373_v34  ;;  %v14184_v21 = vpack.c.bf16 %v16375_v63, %v16373_v34  ;;  %4660 = vrot.lane.b32.xlu0 %v16417_v53, %s14938_s14 }
 0x24c   : > { %v3494_v19 = vsub.f32 %v16373_v34, %v3493_v44  ;;  %v16393_v58 = vpack.c.bf16 %v3505_v13, %v3493_v44  ;;  %v3964_v44 = vand.u32 4294901760, %v3952_v55 }
 0x24e   : > { %v3495_v12 = vand.u32 4294901760, %v3494_v19  ;;  %4654 = vrot.lane.b32.xlu0 %v14937_v61, %s14938_s14 }
 0x24f   : > { %13584 = vmatmul.mubr.f32.vlgmr.msra.gmra.mrb[42].mxu1 %v16314_v42  ;;  %v3499_v42 = vand.u32 4294901760, %v16363_v36 }
 0x250   : > { %14171 = vmatpush3.bf16.msra.mxu1 %v14168_v32  ;;  %13590 = vmatprep.mubr.f32.mxu1 %v16273_v20 }
 0x251   : > { %14173 = vmatprep.subr.bf16.mxu1 %v14152_v8  ;;  %v3500_v4 = vsub.f32 %v16363_v36, %v3499_v42  ;;  %v16395_v2 = vpack.c.bf16 %v3511_v1, %v3499_v42  ;;  %v16423_v42 = vpack.c.bf16 %v3966_v50, %v3962_v56  ;;  %v16425_v1 = vsub.f32 %v3952_v55, %v3964_v44 }
 0x253   : > { %v3501_v11 = vand.u32 4294901760, %v3500_v4  ;;  %v16432_v4 = vld [vmem:[%s15176_s26 + $0x8] sm:$0xff] }
 0x254   : > { %4658 = vrot.lane.b32.xlu1 %v16432_v4, %s14938_s14  ;;  %4623 = vrot.lane.b32.xlu0 %v16432_v4, %s14939_s18 }
 0x255   : > { %v16387_v39 = vpack.c.bf16 %v3513_v28, %v3501_v11 }
 0x257   : > { %13591 = vmatmul.mubr.f32.vlgmr.msra.gmra.mrb[42].mxu1 %v16308_v6 }
 0x258   : > { %14175 = vmatpush3.bf16.msra.mxu1 %v14152_v8  ;;  %13597 = vmatprep.mubr.f32.mxu1 %v16273_v20  ;;  %v3506_v20 = vsub.f32 %v16375_v63, %v3505_v13  ;;  %v3968_v13 = vand.u32 4294901760, %v3954_v9 }
 0x259   : > { %14201 = vmatprep.subr.bf16.mxu1 %v16423_v42 }
 0x25a   : > { %v16427_v19 = vpack.c.bf16 %v3968_v13, %v3964_v44 }
 0x25f   : > { %13598 = vmatmul.mubr.f32.vlgmr.msra.gmra.mrb[42].mxu1 %v16308_v6  ;;  %v3507_v6 = vand.u32 4294901760, %v3506_v20  ;;  %v16429_v20 = vsub.f32 %v3954_v9, %v3968_v13 }
 0x260   : > { %4030 = vmatprep.mubr.f32.mxu1 %v14937_v61  ;;  %14203 = vmatpush1.bf16.msra.mxu1 %v16427_v19 }
 0x261   : > { %v14180_v48 = vpack.c.bf16 %v3507_v6, %v3495_v12  ;;  %v16439_v12 = vld [vmem:[%s15176_s26 + $0x18] sm:$0xff]  ;;  %v14210_v63 = vpack.c.bf16 %v16429_v20, %v16425_v1 }
 0x262   : > { %4662 = vrot.lane.b32.xlu1 %v16439_v12, %s14938_s14  ;;  %4627 = vrot.lane.b32.xlu0 %v16439_v12, %s14939_s18 }
 0x263   : > { %14181 = vmatprep.subr.bf16.mxu0 %v14180_v48 }
 0x266   : > { %4621 = vrot.lane.b32.xlu1 %v16413_v16, %s14939_s18  ;;  %5785 = vrot.lane.b32.xlu0 %v16413_v16, %s14940_s19 }
 0x26a   : > { %4625 = vrot.lane.b32.xlu1 %v16417_v53, %s14939_s18  ;;  %5789 = vrot.lane.b32.xlu0 %v16417_v53, %s14940_s19 }
 0x26e   : > { %4619 = vrot.lane.b32.xlu1 %v14937_v61, %s14939_s18  ;;  %5783 = vrot.lane.b32.xlu0 %v14937_v61, %s14940_s19  ;;  %s14944_s18 = smov 112  }
 0x272   : > { %5787 = vrot.lane.b32.xlu1 %v16432_v4, %s14940_s19  ;;  %6363 = vrot.lane.b32.xlu0 %v16432_v4, %s14941_s20 }
 0x276   : > { %5791 = vrot.lane.b32.xlu1 %v16439_v12, %s14940_s19  ;;  %6367 = vrot.lane.b32.xlu0 %v16439_v12, %s14941_s20  ;;  %s447_s19 = scalar_lea.vmem %s17574_s13, %s12938_s30 }
 0x27a   : > { %6361 = vrot.lane.b32.xlu1 %v16413_v16, %s14941_s20  ;;  %7494 = vrot.lane.b32.xlu0 %v16432_v4, %s14942_s27 }
 0x27e   : > { %6365 = vrot.lane.b32.xlu1 %v16417_v53, %s14941_s20  ;;  %7500 = vrot.lane.b32.xlu0 %v16439_v12, %s14942_s27 }
 0x282   : > { %6359 = vrot.lane.b32.xlu1 %v14937_v61, %s14941_s20 }
 0x286   : > { %7496 = vrot.lane.b32.xlu1 %v14937_v61, %s14942_s27 }
 0x28a   : > { %v13522_v24 = vpop.f32.mrb[40].mxu1  ;;  %7492 = vrot.lane.b32.xlu1 %v16413_v16, %s14942_s27 }
 0x28b   : > { %v2447_v37 = vpop.f32.mrb[41].mxu1  ;;  %v2458_v60 = vadd.f32 %v13522_v24, %v16399_v14 }
 0x28c   : > { %v2448_v10 = vadd.f32 %v2447_v37, %v16397_v18 }
 0x2b2   : > { %v13557_v8 = vpop.f32.mrb[8].mxu0 }
 0x2b3   : > { %v2866_v33 = vpop.f32.mrb[9].mxu0  ;;  %v14501_v23 = vadd.f32 %v13557_v8, %v2458_v60  ;;  %v16450_v8 = vsub.f32 %v3953_v29, %v3962_v56 }
 0x2b4   : > { %v14503_v27 = vadd.f32 %v2866_v33, %v2448_v10  ;;  %v16452_v33 = vsub.f32 %v3955_v35, %v3966_v50 }
 0x2b5   : > { %v12915_v46 = vmul.f32 -1.442695, %v14501_v23 }
 0x2b6   : > { %v12914_v51 = vmul.f32 -1.442695, %v14503_v27  ;;  %v14208_v34 = vpack.c.bf16 %v16452_v33, %v16450_v8 }
 0x2b7   : > { %14872 = vpow2.f32 %v12915_v46 }
 0x2b8   : > { %14874 = vpow2.f32 %v12914_v51  ;;  %v4055_v51 = vand.u32 4294901760, %v16450_v8 }
 0x2ba   : > { %v4056_v55 = vsub.f32 %v16450_v8, %v4055_v51 }
 0x2bc   : > { %v4057_v50 = vand.u32 4294901760, %v4056_v55 }
 0x2c1   : > { %v14873_v32 = vpop.eup %14872 }
 0x2c2   : > { %v14875_v54 = vpop.eup %14874  ;;  %v3385_v38 = vadd.f32 1.0, %v14873_v32  ;;  %v4067_v32 = vand.u32 4294901760, %v16452_v33 }
 0x2c3   : > { %v3384_v30 = vadd.f32 1.0, %v14875_v54 }
 0x2c4   : > { %14876 = vrcp.f32 %v3385_v38  ;;  %v4061_v38 = vand.u32 4294901760, %v16425_v1  ;;  %v4068_v9 = vsub.f32 %v16452_v33, %v4067_v32  ;;  %v16489_v36 = vpack.c.bf16 %v4067_v32, %v4055_v51 }
 0x2c5   : > { %14878 = vrcp.f32 %v3384_v30  ;;  %v4073_v30 = vand.u32 4294901760, %v16429_v20 }
 0x2c6   : > { %v4062_v35 = vsub.f32 %v16425_v1, %v4061_v38  ;;  %v4069_v44 = vand.u32 4294901760, %v4068_v9  ;;  %v4643_v1 = vld [vmem:[%s17570_s9 + $0x8] sm:$0xff] }
 0x2c7   : > { %v4074_v56 = vsub.f32 %v16429_v20, %v4073_v30  ;;  %v16491_v59 = vpack.c.bf16 %v4073_v30, %v4061_v38  ;;  %v5229_v12 = vsel %vm2367_vm0, %v4643_v1, 0 }
 0x2c8   : > { %v4063_v13 = vand.u32 4294901760, %v4062_v35 }
 0x2ce   : > { %v14877_v22 = vpop.eup %14876 }
 0x2cf   : > { %v14879_v6 = vpop.eup %14878  ;;  %v3398_v11 = vsel %vm2367_vm0, %v14877_v22, 0  ;;  %v4075_v22 = vand.u32 4294901760, %v4074_v56 }
 0x2d0   : > { %v3395_v28 = vsel %vm2367_vm0, %v14879_v6, 0  ;;  %v16444_v48 = vand.u32 4294901760, %v3398_v11  ;;  %v14204_v6 = vpack.c.bf16 %v4069_v44, %v4057_v50 }
 0x2d1   : > { %v16446_v24 = vand.u32 4294901760, %v3395_v28 }
 0x2d2   : > { %v3481_v37 = vsub.f32 %v3398_v11, %v16444_v48  ;;  %v16467_v11 = vpack.c.bf16 %v4075_v22, %v4063_v13  ;;  %14205 = vmatprep.subr.bf16.mxu1 %v14204_v6 }
 0x2d3   : > { %v3470_v60 = vsub.f32 %v3395_v28, %v16446_v24 }
 0x2d4   : > { %v3482_v10 = vand.u32 4294901760, %v3481_v37 }
 0x2d5   : > { %v3471_v23 = vand.u32 4294901760, %v3470_v60 }
 0x2d6   : > { %v3483_v46 = vsub.f32 %v3481_v37, %v3482_v10 }
 0x2d7   : > { %v3472_v27 = vsub.f32 %v3470_v60, %v3471_v23 }
 0x2d8   : > { %v3484_v29 = vand.u32 4294901760, %v3483_v46 }
 0x2d9   : > { %v3473_v54 = vand.u32 4294901760, %v3472_v27 }
 0x2db   : > { %3474 = vmatmul.mubr.f32.vlgmr.msra.gmra.mrb[10].mxu0 %v3473_v54 }
 0x2dc   : > { %3479 = vmatprep.mubr.f32.mxu0 %v14937_v61  ;;  %14183 = vmatpush1.bf16.msra.mxu0 %v16387_v39 }
 0x2dd   : > { %14185 = vmatprep.subr.bf16.mxu0 %v14184_v21  ;;  %v12919_v21 = vld [vmem:[%s17570_s9 + $0x18] sm:$0xff] }
 0x2df   : > { %3485 = vmatmul.mubr.f32.gmra.mrb[12].mxu0 %v3484_v29 }
 0x2e0   : > { %3575 = vmatprep.mubr.f32.mxu0 %v14937_v61 }
 0x2e3   : > { %3577 = vmatmul.mubr.f32.vlgmr.msra.gmra.mrb[10].mxu0 %v16446_v24 }
 0x2e4   : > { %3582 = vmatprep.mubr.f32.mxu0 %v14937_v61  ;;  %14187 = vmatpush1.bf16.msra.mxu0 %v14186_v25 }
 0x2e5   : > { %14189 = vmatprep.subr.bf16.mxu0 %v16359_v0 }
 0x2e7   : > { %3584 = vmatmul.mubr.f32.gmra.mrb[12].mxu0 %v16444_v48 }
 0x2e8   : > { %3662 = vmatprep.mubr.f32.mxu0 %v14937_v61 }
 0x2eb   : > { %3665 = vmatmul.mubr.f32.vlgmr.msra.gmra.mrb[10].mxu0 %v3470_v60  ;;  %v4661_v60 = vpop.permute.xlu0 %4660 }
 0x2ec   : > { %3670 = vmatprep.mubr.f32.mxu0 %v14937_v61  ;;  %14191 = vmatpush1.bf16.msra.mxu0 %v16361_v17 }
 0x2ed   : > { %14193 = vmatprep.subr.bf16.mxu0 %v16393_v58 }
 0x2ef   : > { %3673 = vmatmul.mubr.f32.gmra.mrb[12].mxu0 %v3481_v37  ;;  %v4657_v37 = vpop.permute.xlu1 %4656 }
 0x2f0   : > { %3747 = vmatprep.mubr.f32.mxu0 %v14937_v61 }
 0x2f3   : > { %3751 = vmatmul.mubr.f32.vlgmr.msra.gmra.mrb[10].mxu0 %v3471_v23  ;;  %v4659_v27 = vpop.permute.xlu1 %4658 }
 0x2f4   : > { %3756 = vmatprep.mubr.f32.mxu0 %v14937_v61  ;;  %14195 = vmatpush1.bf16.msra.mxu0 %v16395_v2 }
 0x2f5   : > { %14197 = vmatprep.subr.bf16.mxu0 %v16359_v0  ;;  %v12918_v0 = vld [vmem:[%s17570_s9 + $0x10] sm:$0xff] }
 0x2f6   : > { %v4680_v39 = vsel %vm2367_vm0, %v12918_v0, 0 }
 0x2f7   : > { %3760 = vmatmul.mubr.f32.gmra.mrb[12].mxu0 %v3482_v10  ;;  %v16527_v28 = vand.u32 4294901760, %v4680_v39  ;;  %v4663_v29 = vpop.permute.xlu1 %4662 }
 0x2f8   : > { %3842 = vmatprep.mubr.f32.mxu0 %v14937_v61  ;;  %v4667_v44 = vsel %vm2367_vm0, %v4661_v60, %v4663_v29 }
 0x2f9   : > { %v16533_v23 = vsub.f32 %v4680_v39, %v16527_v28  ;;  %v4689_v39 = vand.u32 4294901760, %v4667_v44 }
 0x2fb   : > { %3844 = vmatmul.mubr.f32.vlgmr.msra.gmra.mrb[10].mxu0 %v16446_v24  ;;  %v4756_v54 = vand.u32 4294901760, %v16533_v23 }
 0x2fc   : > { %3849 = vmatprep.mubr.f32.mxu0 %v14937_v61  ;;  %14199 = vmatpush1.bf16.msra.mxu0 %v16361_v17 }
 0x2fd   : > { %v4757_v13 = vsub.f32 %v16533_v23, %v4756_v54 }
 0x2ff   : > { %3851 = vmatmul.mubr.f32.gmra.mrb[12].mxu0 %v16444_v48 }
 0x300   : > { %3925 = vmatprep.mubr.f32.mxu0 %v14937_v61 }
 0x303   : > { %3927 = vmatmul.mubr.f32.vlgmr.msra.gmra.mrb[10].mxu0 %v16446_v24 }
 0x304   : > { %3932 = vmatprep.mubr.f32.mxu0 %v14937_v61 }
 0x307   : > { %3934 = vmatmul.mubr.f32.gmra.mrb[12].mxu0 %v16444_v48  ;;  %v4683_v48 = vsel %vm2367_vm0, %v12919_v21, 0 }
 0x308   : > { %4753 = vmatprep.mubr.f32.mxu0 %v14937_v61  ;;  %v16530_v10 = vand.u32 4294901760, %v4683_v48 }
 0x30a   : > { %v16536_v46 = vsub.f32 %v4683_v48, %v16530_v10 }
 0x30c   : > { %v4767_v22 = vand.u32 4294901760, %v16536_v46 }
 0x332   : > { %v13599_v17 = vpop.f32.mrb[42].mxu1 }
 0x333   : > { %v14504_v25 = vadd.f32 %v13599_v17, %v16399_v14  ;;  %v3368_v58 = vpop.f32.mrb[43].mxu1  ;;  %v4655_v14 = vpop.permute.xlu0 %4654 }
 0x334   : > { %v14505_v2 = vadd.f32 %v3368_v58, %v16397_v18  ;;  %v4665_v18 = vsel %vm2367_vm0, %v4657_v37, %v4659_v27  ;;  %v4664_v51 = vsel %vm2367_vm0, %v4655_v14, %v4657_v37  ;;  %v4666_v32 = vsel %vm2367_vm0, %v4655_v14, %v4661_v60 }
 0x335   : > { %v12917_v53 = vmul.f32 -1.442695, %v14504_v25  ;;  %v4685_v38 = vand.u32 4294901760, %v4665_v18  ;;  %v4687_v30 = vand.u32 4294901760, %v4664_v51  ;;  %v4691_v55 = vand.u32 4294901760, %v4666_v32 }
 0x336   : > { %v12916_v24 = vmul.f32 -1.442695, %v14505_v2  ;;  %v4758_v14 = vand.u32 4294901760, %v4757_v13 }
 0x337   : > { %14880 = vpow2.f32 %v12917_v53  ;;  %v16542_v9 = vsub.f32 %v4665_v18, %v4685_v38  ;;  %v16544_v35 = vsub.f32 %v4664_v51, %v4687_v30  ;;  %v16546_v56 = vsub.f32 %v4666_v32, %v4691_v55 }
 0x338   : > { %14882 = vpow2.f32 %v12916_v24  ;;  %v16555_v58 = vpack.c.bf16 %v4691_v55, %v4687_v30  ;;  %v4789_v53 = vsub.f32 %v4667_v44, %v4689_v39  ;;  %v16561_v24 = vpack.c.bf16 %v4689_v39, %v4685_v38 }
 0x339   : > { %v4778_v17 = vand.u32 4294901760, %v16542_v9  ;;  %v4784_v21 = vand.u32 4294901760, %v16544_v35  ;;  %v4796_v2 = vand.u32 4294901760, %v16546_v56  ;;  %v4768_v18 = vsub.f32 %v16536_v46, %v4767_v22 }
 0x33a   : > { %v4790_v27 = vand.u32 4294901760, %v4789_v53  ;;  %14225 = vmatprep.subr.bf16.mxu0 %v16561_v24 }
 0x33b   : > { %v4785_v48 = vsub.f32 %v16544_v35, %v4784_v21  ;;  %v4797_v37 = vsub.f32 %v16546_v56, %v4796_v2  ;;  %v4779_v60 = vsub.f32 %v16542_v9, %v4778_v17  ;;  %14227 = vmatpush1.bf16.msra.mxu0 %v16555_v58  ;;  %v4769_v55 = vand.u32 4294901760, %v4768_v18 }
 0x33c   : > { %v4791_v30 = vsub.f32 %v4789_v53, %v4790_v27  ;;  %v14242_v8 = vpack.c.bf16 %v4796_v2, %v4784_v21 }
 0x33d   : > { %v4786_v51 = vand.u32 4294901760, %v4785_v48  ;;  %v4798_v32 = vand.u32 4294901760, %v4797_v37  ;;  %v4780_v38 = vand.u32 4294901760, %v4779_v60 }
 0x33e   : > { %4759 = vmatmul.mubr.f32.vlgmr.msra.gmra.mrb[14].mxu0 %v4758_v14  ;;  %v4792_v29 = vand.u32 4294901760, %v4791_v30  ;;  %v14240_v30 = vpack.c.bf16 %v4790_v27, %v4778_v17 }
 0x33f   : > { %4764 = vmatprep.mubr.f32.mxu0 %v14937_v61 }
 0x340   : > { %v14228_v44 = vpack.c.bf16 %v4792_v29, %v4780_v38 }
 0x341   : > { %v14881_v50 = vpop.eup %14880 }
 0x342   : > { %v14883_v6 = vpop.eup %14882  ;;  %v3947_v0 = vadd.f32 1.0, %v14881_v50  ;;  %v14230_v50 = vpack.c.bf16 %v4798_v32, %v4786_v51  ;;  %4770 = vmatmul.mubr.f32.gmra.mrb[16].mxu0 %v4769_v55  ;;  %14229 = vmatprep.subr.bf16.mxu0 %v14228_v44  ;;  %v4575_v55 = vlaneseq }
 0x343   : > { %v3946_v25 = vadd.f32 1.0, %v14883_v6  ;;  %v14232_v6 = vpack.c.bf16 %v4789_v53, %v16542_v9  ;;  %4860 = vmatprep.mubr.f32.mxu0 %v14937_v61 }
 0x344   : > { %14884 = vrcp.f32 %v3947_v0  ;;  %14231 = vmatpush1.bf16.msra.mxu0 %v14230_v50  ;;  %v16611_v50 = vand.u32 127, %v4575_v55 }
 0x345   : > { %14886 = vrcp.f32 %v3946_v25  ;;  %v14234_v25 = vpack.c.bf16 %v16546_v56, %v16544_v35  ;;  %14233 = vmatprep.subr.bf16.mxu0 %v14232_v6 }
 0x346   : > { %v16626_v33 = vadd.s32 128, %v16611_v50 }
 0x347   : > { %4862 = vmatmul.mubr.f32.vlgmr.msra.gmra.mrb[14].mxu0 %v16527_v28 }
 0x348   : > { %4867 = vmatprep.mubr.f32.mxu0 %v14937_v61  ;;  %14235 = vmatpush1.bf16.msra.mxu0 %v14234_v25  ;;  %v4589_v4 = vand.u32 15, %v16626_v33 }
 0x349   : > { %14237 = vmatprep.subr.bf16.mxu0 %v16561_v24 }
 0x34a   : > { %v16655_v20 = vadd.s32 4294967295, %v4589_v4 }
 0x34b   : > { %4869 = vmatmul.mubr.f32.gmra.mrb[16].mxu0 %v16530_v10 }
 0x34c   : > { %4947 = vmatprep.mubr.f32.mxu0 %v14937_v61  ;;  %vm4605_vm2 = vcmp.ge.s32.totalorder %v16655_v20, 0 }
 0x34e   : > { %v14885_v13 = vpop.eup %14884 }
 0x34f   : > { %v14887_v0 = vpop.eup %14886  ;;  %v3960_v39 = vsel %vm2367_vm0, %v14885_v13, 0  ;;  %4950 = vmatmul.mubr.f32.vlgmr.msra.gmra.mrb[14].mxu0 %v16533_v23  ;;  %v4622_v23 = vpop.permute.xlu1 %4621 }
 0x350   : > { %v3957_v48 = vsel %vm2367_vm0, %v14887_v0, 0  ;;  %v16579_v37 = vand.u32 4294901760, %v3960_v39  ;;  %4955 = vmatprep.mubr.f32.mxu0 %v14937_v61  ;;  %14239 = vmatpush1.bf16.msra.mxu0 %v16555_v58 }
 0x351   : > { %v16581_v60 = vand.u32 4294901760, %v3957_v48  ;;  %14241 = vmatprep.subr.bf16.mxu0 %v14240_v30 }
 0x352   : > { %v16584_v9 = vsub.f32 %v3960_v39, %v16579_v37 }
 0x353   : > { %v16588_v53 = vsub.f32 %v3957_v48, %v16581_v60  ;;  %4958 = vmatmul.mubr.f32.gmra.mrb[16].mxu0 %v16536_v46  ;;  %v4624_v46 = vpop.permute.xlu0 %4623  ;;  %v4626_v21 = vpop.permute.xlu1 %4625 }
 0x354   : > { %v4044_v18 = vand.u32 4294901760, %v16584_v9  ;;  %5032 = vmatprep.mubr.f32.mxu0 %v14937_v61 }
 0x355   : > { %v4033_v14 = vand.u32 4294901760, %v16588_v53 }
 0x356   : > { %v4045_v38 = vsub.f32 %v16584_v9, %v4044_v18 }
 0x357   : > { %v4034_v51 = vsub.f32 %v16588_v53, %v4033_v14  ;;  %5036 = vmatmul.mubr.f32.vlgmr.msra.gmra.mrb[14].mxu0 %v4756_v54  ;;  %v16672_v54 = vand.u32 4294901760, %v5229_v12 }
 0x358   : > { %v4046_v29 = vand.u32 4294901760, %v4045_v38  ;;  %5041 = vmatprep.mubr.f32.mxu0 %v14937_v61  ;;  %14243 = vmatpush1.bf16.msra.mxu0 %v14242_v8 }
 0x359   : > { %v4035_v32 = vand.u32 4294901760, %v4034_v51  ;;  %14245 = vmatprep.subr.bf16.mxu0 %v16561_v24  ;;  %v16690_v2 = vsub.f32 %v5229_v12, %v16672_v54 }
 0x35b   : > { %4036 = vmatmul.mubr.f32.vlgmr.msra.gmra.mrb[44].mxu1 %v4035_v32  ;;  %5045 = vmatmul.mubr.f32.gmra.mrb[16].mxu0 %v4767_v22 }
 0x35c   : > { %4041 = vmatprep.mubr.f32.mxu1 %v14937_v61  ;;  %14207 = vmatpush1.bf16.msra.mxu1 %v16467_v11  ;;  %v4642_v11 = vld [vmem:[%s17570_s9] sm:$0xff] }
 0x35d   : > { %14209 = vmatprep.subr.bf16.mxu1 %v14208_v34  ;;  %5127 = vmatprep.mubr.f32.mxu0 %v14937_v61  ;;  %v5226_v34 = vsel %vm2367_vm0, %v4642_v11, 0 }
 0x35e   : > { %v16665_v16 = vand.u32 4294901760, %v5226_v34 }
 0x35f   : > { %4047 = vmatmul.mubr.f32.gmra.mrb[46].mxu1 %v4046_v29  ;;  %5129 = vmatmul.mubr.f32.vlgmr.msra.gmra.mrb[14].mxu0 %v16527_v28 }
 0x360   : > { %4137 = vmatprep.mubr.f32.mxu1 %v14937_v61  ;;  %5134 = vmatprep.mubr.f32.mxu0 %v14937_v61  ;;  %v16679_v56 = vsub.f32 %v5226_v34, %v16665_v16 }
 0x361   : > { %14247 = vmatpush1.bf16.msra.mxu0 %v16555_v58  ;;  %v4628_v58 = vpop.permute.xlu0 %4627 }
 0x362   : > { %v4633_v27 = vsel %vm4629_vm1, %v4626_v21, %v4628_v58  ;;  %v5302_v44 = vand.u32 4294901760, %v16679_v56 }
 0x363   : > { %4139 = vmatmul.mubr.f32.vlgmr.msra.gmra.mrb[44].mxu1 %v16581_v60  ;;  %5136 = vmatmul.mubr.f32.gmra.mrb[16].mxu0 %v16530_v10 }
 0x364   : > { %4144 = vmatprep.mubr.f32.mxu1 %v14937_v61  ;;  %14211 = vmatpush1.bf16.msra.mxu1 %v14210_v63  ;;  %v4582_v63 = vand.u32 15, %v16611_v50 }
 0x365   : > { %14213 = vmatprep.subr.bf16.mxu1 %v16423_v42  ;;  %5210 = vmatprep.mubr.f32.mxu0 %v14937_v61 }
 0x366   : > { %v16683_v17 = vadd.s32 4294967295, %v4582_v63 }
 0x367   : > { %4146 = vmatmul.mubr.f32.gmra.mrb[46].mxu1 %v16579_v37  ;;  %5212 = vmatmul.mubr.f32.vlgmr.msra.gmra.mrb[14].mxu0 %v16527_v28  ;;  %v4641_v28 = vsel %vm4605_vm2, %v4633_v27, 0.0 }
 0x368   : > { %4224 = vmatprep.mubr.f32.mxu1 %v14937_v61  ;;  %5217 = vmatprep.mubr.f32.mxu0 %v14937_v61  ;;  %v5235_v13 = vand.u32 4294901760, %v4641_v28  ;;  %vm4604_vm3 = vcmp.ge.s32.totalorder %v16683_v17, 0 }
 0x36a   : > { %v16709_v0 = vsub.f32 %v4641_v28, %v5235_v13 }
 0x36b   : > { %4227 = vmatmul.mubr.f32.vlgmr.msra.gmra.mrb[44].mxu1 %v16588_v53  ;;  %5219 = vmatmul.mubr.f32.gmra.mrb[16].mxu0 %v16530_v10  ;;  %v5303_v53 = vsub.f32 %v16679_v56, %v5302_v44 }
 0x36c   : > { %4232 = vmatprep.mubr.f32.mxu1 %v14937_v61  ;;  %14215 = vmatpush1.bf16.msra.mxu1 %v16427_v19 }
 0x36d   : > { %14217 = vmatprep.subr.bf16.mxu1 %v16489_v36  ;;  %v4631_v36 = vsel %vm4629_vm1, %v4622_v23, %v4624_v46  ;;  %5299 = vmatprep.mubr.f32.mxu0 %v14937_v61  ;;  %v5304_v29 = vand.u32 4294901760, %v5303_v53 }
 0x36e   : > { %v4639_v35 = vsel %vm4605_vm2, %v4631_v36, 0.0 }
 0x36f   : > { %4235 = vmatmul.mubr.f32.gmra.mrb[46].mxu1 %v16584_v9  ;;  %v5231_v22 = vand.u32 4294901760, %v4639_v35 }
 0x370   : > { %4309 = vmatprep.mubr.f32.mxu1 %v14937_v61 }
 0x371   : > { %v16694_v24 = vsub.f32 %v4639_v35, %v5231_v22  ;;  %v16713_v48 = vpack.c.bf16 %v5235_v13, %v5231_v22  ;;  %v5786_v13 = vpop.permute.xlu0 %5785 }
 0x373   : > { %4313 = vmatmul.mubr.f32.vlgmr.msra.gmra.mrb[44].mxu1 %v4033_v14  ;;  %v5324_v6 = vand.u32 4294901760, %v16694_v24  ;;  %14249 = vmatprep.subr.bf16.mxu0 %v16713_v48  ;;  %v14256_v58 = vpack.c.bf16 %v16709_v0, %v16694_v24 }
 0x374   : > { %4318 = vmatprep.mubr.f32.mxu1 %v14937_v61  ;;  %14219 = vmatpush1.bf16.msra.mxu1 %v16491_v59  ;;  %v4620_v59 = vpop.permute.xlu1 %4619 }
 0x375   : > { %14221 = vmatprep.subr.bf16.mxu1 %v16423_v42  ;;  %v5313_v42 = vand.u32 4294901760, %v16690_v2  ;;  %v4630_v39 = vsel %vm4629_vm1, %v4620_v59, %v4622_v23  ;;  %v4632_v25 = vsel %vm4629_vm1, %v4620_v59, %v4626_v21  ;;  %v5325_v14 = vsub.f32 %v16694_v24, %v5324_v6 }
 0x376   : > { %v4638_v10 = vsel %vm4604_vm3, %v4630_v39, 0.0  ;;  %v4640_v9 = vsel %vm4604_vm3, %v4632_v25, 0.0  ;;  %v5790_v39 = vpop.permute.xlu0 %5789 }
 0x377   : > { %4322 = vmatmul.mubr.f32.gmra.mrb[46].mxu1 %v4044_v18  ;;  %v5336_v18 = vand.u32 4294901760, %v16709_v0  ;;  %v5233_v51 = vand.u32 4294901760, %v4638_v10  ;;  %v5237_v32 = vand.u32 4294901760, %v4640_v9  ;;  %v5314_v8 = vsub.f32 %v16690_v2, %v5313_v42 }
 0x378   : > { %4404 = vmatprep.mubr.f32.mxu1 %v14937_v61  ;;  %v5326_v11 = vand.u32 4294901760, %v5325_v14  ;;  %v5788_v28 = vpop.permute.xlu1 %5787 }
 0x379   : > { %v16730_v38 = vpack.c.bf16 %v5237_v32, %v5233_v51  ;;  %v16732_v30 = vsub.f32 %v4638_v10, %v5233_v51  ;;  %v5341_v55 = vsub.f32 %v4640_v9, %v5237_v32  ;;  %v5337_v1 = vsub.f32 %v16709_v0, %v5336_v18 }
 0x37a   : > { %v5315_v36 = vand.u32 4294901760, %v5314_v8  ;;  %v14264_v33 = vpack.c.bf16 %v5336_v18, %v5324_v6  ;;  %v16771_v9 = vadd.s32 1, %v4582_v63  ;;  %v5784_v53 = vpop.permute.xlu0 %5783 }
 0x37b   : > { %4406 = vmatmul.mubr.f32.vlgmr.msra.gmra.mrb[44].mxu1 %v16581_v60  ;;  %v5330_v34 = vand.u32 4294901760, %v16732_v30  ;;  %v5342_v12 = vand.u32 4294901760, %v5341_v55  ;;  %14251 = vmatpush1.bf16.msra.mxu0 %v16730_v38  ;;  %v14258_v59 = vpack.c.bf16 %v5341_v55, %v16732_v30  ;;  %v5794_v14 = vsel %vm5793_vm4, %v5784_v53, %v5786_v13 }
 0x37c   : > { %4411 = vmatprep.mubr.f32.mxu1 %v14937_v61  ;;  %14223 = vmatpush1.bf16.msra.mxu1 %v16427_v19  ;;  %v5338_v19 = vand.u32 4294901760, %v5337_v1  ;;  %v5792_v0 = vpop.permute.xlu1 %5791  ;;  %vm5775_vm6 = vcmp.lt.s32.totalorder %v16771_v9, 16  ;;  %v5796_v18 = vsel %vm5793_vm4, %v5784_v53, %v5790_v39 }
 0x37d   : > { %v5331_v23 = vsub.f32 %v16732_v30, %v5330_v34  ;;  %v5343_v46 = vsub.f32 %v5341_v55, %v5342_v12  ;;  %v5797_v25 = vsel %vm5793_vm4, %v5790_v39, %v5792_v0  ;;  %v14266_v50 = vpack.c.bf16 %v5342_v12, %v5330_v34  ;;  %v12920_v55 = vld [vmem:[%s17570_s9 + $0x20] sm:$0xff]  ;;  %v12921_v12 = vld [vmem:[%s17570_s9 + $0x28] sm:$0xff] }
 0x37e   : > { %5305 = vmatmul.mubr.f32.vlgmr.msra.gmra.mrb[14].mxu0 %v5304_v29  ;;  %v14252_v35 = vpack.c.bf16 %v5338_v19, %v5326_v11  ;;  %v5802_v32 = vsel %vm5775_vm6, %v5794_v14, 0.0  ;;  %v5804_v30 = vsel %vm5775_vm6, %v5796_v18, 0.0  ;;  %v5810_v11 = vsel %vm2367_vm0, %v12920_v55, 0 }
 0x37f   : > { %4413 = vmatmul.mubr.f32.gmra.mrb[46].mxu1 %v16579_v37  ;;  %v5332_v22 = vand.u32 4294901760, %v5331_v23  ;;  %v5344_v21 = vand.u32 4294901760, %v5343_v46  ;;  %5310 = vmatprep.mubr.f32.mxu0 %v14937_v61  ;;  %v5817_v29 = vand.u32 4294901760, %v5802_v32  ;;  %v5821_v8 = vand.u32 4294901760, %v5804_v30 }
 0x380   : > { %4487 = vmatprep.mubr.f32.mxu1 %v14937_v61  ;;  %14253 = vmatprep.subr.bf16.mxu0 %v14252_v35  ;;  %v5813_v23 = vsel %vm2367_vm0, %v12921_v12, 0  ;;  %v6362_v18 = vpop.permute.xlu1 %6361 }
 0x381   : > { %v14254_v27 = vpack.c.bf16 %v5344_v21, %v5332_v22  ;;  %v5925_v19 = vsub.f32 %v5804_v30, %v5821_v8  ;;  %v16812_v22 = vand.u32 4294901760, %v5813_v23 }
 0x382   : > { %5316 = vmatmul.mubr.f32.gmra.mrb[16].mxu0 %v5315_v36 }
 0x383   : > { %4489 = vmatmul.mubr.f32.vlgmr.msra.gmra.mrb[44].mxu1 %v16581_v60  ;;  %14255 = vmatpush1.bf16.msra.mxu0 %v14254_v27  ;;  %v16754_v60 = vadd.s32 1, %v4589_v4 }
 0x384   : > { %4494 = vmatprep.mubr.f32.mxu1 %v14937_v61  ;;  %5406 = vmatprep.mubr.f32.mxu0 %v14937_v61 }
 0x385   : > { %14257 = vmatprep.subr.bf16.mxu0 %v14256_v58  ;;  %vm5776_vm5 = vcmp.lt.s32.totalorder %v16754_v60, 16 }
 0x386   : > { %5408 = vmatmul.mubr.f32.vlgmr.msra.gmra.mrb[14].mxu0 %v16665_v16  ;;  %v5805_v10 = vsel %vm5776_vm5, %v5797_v25, 0.0 }
 0x387   : > { %4496 = vmatmul.mubr.f32.gmra.mrb[46].mxu1 %v16579_v37  ;;  %5413 = vmatprep.mubr.f32.mxu0 %v14937_v61  ;;  %v5795_v37 = vsel %vm5793_vm4, %v5786_v13, %v5788_v28  ;;  %v5819_v6 = vand.u32 4294901760, %v5805_v10  ;;  %v5896_v28 = vsub.f32 %v5813_v23, %v16812_v22  ;;  %v14274_v13 = vpack.c.bf16 %v5821_v8, %v5817_v29  ;;  %v12922_v8 = vld [vmem:[%s17570_s9 + $0x30] sm:$0xff] }
 0x388   : > { %14259 = vmatpush1.bf16.msra.mxu0 %v14258_v59  ;;  %v5803_v4 = vsel %vm5776_vm5, %v5795_v37, 0.0  ;;  %13604 = vmatprep.mubr.msk.f32.mxu1 %vm14947_vm12, %v14937_v61 }
 0x389   : > { %14261 = vmatprep.subr.bf16.mxu0 %v16713_v48  ;;  %v5815_v24 = vand.u32 4294901760, %v5803_v4  ;;  %v16783_v51 = vsub.f32 %v5805_v10, %v5819_v6 }
 0x38a   : > { %5415 = vmatmul.mubr.f32.gmra.mrb[16].mxu0 %v16672_v54 }
 0x38b   : > { %5493 = vmatprep.mubr.f32.mxu0 %v14937_v61  ;;  %v16781_v63 = vsub.f32 %v5803_v4, %v5815_v24  ;;  %v5920_v34 = vand.u32 4294901760, %v16783_v51  ;;  %v14272_v46 = vpack.c.bf16 %v5819_v6, %v5815_v24 }
 0x38d   : > { %v5908_v1 = vand.u32 4294901760, %v16781_v63  ;;  %v5921_v36 = vsub.f32 %v16783_v51, %v5920_v34  ;;  %v14280_v24 = vpack.c.bf16 %v16783_v51, %v16781_v63 }
 0x38e   : > { %5496 = vmatmul.mubr.f32.vlgmr.msra.gmra.mrb[14].mxu0 %v16679_v56  ;;  %v16804_v56 = vand.u32 4294901760, %v5810_v11 }
 0x38f   : > { %5501 = vmatprep.mubr.f32.mxu0 %v14937_v61  ;;  %14263 = vmatpush1.bf16.msra.mxu0 %v16730_v38  ;;  %v5922_v58 = vand.u32 4294901760, %v5921_v36 }
 0x390   : > { %14265 = vmatprep.subr.bf16.mxu0 %v14264_v33  ;;  %v5885_v35 = vsub.f32 %v5810_v11, %v16804_v56 }
 0x392   : > { %5504 = vmatmul.mubr.f32.gmra.mrb[16].mxu0 %v16690_v2  ;;  %v5886_v27 = vand.u32 4294901760, %v5885_v35 }
 0x393   : > { %5578 = vmatprep.mubr.f32.mxu0 %v14937_v61 }
 0x394   : > { %v5887_v37 = vsub.f32 %v5885_v35, %v5886_v27 }
 0x396   : > { %5582 = vmatmul.mubr.f32.vlgmr.msra.gmra.mrb[14].mxu0 %v5302_v44  ;;  %v5913_v44 = vsub.f32 %v5802_v32, %v5817_v29  ;;  %v5888_v4 = vand.u32 4294901760, %v5887_v37  ;;  %v6366_v32 = vpop.permute.xlu1 %6365 }
 0x397   : > { %5587 = vmatprep.mubr.f32.mxu0 %v14937_v61  ;;  %14267 = vmatpush1.bf16.msra.mxu0 %v14266_v50  ;;  %v6364_v50 = vpop.permute.xlu0 %6363 }
 0x398   : > { %14269 = vmatprep.subr.bf16.mxu0 %v16713_v48  ;;  %v5909_v48 = vsub.f32 %v16781_v63, %v5908_v1  ;;  %v5914_v2 = vand.u32 4294901760, %v5913_v44  ;;  %v14282_v6 = vpack.c.bf16 %v5925_v19, %v5913_v44  ;;  %v6371_v63 = vsel %vm6369_vm7, %v6362_v18, %v6364_v50 }
 0x399   : > { %v6379_v51 = vsel %vm4605_vm2, %v6371_v63, 0.0 }
 0x39a   : > { %5591 = vmatmul.mubr.f32.gmra.mrb[16].mxu0 %v5313_v42  ;;  %v5926_v42 = vand.u32 4294901760, %v5925_v19  ;;  %v5910_v21 = vand.u32 4294901760, %v5909_v48  ;;  %v5915_v59 = vsub.f32 %v5913_v44, %v5914_v2  ;;  %v6391_v30 = vand.u32 4294901760, %v6379_v51  ;;  %v6360_v44 = vpop.permute.xlu1 %6359 }
 0x39b   : > { %5673 = vmatprep.mubr.f32.mxu0 %v14937_v61  ;;  %v6370_v48 = vsel %vm6369_vm7, %v6360_v44, %v6362_v18  ;;  %v6372_v36 = vsel %vm6369_vm7, %v6360_v44, %v6366_v32 }
 0x39c   : > { %v5927_v0 = vsub.f32 %v5925_v19, %v5926_v42  ;;  %v14276_v39 = vpack.c.bf16 %v5922_v58, %v5910_v21  ;;  %v5916_v25 = vand.u32 4294901760, %v5915_v59  ;;  %v14290_v14 = vpack.c.bf16 %v5926_v42, %v5914_v2  ;;  %v12923_v58 = vld [vmem:[%s17570_s9 + $0x38] sm:$0xff] }
 0x39d   : > { %v16849_v11 = vsub.f32 %v6379_v51, %v6391_v30  ;;  %v6378_v42 = vsel %vm4604_vm3, %v6370_v48, 0.0  ;;  %v6389_v59 = vsel %vm2367_vm0, %v12923_v58, 0  ;;  %v12925_v58 = vld [vmem:[%s17570_s9 + $0x48] sm:$0xff] }
 0x39e   : > { %5675 = vmatmul.mubr.f32.vlgmr.msra.gmra.mrb[14].mxu0 %v16665_v16  ;;  %v5928_v33 = vand.u32 4294901760, %v5927_v0 }
 0x39f   : > { %5680 = vmatprep.mubr.f32.mxu0 %v14937_v61  ;;  %14271 = vmatpush1.bf16.msra.mxu0 %v16730_v38  ;;  %v5897_v38 = vand.u32 4294901760, %v5896_v28 }
 0x3a0   : > { %14273 = vmatprep.subr.bf16.mxu0 %v14272_v46  ;;  %v14278_v53 = vpack.c.bf16 %v5928_v33, %v5916_v25 }
 0x3a1   : > { %v5898_v10 = vsub.f32 %v5896_v28, %v5897_v38 }
 0x3a2   : > { %5682 = vmatmul.mubr.f32.gmra.mrb[16].mxu0 %v16672_v54 }
 0x3a3   : > { %5756 = vmatprep.mubr.f32.mxu0 %v14937_v61 }
 0x3a6   : > { %5758 = vmatmul.mubr.f32.vlgmr.msra.gmra.mrb[14].mxu0 %v16665_v16  ;;  %v5899_v16 = vand.u32 4294901760, %v5898_v10 }
 0x3a7   : > { %5763 = vmatprep.mubr.f32.mxu0 %v14937_v61  ;;  %14275 = vmatpush1.bf16.msra.mxu0 %v14274_v13 }
 0x3a8   : > { %14277 = vmatprep.subr.bf16.mxu0 %v14276_v39 }
 0x3aa   : > { %5765 = vmatmul.mubr.f32.gmra.mrb[16].mxu0 %v16672_v54  ;;  %v14288_v54 = vpack.c.bf16 %v5920_v34, %v5908_v1  ;;  %v6368_v1 = vpop.permute.xlu0 %6367  ;;  %v6386_v34 = vsel %vm2367_vm0, %v12922_v8, 0 }
 0x3ab   : > { %5883 = vmatprep.mubr.f32.mxu0 %v14937_v61  ;;  %v6373_v12 = vsel %vm6369_vm7, %v6366_v32, %v6368_v1  ;;  %v16854_v19 = vand.u32 4294901760, %v6386_v34 }
 0x3ad   : > { %v6461_v21 = vsub.f32 %v6386_v34, %v16854_v19 }
 0x3ae   : > { %5889 = vmatmul.mubr.f32.vlgmr.msra.gmra.mrb[14].mxu0 %v5888_v4 }
 0x3af   : > { %5894 = vmatprep.mubr.f32.mxu0 %v14937_v61  ;;  %14279 = vmatpush1.bf16.msra.mxu0 %v14278_v53  ;;  %v6462_v37 = vand.u32 4294901760, %v6461_v21 }
 0x3b0   : > { %14281 = vmatprep.subr.bf16.mxu0 %v14280_v24 }
 0x3b1   : > { %v6463_v53 = vsub.f32 %v6461_v21, %v6462_v37 }
 0x3b2   : > { %5900 = vmatmul.mubr.f32.gmra.mrb[16].mxu0 %v5899_v16 }
 0x3b3   : > { %5990 = vmatprep.mubr.f32.mxu0 %v14937_v61 }
 0x3b6   : > { %5992 = vmatmul.mubr.f32.vlgmr.msra.gmra.mrb[14].mxu0 %v16804_v56 }
 0x3b7   : > { %5997 = vmatprep.mubr.f32.mxu0 %v14937_v61  ;;  %14283 = vmatpush1.bf16.msra.mxu0 %v14282_v6 }
 0x3b8   : > { %14285 = vmatprep.subr.bf16.mxu0 %v14272_v46 }
 0x3ba   : > { %5999 = vmatmul.mubr.f32.gmra.mrb[16].mxu0 %v16812_v22 }
 0x3bb   : > { %6077 = vmatprep.mubr.f32.mxu0 %v14937_v61 }
 0x3be   : > { %6080 = vmatmul.mubr.f32.vlgmr.msra.gmra.mrb[14].mxu0 %v5885_v35 }
 0x3bf   : > { %6085 = vmatprep.mubr.f32.mxu0 %v14937_v61  ;;  %14287 = vmatpush1.bf16.msra.mxu0 %v14274_v13 }
 0x3c0   : > { %14289 = vmatprep.subr.bf16.mxu0 %v14288_v54  ;;  %v6464_v54 = vand.u32 4294901760, %v6463_v53 }
 0x3c2   : > { %6088 = vmatmul.mubr.f32.gmra.mrb[16].mxu0 %v5896_v28  ;;  %v6393_v28 = vand.u32 4294901760, %v6378_v42 }
 0x3c3   : > { %6162 = vmatprep.mubr.f32.mxu0 %v14937_v61 }
 0x3c4   : > { %v6489_v33 = vsub.f32 %v6378_v42, %v6393_v28 }
 0x3c6   : > { %6166 = vmatmul.mubr.f32.vlgmr.msra.gmra.mrb[14].mxu0 %v5886_v27  ;;  %v6484_v27 = vand.u32 4294901760, %v16849_v11  ;;  %v6490_v16 = vand.u32 4294901760, %v6489_v33 }
 0x3c7   : > { %6171 = vmatprep.mubr.f32.mxu0 %v14937_v61  ;;  %14291 = vmatpush1.bf16.msra.mxu0 %v14290_v14 }
 0x3c8   : > { %14293 = vmatprep.subr.bf16.mxu0 %v14272_v46  ;;  %v6381_v46 = vsel %vm4605_vm2, %v6373_v12, 0.0  ;;  %v6491_v50 = vsub.f32 %v6489_v33, %v6490_v16 }
 0x3c9   : > { %v6395_v2 = vand.u32 4294901760, %v6381_v46 }
 0x3ca   : > { %6175 = vmatmul.mubr.f32.gmra.mrb[16].mxu0 %v5897_v38  ;;  %v16876_v38 = vand.u32 4294901760, %v6389_v59  ;;  %v6492_v8 = vand.u32 4294901760, %v6491_v50 }
 0x3cb   : > { %6257 = vmatprep.mubr.f32.mxu0 %v14937_v61  ;;  %v6495_v0 = vsub.f32 %v6381_v46, %v6395_v2  ;;  %v14296_v39 = vpack.c.bf16 %v6395_v2, %v6391_v30  ;;  %v12924_v2 = vld [vmem:[%s17570_s9 + $0x40] sm:$0xff] }
 0x3cc   : > { %v6472_v24 = vsub.f32 %v6389_v59, %v16876_v38  ;;  %v6943_v42 = vsel %vm2367_vm0, %v12924_v2, 0  ;;  %v16915_v59 = vpop.permute.xlu0 %7494 }
 0x3cd   : > { %v6496_v10 = vand.u32 4294901760, %v6495_v0  ;;  %v14304_v44 = vpack.c.bf16 %v6495_v0, %v16849_v11 }
 0x3ce   : > { %6259 = vmatmul.mubr.f32.vlgmr.msra.gmra.mrb[14].mxu0 %v16804_v56  ;;  %v6473_v14 = vand.u32 4294901760, %v6472_v24 }
 0x3cf   : > { %6264 = vmatprep.mubr.f32.mxu0 %v14937_v61  ;;  %14295 = vmatpush1.bf16.msra.mxu0 %v14274_v13  ;;  %v6497_v18 = vsub.f32 %v6495_v0, %v6496_v10 }
 0x3d0   : > { %14297 = vmatprep.subr.bf16.mxu0 %v14296_v39  ;;  %v6474_v51 = vsub.f32 %v6472_v24, %v6473_v14 }
 0x3d1   : > { %v6498_v30 = vand.u32 4294901760, %v6497_v18 }
 0x3d2   : > { %6266 = vmatmul.mubr.f32.gmra.mrb[16].mxu0 %v16812_v22  ;;  %v6475_v34 = vand.u32 4294901760, %v6474_v51 }
 0x3d3   : > { %6340 = vmatprep.mubr.f32.mxu0 %v14937_v61 }
 0x3d6   : > { %v16841_v55 = vpop.f32.mrb[10].mxu0  ;;  %6342 = vmatmul.mubr.f32.vlgmr.msra.gmra.mrb[14].mxu0 %v16804_v56  ;;  %v6380_v56 = vsel %vm4604_vm3, %v6372_v36, 0.0 }
 0x3d7   : > { %v16844_v29 = vpop.f32.mrb[11].mxu0  ;;  %6347 = vmatprep.mubr.f32.mxu0 %v14937_v61  ;;  %v6397_v13 = vand.u32 4294901760, %v6380_v56 }
 0x3d9   : > { %v14298_v25 = vpack.c.bf16 %v6397_v13, %v6393_v28  ;;  %v6501_v4 = vsub.f32 %v6380_v56, %v6397_v13  ;;  %v16900_v56 = vand.u32 4294901760, %v6943_v42  ;;  %v16912_v28 = vpack.c.bf16 %v17908_v41, %v17906_v43 }
 0x3da   : > { %v16856_v23 = vpop.f32.mrb[12].mxu0  ;;  %6349 = vmatmul.mubr.f32.gmra.mrb[16].mxu0 %v16812_v22  ;;  %v6485_v22 = vsub.f32 %v16849_v11, %v6484_v27  ;;  %v14312_v11 = vpack.c.bf16 %v6496_v10, %v6484_v27  ;;  %v14320_v27 = vpack.c.bf16 %v17907_v3, %v17867_v45  ;;  %v6946_v13 = vsel %vm2367_vm0, %v12925_v58, 0 }
 0x3db   : > { %v16863_v35 = vpop.f32.mrb[13].mxu0  ;;  %6459 = vmatprep.mubr.f32.mxu0 %v14937_v61  ;;  %v6502_v6 = vand.u32 4294901760, %v6501_v4  ;;  %14299 = vmatpush1.bf16.msra.mxu0 %v14298_v25  ;;  %v14306_v48 = vpack.c.bf16 %v6501_v4, %v6489_v33  ;;  %v14326_v41 = vpack.c.bf16 %v17938_v26, %v17934_v47 }
 0x3dc   : > { %v6486_v32 = vand.u32 4294901760, %v6485_v22 }
 0x3dd   : > { %v6503_v63 = vsub.f32 %v6501_v4, %v6502_v6  ;;  %v14314_v36 = vpack.c.bf16 %v6502_v6, %v6490_v16 }
 0x3de   : > { %6465 = vmatmul.mubr.f32.vlgmr.msra.gmra.mrb[14].mxu0 %v6464_v54  ;;  %v14300_v12 = vpack.c.bf16 %v6498_v30, %v6486_v32  ;;  %v14330_v54 = vpack.c.bf16 %v15420_v40, %v17827_v7  ;;  %v14338_v40 = vpack.c.bf16 %v15434_v5, %v17860_v31 }
 0x3df   : > { %v6504_v1 = vand.u32 4294901760, %v6503_v63  ;;  %6470 = vmatprep.mubr.f32.mxu0 %v14937_v61 }
 0x3e0   : > { %14301 = vmatprep.subr.bf16.mxu0 %v14300_v12 }
 0x3e1   : > { %v14302_v46 = vpack.c.bf16 %v6504_v1, %v6492_v8 }
 0x3e2   : > { %6476 = vmatmul.mubr.f32.gmra.mrb[16].mxu0 %v6475_v34  ;;  %v16985_v34 = vld [vmem:[%s15176_s26] sm:$0xff] }
 0x3e3   : > { %14303 = vmatpush1.bf16.msra.mxu0 %v14302_v46  ;;  %6566 = vmatprep.mubr.f32.mxu0 %v14937_v61 }
 0x3e4   : > { %14305 = vmatprep.subr.bf16.mxu0 %v14304_v44  ;;  %v16989_v44 = vld [vmem:[%s15176_s26 + $0x8] sm:$0xff] }
 0x3e6   : > { %6568 = vmatmul.mubr.f32.vlgmr.msra.gmra.mrb[14].mxu0 %v16854_v19 }
 0x3e7   : > { %6573 = vmatprep.mubr.f32.mxu0 %v14937_v61  ;;  %14307 = vmatpush1.bf16.msra.mxu0 %v14306_v48 }
 0x3e8   : > { %14309 = vmatprep.subr.bf16.mxu0 %v14296_v39 }
 0x3ea   : > { %6575 = vmatmul.mubr.f32.gmra.mrb[16].mxu0 %v16876_v38 }
 0x3eb   : > { %6653 = vmatprep.mubr.f32.mxu0 %v14937_v61 }
 0x3ee   : > { %6656 = vmatmul.mubr.f32.vlgmr.msra.gmra.mrb[14].mxu0 %v6461_v21  ;;  %v7018_v21 = vsub.f32 %v6943_v42, %v16900_v56 }
 0x3ef   : > { %6661 = vmatprep.mubr.f32.mxu0 %v14937_v61  ;;  %14311 = vmatpush1.bf16.msra.mxu0 %v14298_v25 }
 0x3f0   : > { %14313 = vmatprep.subr.bf16.mxu0 %v14312_v11  ;;  %v7019_v0 = vand.u32 4294901760, %v7018_v21 }
 0x3f2   : > { %6664 = vmatmul.mubr.f32.gmra.mrb[16].mxu0 %v6472_v24  ;;  %v7020_v45 = vsub.f32 %v7018_v21, %v7019_v0 }
 0x3f3   : > { %6738 = vmatprep.mubr.f32.mxu0 %v14937_v61 }
 0x3f4   : > { %v7021_v33 = vand.u32 4294901760, %v7020_v45 }
 0x3f6   : > { %6742 = vmatmul.mubr.f32.vlgmr.msra.gmra.mrb[14].mxu0 %v6462_v37  ;;  %v14324_v37 = vpack.c.bf16 %v17936_v15, %v17920_v49  ;;  %v16931_v15 = vpop.permute.xlu0 %7500 }
 0x3f7   : > { %6747 = vmatprep.mubr.f32.mxu0 %v14937_v61  ;;  %14315 = vmatpush1.bf16.msra.mxu0 %v14314_v36 }
 0x3f8   : > { %14317 = vmatprep.subr.bf16.mxu0 %v14296_v39  ;;  %v16917_v39 = vand.u32 4294901760, %v6946_v13 }
 0x3fa   : > { %6751 = vmatmul.mubr.f32.gmra.mrb[16].mxu0 %v6473_v14  ;;  %v7029_v3 = vsub.f32 %v6946_v13, %v16917_v39  ;;  %v14336_v14 = vpack.c.bf16 %v15431_v57, %v17950_v52 }
 0x3fb   : > { %6833 = vmatprep.mubr.f32.mxu0 %v14937_v61 }
 0x3fc   : > { %v7030_v4 = vand.u32 4294901760, %v7029_v3 }
 0x3fe   : > { %6835 = vmatmul.mubr.f32.vlgmr.msra.gmra.mrb[14].mxu0 %v16854_v19  ;;  %v7031_v47 = vsub.f32 %v7029_v3, %v7030_v4 }
 0x3ff   : > { %6840 = vmatprep.mubr.f32.mxu0 %v14937_v61  ;;  %14319 = vmatpush1.bf16.msra.mxu0 %v14298_v25  ;;  %v17951_v25 = vld [vmem:[#allocation18_spill] sm:$0xff] }
 0x400   : > { %14321 = vmatprep.subr.bf16.mxu0 %v14320_v27  ;;  %v14328_v49 = vpack.c.bf16 %v15417_v62, %v17951_v25  ;;  %v7032_v62 = vand.u32 4294901760, %v7031_v47 }
 0x402   : > { %6842 = vmatmul.mubr.f32.gmra.mrb[16].mxu0 %v16876_v38 }
 0x403   : > { %6916 = vmatprep.mubr.f32.mxu0 %v14937_v61 }
 0x406   : > { %6918 = vmatmul.mubr.f32.vlgmr.msra.gmra.mrb[14].mxu0 %v16854_v19  ;;  %v7497_v19 = vpop.permute.xlu1 %7496 }
 0x407   : > { %6923 = vmatprep.mubr.f32.mxu0 %v14937_v61  ;;  %v7504_v43 = vsel %vm7502_vm8, %v16915_v59, %v7497_v19  ;;  %14323 = vmatpush1.bf16.msra.mxu0 %v16912_v28  ;;  %v7506_v10 = vsel %vm7502_vm8, %v16931_v15, %v7497_v19 }
 0x408   : > { %14325 = vmatprep.subr.bf16.mxu0 %v14324_v37  ;;  %v7514_v24 = vsel %vm5776_vm5, %v7506_v10, 0.0 }
 0x409   : > { %v7528_v26 = vand.u32 4294901760, %v7514_v24 }
 0x40a   : > { %6925 = vmatmul.mubr.f32.gmra.mrb[16].mxu0 %v16876_v38  ;;  %v7512_v38 = vsel %vm5776_vm5, %v7504_v43, 0.0 }
 0x40b   : > { %7016 = vmatprep.mubr.f32.mxu0 %v14937_v61  ;;  %v7524_v53 = vand.u32 4294901760, %v7512_v38  ;;  %v16942_v6 = vsub.f32 %v7514_v24, %v7528_v26 }
 0x40d   : > { %v16939_v16 = vsub.f32 %v7512_v38, %v7524_v53  ;;  %v7629_v57 = vand.u32 4294901760, %v16942_v6  ;;  %v16962_v52 = vpack.c.bf16 %v7528_v26, %v7524_v53 }
 0x40e   : > { %7022 = vmatmul.mubr.f32.vlgmr.msra.gmra.mrb[14].mxu0 %v7021_v33 }
 0x40f   : > { %7027 = vmatprep.mubr.f32.mxu0 %v14937_v61  ;;  %14327 = vmatpush1.bf16.msra.mxu0 %v14326_v41  ;;  %v7617_v7 = vand.u32 4294901760, %v16939_v16  ;;  %v7630_v18 = vsub.f32 %v16942_v6, %v7629_v57  ;;  %v14352_v5 = vpack.c.bf16 %v16942_v6, %v16939_v16  ;;  %v4559_v6 = vld [vmem:[%s17569_s8] sm:$0xff] }
 0x410   : > { %14329 = vmatprep.subr.bf16.mxu0 %v14328_v49 }
 0x411   : > { %v7618_v22 = vsub.f32 %v16939_v16, %v7617_v7  ;;  %v7631_v50 = vand.u32 4294901760, %v7630_v18  ;;  %v16971_v63 = vpack.c.bf16 %v7629_v57, %v7617_v7 }
 0x412   : > { %7033 = vmatmul.mubr.f32.gmra.mrb[16].mxu0 %v7032_v62 }
 0x413   : > { %7123 = vmatprep.mubr.f32.mxu0 %v14937_v61  ;;  %v7619_v31 = vand.u32 4294901760, %v7618_v22 }
 0x415   : > { %v16974_v51 = vpack.c.bf16 %v7631_v50, %v7619_v31 }
 0x416   : > { %7125 = vmatmul.mubr.f32.vlgmr.msra.gmra.mrb[14].mxu0 %v16900_v56 }
 0x417   : > { %7130 = vmatprep.mubr.f32.mxu0 %v14937_v61  ;;  %14331 = vmatpush1.bf16.msra.mxu0 %v14330_v54 }
 0x418   : > { %14333 = vmatprep.subr.bf16.mxu0 %v14320_v27 }
 0x41a   : > { %7132 = vmatmul.mubr.f32.gmra.mrb[16].mxu0 %v16917_v39 }
 0x41b   : > { %7210 = vmatprep.mubr.f32.mxu0 %v14937_v61 }
 0x41e   : > { %7213 = vmatmul.mubr.f32.vlgmr.msra.gmra.mrb[14].mxu0 %v7018_v21 }
 0x41f   : > { %7218 = vmatprep.mubr.f32.mxu0 %v14937_v61  ;;  %14335 = vmatpush1.bf16.msra.mxu0 %v16912_v28 }
 0x420   : > { %14337 = vmatprep.subr.bf16.mxu0 %v14336_v14 }
 0x422   : > { %7221 = vmatmul.mubr.f32.gmra.mrb[16].mxu0 %v7029_v3 }
 0x423   : > { %7295 = vmatprep.mubr.f32.mxu0 %v14937_v61 }
 0x426   : > { %7299 = vmatmul.mubr.f32.vlgmr.msra.gmra.mrb[14].mxu0 %v7019_v0  ;;  %v12927_v0 = vld [vmem:[%s17570_s9 + $0x58] sm:$0xff] }
 0x427   : > { %7304 = vmatprep.mubr.f32.mxu0 %v14937_v61  ;;  %14339 = vmatpush1.bf16.msra.mxu0 %v14338_v40  ;;  %v7522_v45 = vsel %vm2367_vm0, %v12927_v0, 0 }
 0x428   : > { %14341 = vmatprep.subr.bf16.mxu0 %v14320_v27  ;;  %v12926_v27 = vld [vmem:[%s17570_s9 + $0x50] sm:$0xff]  ;;  %v17037_v41 = vand.u32 4294901760, %v7522_v45 }
 0x429   : > { %v7519_v13 = vsel %vm2367_vm0, %v12926_v27, 0 }
 0x42a   : > { %7308 = vmatmul.mubr.f32.gmra.mrb[16].mxu0 %v7030_v4  ;;  %v17043_v33 = vsub.f32 %v7522_v45, %v17037_v41 }
 0x42b   : > { %7390 = vmatprep.mubr.f32.mxu0 %v14937_v61 }
 0x42c   : > { %v7606_v57 = vand.u32 4294901760, %v17043_v33 }
 0x42e   : > { %7392 = vmatmul.mubr.f32.vlgmr.msra.gmra.mrb[14].mxu0 %v16900_v56 }
 0x42f   : > { %14343 = vmatpush1.bf16.msra.mxu0 %v16912_v28  ;;  %7397 = vmatprep.mubr.f32.mxu0 %v14937_v61  ;;  %v7493_v28 = vpop.permute.xlu1 %7492 }
 0x430   : > { %14345 = vmatprep.subr.bf16.mxu0 %v16962_v52  ;;  %v7503_v19 = vsel %vm7502_vm8, %v7493_v28, %v16915_v59 }
 0x431   : > { %v7511_v37 = vsel %vm5775_vm6, %v7503_v19, 0.0 }
 0x432   : > { %7399 = vmatmul.mubr.f32.gmra.mrb[16].mxu0 %v16917_v39  ;;  %v7526_v3 = vand.u32 4294901760, %v7511_v37 }
 0x433   : > { %7473 = vmatprep.mubr.f32.mxu0 %v14937_v61 }
 0x434   : > { %v17039_v59 = vsub.f32 %v7511_v37, %v7526_v3 }
 0x436   : > { %7475 = vmatmul.mubr.f32.vlgmr.msra.gmra.mrb[14].mxu0 %v16900_v56  ;;  %v16995_v56 = vld [vmem:[%s15176_s26 + $0x10] sm:$0xff]  ;;  %v7623_v14 = vand.u32 4294901760, %v17039_v59 }
 0x437   : > { %7480 = vmatprep.mubr.f32.mxu0 %v14937_v61 }
 0x43a   : > { %7482 = vmatmul.mubr.f32.gmra.mrb[16].mxu0 %v16917_v39  ;;  %v17029_v39 = vand.u32 4294901760, %v7519_v13 }
 0x43b   : > { %7592 = vmatprep.mubr.f32.mxu0 %v14937_v61 }
 0x43c   : > { %v17035_v43 = vsub.f32 %v7519_v13, %v17029_v39 }
 0x43e   : > { %v7595_v38 = vand.u32 4294901760, %v17035_v43 }
 0x440   : > { %v7596_v7 = vsub.f32 %v17035_v43, %v7595_v38 }
 0x456   : > { %v4490_v32 = vpop.f32.mrb[44].mxu1 }
 0x457   : > { %v4502_v30 = vmul.f32 %v4490_v32, %v16841_v55  ;;  %v4492_v8 = vpop.f32.mrb[45].mxu1 }
 0x458   : > { %v4503_v1 = vmul.f32 %v4492_v8, %v16844_v29  ;;  %v16999_v29 = vld [vmem:[%s15176_s26 + $0x18] sm:$0xff] }
 0x459   : > { %v4506_v12 = vmul.f32 %v16985_v34, %v4502_v30 }
 0x45a   : > { %v4507_v46 = vmul.f32 %v16989_v44, %v4503_v1  ;;  %v4497_v48 = vpop.f32.mrb[46].mxu1  ;;  %v7597_v1 = vand.u32 4294901760, %v7596_v7 }
 0x45b   : > { %v4504_v11 = vmul.f32 %v4497_v48, %v16856_v23  ;;  %v4499_v36 = vpop.f32.mrb[47].mxu1  ;;  %v4543_v23 = vld [vmem:[%s17568_s7] sm:$0xff] }
 0x45c   : > { %v4505_v2 = vmul.f32 %v4499_v36, %v16863_v35  ;;  %v4510_v42 = vadd.f32 %v4507_v46, %v4506_v12  ;;  %v4544_v35 = vld [vmem:[%s17568_s7 + $0x8] sm:$0xff] }
 0x45d   : > { %v4508_v55 = vmul.f32 %v16995_v56, %v4504_v11 }
 0x45e   : > { %v4509_v21 = vmul.f32 %v16999_v29, %v4505_v2  ;;  %4511 = vadd.xlane.f32.xlu0 %v4510_v42 }
 0x460   : > { %v4513_v58 = vadd.f32 %v4509_v21, %v4508_v55 }
 0x462   : > { %4514 = vadd.xlane.f32.xlu1 %v4513_v58 }
 0x473   : > { %8070 = vrot.lane.b32.xlu1 %v16989_v44, %s14943_s17 }
 0x474   : > { %7498 = vrot.lane.b32.xlu0 %v16995_v56, %s14942_s27 }
 0x477   : > { %8076 = vrot.lane.b32.xlu1 %v16999_v29, %s14943_s17 }
 0x478   : > { %8072 = vrot.lane.b32.xlu0 %v14937_v61, %s14943_s17 }
 0x47b   : > { %8074 = vrot.lane.b32.xlu1 %v16995_v56, %s14943_s17 }
 0x47c   : > { %8068 = vrot.lane.b32.xlu0 %v16985_v34, %s14943_s17 }
 0x47f   : > { %8648 = vrot.lane.b32.xlu1 %v14937_v61, %s14944_s18 }
 0x480   : > { %8646 = vrot.lane.b32.xlu0 %v16989_v44, %s14944_s18 }
 0x483   : > { %8644 = vrot.lane.b32.xlu1 %v16985_v34, %s14944_s18 }
 0x484   : > { %8652 = vrot.lane.b32.xlu0 %v16999_v29, %s14944_s18 }
 0x487   : > { %4547 = vperm.xlu1 %14871, %v4543_v23  }
 0x488   : > { %8650 = vrot.lane.b32.xlu0 %v16995_v56, %s14944_s18  ;;  %s14945_s18 = smov 111  }
 0x48c   : > { %4552 = vperm.xlu0 %14870, %v4544_v35  }
 0x4eb   : > { %v4512_v25 = vpop.xlane.xlu0 %4511 }
 0x4ec   : > { %v4517_v49 = vmul.f32 0.00390625, %v4512_v25 }
 0x4ee   : > { %v17045_v4 = vsub.f32 %v4506_v12, %v4517_v49  ;;  %v17047_v10 = vsub.f32 %v4507_v46, %v4517_v49  ;;  %v7607_v12 = vsub.f32 %v17043_v33, %v7606_v57  ;;  %v7624_v46 = vsub.f32 %v17039_v59, %v7623_v14 }
 0x4ef   : > { %v7499_v53 = vpop.permute.xlu0 %7498  ;;  %v4515_v24 = vpop.xlane.xlu1 %4514 }
 0x4f0   : > { %v7505_v47 = vsel %vm7502_vm8, %v7499_v53, %v16931_v15  ;;  %v4518_v26 = vmul.f32 0.00390625, %v4515_v24  ;;  %v4523_v62 = vmul.f32 %v17045_v4, %v17045_v4  ;;  %v4524_v54 = vmul.f32 %v17047_v10, %v17047_v10  ;;  %v12928_v24 = vld [vmem:[%s17570_s9 + $0x60] sm:$0xff] }
 0x4f1   : > { %v7513_v40 = vsel %vm5775_vm6, %v7505_v47, 0.0  ;;  %v7608_v2 = vand.u32 4294901760, %v7607_v12  ;;  %v7625_v42 = vand.u32 4294901760, %v7624_v46  ;;  %v8095_v17 = vsel %vm2367_vm0, %v12928_v24, 0 }
 0x4f2   : > { %v7530_v22 = vand.u32 4294901760, %v7513_v40  ;;  %v17062_v15 = vsub.f32 %v4508_v55, %v4518_v26  ;;  %v17064_v18 = vsub.f32 %v4509_v21, %v4518_v26  ;;  %v4527_v31 = vadd.f32 %v4524_v54, %v4523_v62 }
 0x4f3   : > { %v8071_v58 = vpop.permute.xlu1 %8070  ;;  %v8073_v35 = vpop.permute.xlu0 %8072 }
 0x4f4   : > { %v17066_v50 = vpack.c.bf16 %v7530_v22, %v7526_v3  ;;  %v17068_v32 = vsub.f32 %v7513_v40, %v7530_v22  ;;  %4528 = vadd.xlane.f32.xlu0 %v4527_v31  ;;  %v4525_v30 = vmul.f32 %v17062_v15, %v17062_v15  ;;  %v4526_v8 = vmul.f32 %v17064_v18, %v17064_v18 }
 0x4f5   : > { %v8080_v27 = vsel %vm8078_vm9, %v8071_v58, %v8073_v35 }
 0x4f6   : > { %v7635_v48 = vand.u32 4294901760, %v17068_v32  ;;  %14347 = vmatpush1.bf16.msra.mxu0 %v17066_v50  ;;  %v4530_v11 = vadd.f32 %v4526_v8, %v4525_v30  ;;  %v8088_v28 = vsel %vm4605_vm2, %v8080_v27, 0.0 }
 0x4f7   : > { %14349 = vmatprep.subr.bf16.mxu0 %v16974_v51  ;;  %v14354_v51 = vpack.c.bf16 %v17068_v32, %v17039_v59  ;;  %v8077_v23 = vpop.permute.xlu1 %8076  ;;  %v8069_v0 = vpop.permute.xlu0 %8068  ;;  %v8100_v37 = vand.u32 4294901760, %v8088_v28 }
 0x4f8   : > { %v7636_v36 = vsub.f32 %v17068_v32, %v7635_v48  ;;  %4531 = vadd.xlane.f32.xlu1 %v4530_v11  ;;  %v8082_v16 = vsel %vm8078_vm9, %v8077_v23, %v8073_v35  ;;  %v8079_v3 = vsel %vm8078_vm9, %v8069_v0, %v8071_v58 }
 0x4f9   : > { %7598 = vmatmul.mubr.f32.vlgmr.msra.gmra.mrb[14].mxu0 %v7597_v1  ;;  %v8090_v13 = vsel %vm4605_vm2, %v8082_v16, 0.0  ;;  %v8087_v20 = vsel %vm4604_vm3, %v8079_v3, 0.0 }
 0x4fa   : > { %v7637_v55 = vand.u32 4294901760, %v7636_v36  ;;  %7603 = vmatprep.mubr.f32.mxu0 %v14937_v61  ;;  %v8104_v45 = vand.u32 4294901760, %v8090_v13  ;;  %v8102_v47 = vand.u32 4294901760, %v8087_v20 }
 0x4fb   : > { %v8075_v19 = vpop.permute.xlu1 %8074  ;;  %v8647_v58 = vpop.permute.xlu0 %8646 }
 0x4fc   : > { %v14350_v21 = vpack.c.bf16 %v7637_v55, %v7625_v42  ;;  %v8081_v25 = vsel %vm8078_vm9, %v8075_v19, %v8077_v23  ;;  %v17122_v49 = vsub.f32 %v8090_v13, %v8104_v45  ;;  %v17148_v59 = vsub.f32 %v8087_v20, %v8102_v47 }
 0x4fd   : > { %7609 = vmatmul.mubr.f32.gmra.mrb[16].mxu0 %v7608_v2  ;;  %v8089_v53 = vsel %vm4604_vm3, %v8081_v25, 0.0 }
 0x4fe   : > { %14351 = vmatpush1.bf16.msra.mxu0 %v14350_v21  ;;  %7699 = vmatprep.mubr.f32.mxu0 %v14937_v61  ;;  %v8106_v26 = vand.u32 4294901760, %v8089_v53  ;;  %v8205_v54 = vand.u32 4294901760, %v17122_v49  ;;  %v8199_v7 = vand.u32 4294901760, %v17148_v59 }
 0x4ff   : > { %14353 = vmatprep.subr.bf16.mxu0 %v14352_v5  ;;  %v4560_v5 = vld [vmem:[%s17569_s8 + $0x8] sm:$0xff]  ;;  %v8649_v23 = vpop.permute.xlu1 %8648  ;;  %v8653_v35 = vpop.permute.xlu0 %8652 }
 0x500   : > { %v8206_v40 = vsub.f32 %v17122_v49, %v8205_v54  ;;  %v8200_v8 = vsub.f32 %v17148_v59, %v8199_v7  ;;  %v17175_v1 = vpack.c.bf16 %v8106_v26, %v8102_v47  ;;  %v8656_v27 = vsel %vm8654_vm10, %v8647_v58, %v8649_v23 }
 0x501   : > { %7701 = vmatmul.mubr.f32.vlgmr.msra.gmra.mrb[14].mxu0 %v17029_v39  ;;  %v8658_v16 = vsel %vm8654_vm10, %v8653_v35, %v8649_v23 }
 0x502   : > { %14355 = vmatpush1.bf16.msra.mxu0 %v14354_v51  ;;  %7706 = vmatprep.mubr.f32.mxu0 %v14937_v61  ;;  %v8207_v31 = vand.u32 4294901760, %v8206_v40  ;;  %v8201_v11 = vand.u32 4294901760, %v8200_v8 }
 0x503   : > { %14357 = vmatprep.subr.bf16.mxu0 %v16962_v52  ;;  %v8645_v13 = vpop.permute.xlu1 %8644  ;;  %v8651_v19 = vpop.permute.xlu0 %8650 }
 0x504   : > { %v8655_v20 = vsel %vm8654_vm10, %v8645_v13, %v8647_v58 }
 0x505   : > { %7708 = vmatmul.mubr.f32.gmra.mrb[16].mxu0 %v17037_v41 }
 0x506   : > { %7786 = vmatprep.mubr.f32.mxu0 %v14937_v61 }
 0x509   : > { %7789 = vmatmul.mubr.f32.vlgmr.msra.gmra.mrb[14].mxu0 %v17035_v43  ;;  %4563 = vperm.xlu1 %14871, %v4559_v6   ;;  %v12929_v43 = vld [vmem:[%s17570_s9 + $0x68] sm:$0xff]  ;;  %v8676_v6 = vand.u32 4294901760, %v8656_v27 }
 0x50a   : > { %14359 = vmatpush1.bf16.msra.mxu0 %v17066_v50  ;;  %4568 = vperm.xlu0 %14870, %v4560_v5   ;;  %v8680_v5 = vand.u32 4294901760, %v8658_v16 }
 0x50b   : > { %14361 = vmatprep.subr.bf16.mxu0 %v16971_v63  ;;  %7794 = vmatprep.mubr.f32.mxu0 %v14937_v61  ;;  %v17120_v63 = vsub.f32 %v8088_v28, %v8100_v37  ;;  %v12930_v28 = vld [vmem:[%s17570_s9 + $0x70] sm:$0xff]  ;;  %v17210_v3 = vsub.f32 %v8656_v27, %v8676_v6 }
 0x50c   : > { %v17212_v25 = vsub.f32 %v8658_v16, %v8680_v5 }
 0x50d   : > { %7797 = vmatmul.mubr.f32.gmra.mrb[16].mxu0 %v17043_v33  ;;  %9222 = vrot.lane.b32.xlu1 %v16989_v44, %s14945_s18  ;;  %v14362_v44 = vpack.c.bf16 %v7635_v48, %v7623_v14  ;;  %v8193_v62 = vand.u32 4294901760, %v17120_v63 }
 0x50e   : > { %7871 = vmatprep.mubr.f32.mxu0 %v14937_v61  ;;  %9224 = vrot.lane.b32.xlu0 %v14937_v61, %s14945_s18  ;;  %v8781_v47 = vand.u32 4294901760, %v17212_v25 }
 0x50f   : > { %v8194_v14 = vsub.f32 %v17120_v63, %v8193_v62  ;;  %v14384_v51 = vpack.c.bf16 %v8205_v54, %v8193_v62 }
 0x511   : > { %7875 = vmatmul.mubr.f32.vlgmr.msra.gmra.mrb[14].mxu0 %v7595_v38  ;;  %9228 = vrot.lane.b32.xlu1 %v16999_v29, %s14945_s18  ;;  %v17146_v29 = vand.u32 4294901760, %v8095_v17  ;;  %v8098_v38 = vsel %vm2367_vm0, %v12929_v43, 0  ;;  %v8195_v22 = vand.u32 4294901760, %v8194_v14  ;;  %v14392_v43 = vpack.c.bf16 %v8680_v5, %v8676_v6  ;;  %v12933_v6 = vld [vmem:[%s17570_s9 + $0x88] sm:$0xff] }
 0x512   : > { %14363 = vmatpush1.bf16.msra.mxu0 %v14362_v44  ;;  %7880 = vmatprep.mubr.f32.mxu0 %v14937_v61  ;;  %v17162_v33 = vand.u32 4294901760, %v8098_v38  ;;  %v8769_v44 = vand.u32 4294901760, %v17210_v3 }
 0x513   : > { %14365 = vmatprep.subr.bf16.mxu0 %v16962_v52  ;;  %9220 = vrot.lane.b32.xlu0 %v16985_v34, %s14945_s18  ;;  %v17151_v52 = vsub.f32 %v8089_v53, %v8106_v26  ;;  %v17154_v34 = vpack.c.bf16 %v8104_v45, %v8100_v37  ;;  %v14372_v12 = vpack.c.bf16 %v8207_v31, %v8195_v22  ;;  %v8671_v37 = vsel %vm2367_vm0, %v12930_v28, 0 }
 0x514   : > { %v17172_v30 = vsub.f32 %v8098_v38, %v17162_v33  ;;  %v8657_v45 = vsel %vm8654_vm10, %v8651_v19, %v8653_v35  ;;  %v8678_v53 = vand.u32 4294901760, %v8655_v20  ;;  %v17220_v24 = vand.u32 4294901760, %v8671_v37 }
 0x515   : > { %7884 = vmatmul.mubr.f32.gmra.mrb[16].mxu0 %v7606_v57  ;;  %9226 = vrot.lane.b32.xlu1 %v16995_v56, %s14945_s18  ;;  %v17160_v56 = vsub.f32 %v8095_v17, %v17146_v29  ;;  %v8211_v57 = vand.u32 4294901760, %v17151_v52  ;;  %v9250_v19 = vsel %vm2367_vm0, %v12933_v6, 0 }
 0x516   : > { %7966 = vmatprep.mubr.f32.mxu0 %v14937_v61  ;;  %v8182_v48 = vand.u32 4294901760, %v17172_v30  ;;  %v8774_v62 = vsub.f32 %v8655_v20, %v8678_v53  ;;  %v8746_v54 = vsub.f32 %v8671_v37, %v17220_v24  ;;  %v17274_v37 = vand.u32 4294901760, %v9250_v19 }
 0x517   : > { %v8171_v32 = vand.u32 4294901760, %v17160_v56  ;;  %v14386_v0 = vpack.c.bf16 %v8211_v57, %v8199_v7 }
 0x518   : > { %v8183_v42 = vsub.f32 %v17172_v30, %v8182_v48  ;;  %v8775_v14 = vand.u32 4294901760, %v8774_v62  ;;  %v8747_v7 = vand.u32 4294901760, %v8746_v54 }
 0x519   : > { %7968 = vmatmul.mubr.f32.vlgmr.msra.gmra.mrb[14].mxu0 %v17029_v39  ;;  %v8172_v46 = vsub.f32 %v17160_v56, %v8171_v32 }
 0x51a   : > { %14367 = vmatpush1.bf16.msra.mxu0 %v17066_v50  ;;  %7973 = vmatprep.mubr.f32.mxu0 %v14937_v61  ;;  %v8212_v50 = vsub.f32 %v17151_v52, %v8211_v57  ;;  %v8184_v21 = vand.u32 4294901760, %v8183_v42  ;;  %v8748_v8 = vsub.f32 %v8746_v54, %v8747_v7 }
 0x51b   : > { %14369 = vmatprep.subr.bf16.mxu0 %v17154_v34  ;;  %v8173_v2 = vand.u32 4294901760, %v8172_v46 }
 0x51c   : > { %v8213_v36 = vand.u32 4294901760, %v8212_v50  ;;  %v8749_v46 = vand.u32 4294901760, %v8748_v8 }
 0x51d   : > { %7975 = vmatmul.mubr.f32.gmra.mrb[16].mxu0 %v17037_v41 }
 0x51e   : > { %8049 = vmatprep.mubr.f32.mxu0 %v14937_v61  ;;  %v14374_v55 = vpack.c.bf16 %v8213_v36, %v8201_v11 }
 0x521   : > { %8051 = vmatmul.mubr.f32.vlgmr.msra.gmra.mrb[14].mxu0 %v17029_v39  ;;  %v14376_v39 = vpack.c.bf16 %v17122_v49, %v17120_v63  ;;  %v12931_v63 = vld [vmem:[%s17570_s9 + $0x78] sm:$0xff]  ;;  %v8682_v49 = vand.u32 4294901760, %v8657_v45 }
 0x522   : > { %8056 = vmatprep.mubr.f32.mxu0 %v14937_v61  ;;  %14371 = vmatpush1.bf16.msra.mxu0 %v17175_v1  ;;  %v8674_v26 = vsel %vm2367_vm0, %v12931_v63, 0 }
 0x523   : > { %14373 = vmatprep.subr.bf16.mxu0 %v14372_v12  ;;  %v8786_v17 = vsub.f32 %v8657_v45, %v8682_v49  ;;  %v17230_v38 = vand.u32 4294901760, %v8674_v26  ;;  %v14394_v31 = vpack.c.bf16 %v8682_v49, %v8678_v53 }
 0x525   : > { %8058 = vmatmul.mubr.f32.gmra.mrb[16].mxu0 %v17037_v41  ;;  %v14378_v41 = vpack.c.bf16 %v17151_v52, %v17148_v59  ;;  %v8770_v59 = vsub.f32 %v17210_v3, %v8769_v44  ;;  %v8782_v52 = vsub.f32 %v17212_v25, %v8781_v47  ;;  %v8757_v57 = vsub.f32 %v8674_v26, %v17230_v38 }
 0x526   : > { %8168 = vmatprep.mubr.f32.mxu0 %v14937_v61 }
 0x527   : > { %v8771_v40 = vand.u32 4294901760, %v8770_v59 }
 0x529   : > { %8174 = vmatmul.mubr.f32.vlgmr.msra.gmra.mrb[14].mxu0 %v8173_v2  ;;  %v14402_v2 = vpack.c.bf16 %v8786_v17, %v8774_v62 }
 0x52a   : > { %8179 = vmatprep.mubr.f32.mxu0 %v14937_v61  ;;  %14375 = vmatpush1.bf16.msra.mxu0 %v14374_v55  ;;  %v4553_v55 = vpop.permute.xlu0 %4552 }
 0x52b   : > { %14377 = vmatprep.subr.bf16.mxu0 %v14376_v39  ;;  %v12932_v39 = vld [vmem:[%s17570_s9 + $0x80] sm:$0xff] }
 0x52d   : > { %8185 = vmatmul.mubr.f32.gmra.mrb[16].mxu0 %v8184_v21  ;;  %v4548_v21 = vpop.permute.xlu1 %4547 }
 0x52e   : > { %8275 = vmatprep.mubr.f32.mxu0 %v14937_v61 }
 0x531   : > { %8277 = vmatmul.mubr.f32.vlgmr.msra.gmra.mrb[14].mxu0 %v17146_v29 }
 0x532   : > { %8282 = vmatprep.mubr.f32.mxu0 %v14937_v61  ;;  %14379 = vmatpush1.bf16.msra.mxu0 %v14378_v41 }
 0x533   : > { %14381 = vmatprep.subr.bf16.mxu0 %v17154_v34 }
 0x535   : > { %8284 = vmatmul.mubr.f32.gmra.mrb[16].mxu0 %v17162_v33 }
 0x536   : > { %8362 = vmatprep.mubr.f32.mxu0 %v14937_v61 }
 0x539   : > { %8365 = vmatmul.mubr.f32.vlgmr.msra.gmra.mrb[14].mxu0 %v17160_v56  ;;  %v8783_v56 = vand.u32 4294901760, %v8782_v52 }
 0x53a   : > { %14383 = vmatpush1.bf16.msra.mxu0 %v17175_v1  ;;  %8370 = vmatprep.mubr.f32.mxu0 %v14937_v61 }
 0x53b   : > { %14385 = vmatprep.subr.bf16.mxu0 %v14384_v51  ;;  %v9247_v51 = vsel %vm2367_vm0, %v12932_v39, 0 }
 0x53c   : > { %v17265_v16 = vand.u32 4294901760, %v9247_v51 }
 0x53d   : > { %8373 = vmatmul.mubr.f32.gmra.mrb[16].mxu0 %v17172_v30  ;;  %v14396_v30 = vpack.c.bf16 %v8783_v56, %v8771_v40 }
 0x53e   : > { %8447 = vmatprep.mubr.f32.mxu0 %v14937_v61 }
 0x541   : > { %8451 = vmatmul.mubr.f32.vlgmr.msra.gmra.mrb[14].mxu0 %v8171_v32  ;;  %v8776_v32 = vsub.f32 %v8774_v62, %v8775_v14 }
 0x542   : > { %14387 = vmatpush1.bf16.msra.mxu0 %v14386_v0  ;;  %8456 = vmatprep.mubr.f32.mxu0 %v14937_v61  ;;  %v17272_v0 = vsub.f32 %v9247_v51, %v17265_v16 }
 0x543   : > { %14389 = vmatprep.subr.bf16.mxu0 %v17154_v34  ;;  %v8787_v34 = vand.u32 4294901760, %v8786_v17  ;;  %v8777_v12 = vand.u32 4294901760, %v8776_v32 }
 0x544   : > { %v9323_v20 = vand.u32 4294901760, %v17272_v0 }
 0x545   : > { %8460 = vmatmul.mubr.f32.gmra.mrb[16].mxu0 %v8182_v48  ;;  %v8788_v22 = vsub.f32 %v8786_v17, %v8787_v34  ;;  %v14410_v42 = vpack.c.bf16 %v8787_v34, %v8775_v14 }
 0x546   : > { %8542 = vmatprep.mubr.f32.mxu0 %v14937_v61  ;;  %v9324_v59 = vsub.f32 %v17272_v0, %v9323_v20 }
 0x547   : > { %v8789_v50 = vand.u32 4294901760, %v8788_v22 }
 0x549   : > { %8544 = vmatmul.mubr.f32.vlgmr.msra.gmra.mrb[14].mxu0 %v17146_v29  ;;  %v14398_v11 = vpack.c.bf16 %v8789_v50, %v8777_v12 }
 0x54a   : > { %14391 = vmatpush1.bf16.msra.mxu0 %v17175_v1  ;;  %8549 = vmatprep.mubr.f32.mxu0 %v14937_v61  ;;  %v8758_v1 = vand.u32 4294901760, %v8757_v57 }
 0x54b   : > { %14393 = vmatprep.subr.bf16.mxu0 %v14392_v43 }
 0x54c   : > { %v8759_v48 = vsub.f32 %v8757_v57, %v8758_v1 }
 0x54d   : > { %8551 = vmatmul.mubr.f32.gmra.mrb[16].mxu0 %v17162_v33 }
 0x54e   : > { %8625 = vmatprep.mubr.f32.mxu0 %v14937_v61  ;;  %v8760_v36 = vand.u32 4294901760, %v8759_v48 }
 0x551   : > { %8627 = vmatmul.mubr.f32.vlgmr.msra.gmra.mrb[14].mxu0 %v17146_v29  ;;  %v14400_v29 = vpack.c.bf16 %v17212_v25, %v17210_v3 }
 0x552   : > { %14395 = vmatpush1.bf16.msra.mxu0 %v14394_v31  ;;  %8632 = vmatprep.mubr.f32.mxu0 %v14937_v61 }
 0x553   : > { %14397 = vmatprep.subr.bf16.mxu0 %v14396_v30 }
 0x555   : > { %8634 = vmatmul.mubr.f32.gmra.mrb[16].mxu0 %v17162_v33  ;;  %v14408_v33 = vpack.c.bf16 %v8781_v47, %v8769_v44 }
 0x556   : > { %8744 = vmatprep.mubr.f32.mxu0 %v14937_v61 }
 0x559   : > { %8750 = vmatmul.mubr.f32.vlgmr.msra.gmra.mrb[14].mxu0 %v8749_v46 }
 0x55a   : > { %14399 = vmatpush1.bf16.msra.mxu0 %v14398_v11  ;;  %8755 = vmatprep.mubr.f32.mxu0 %v14937_v61 }
 0x55b   : > { %14401 = vmatprep.subr.bf16.mxu0 %v14400_v29 }
 0x55d   : > { %8761 = vmatmul.mubr.f32.gmra.mrb[16].mxu0 %v8760_v36 }
 0x55e   : > { %8851 = vmatprep.mubr.f32.mxu0 %v14937_v61 }
 0x561   : > { %8853 = vmatmul.mubr.f32.vlgmr.msra.gmra.mrb[14].mxu0 %v17220_v24 }
 0x562   : > { %14403 = vmatpush1.bf16.msra.mxu0 %v14402_v2  ;;  %8858 = vmatprep.mubr.f32.mxu0 %v14937_v61 }
 0x563   : > { %14405 = vmatprep.subr.bf16.mxu0 %v14392_v43 }
 0x565   : > { %8860 = vmatmul.mubr.f32.gmra.mrb[16].mxu0 %v17230_v38 }
 0x566   : > { %8938 = vmatprep.mubr.f32.mxu0 %v14937_v61 }
 0x569   : > { %8941 = vmatmul.mubr.f32.vlgmr.msra.gmra.mrb[14].mxu0 %v8746_v54 }
 0x56a   : > { %14407 = vmatpush1.bf16.msra.mxu0 %v14394_v31  ;;  %8946 = vmatprep.mubr.f32.mxu0 %v14937_v61 }
 0x56b   : > { %14409 = vmatprep.subr.bf16.mxu0 %v14408_v33 }
 0x56d   : > { %8949 = vmatmul.mubr.f32.gmra.mrb[16].mxu0 %v8757_v57 }
 0x56e   : > { %9023 = vmatprep.mubr.f32.mxu0 %v14937_v61 }
 0x571   : > { %9027 = vmatmul.mubr.f32.vlgmr.msra.gmra.mrb[14].mxu0 %v8747_v7 }
 0x572   : > { %14411 = vmatpush1.bf16.msra.mxu0 %v14410_v42  ;;  %9032 = vmatprep.mubr.f32.mxu0 %v14937_v61 }
 0x573   : > { %14413 = vmatprep.subr.bf16.mxu0 %v14392_v43 }
 0x575   : > { %9036 = vmatmul.mubr.f32.gmra.mrb[16].mxu0 %v8758_v1 }
 0x576   : > { %9118 = vmatprep.mubr.f32.mxu0 %v14937_v61 }
 0x579   : > { %9120 = vmatmul.mubr.f32.vlgmr.msra.gmra.mrb[14].mxu0 %v17220_v24 }
 0x57a   : > { %14415 = vmatpush1.bf16.msra.mxu0 %v14394_v31  ;;  %9125 = vmatprep.mubr.f32.mxu0 %v14937_v61 }
 0x57d   : > { %9127 = vmatmul.mubr.f32.gmra.mrb[16].mxu0 %v17230_v38 }
 0x57e   : > { %9201 = vmatprep.mubr.f32.mxu0 %v14937_v61 }
 0x581   : > { %v4529_v41 = vpop.xlane.xlu0 %4528  ;;  %9203 = vmatmul.mubr.f32.vlgmr.msra.gmra.mrb[14].mxu0 %v17220_v24  ;;  %v17281_v24 = vsub.f32 %v9250_v19, %v17274_v37 }
 0x582   : > { %v4533_v58 = vmul.f32 0.00390625, %v4529_v41  ;;  %9208 = vmatprep.mubr.f32.mxu0 %v14937_v61 }
 0x583   : > { %v9334_v7 = vand.u32 4294901760, %v17281_v24 }
 0x584   : > { %v4535_v23 = vadd.f32 1e-05, %v4533_v58 }
 0x585   : > { %v4532_v35 = vpop.xlane.xlu1 %4531  ;;  %9210 = vmatmul.mubr.f32.gmra.mrb[16].mxu0 %v17230_v38  ;;  %v9335_v41 = vsub.f32 %v17281_v24, %v9334_v7 }
 0x586   : > { %14888 = vrsqrt.f32 %v4535_v23  ;;  %v4534_v27 = vmul.f32 0.00390625, %v4532_v35  ;;  %9320 = vmatprep.mubr.f32.mxu0 %v14937_v61 }
 0x588   : > { %v4536_v5 = vadd.f32 1e-05, %v4534_v27 }
 0x589   : > { %v4569_v28 = vpop.permute.xlu0 %4568  ;;  %v4564_v13 = vpop.permute.xlu1 %4563 }
 0x58a   : > { %14890 = vrsqrt.f32 %v4536_v5  ;;  %v9336_v5 = vand.u32 4294901760, %v9335_v41 }
 0x58d   : > { %v9223_v45 = vpop.permute.xlu1 %9222  ;;  %v9225_v3 = vpop.permute.xlu0 %9224 }
 0x58e   : > { %v9232_v25 = vsel %vm9230_vm11, %v9223_v45, %v9225_v3 }
 0x58f   : > { %v9240_v63 = vsel %vm5776_vm5, %v9232_v25, 0.0  ;;  %v9797_v25 = vld [vmem:[%s17571_s10 + $0x8] sm:$0xff] }
 0x590   : > { %v14889_v49 = vpop.eup %14888  ;;  %v9252_v53 = vand.u32 4294901760, %v9240_v63 }
 0x591   : > { %v4539_v44 = vmul.f32 %v14889_v49, %v17045_v4  ;;  %v4540_v47 = vmul.f32 %v14889_v49, %v17047_v10  ;;  %v9229_v26 = vpop.permute.xlu1 %9228  ;;  %v9221_v17 = vpop.permute.xlu0 %9220 }
 0x592   : > { %v17285_v62 = vsub.f32 %v9240_v63, %v9252_v53  ;;  %v9234_v54 = vsel %vm9230_vm11, %v9229_v26, %v9225_v3  ;;  %v9231_v43 = vsel %vm9230_vm11, %v9221_v17, %v9223_v45  ;;  %v9796_v63 = vld [vmem:[%s17571_s10] sm:$0xff] }
 0x593   : > { %v4555_v52 = vmul.f32 %v4548_v21, %v4539_v44  ;;  %v4556_v38 = vmul.f32 %v4548_v21, %v4540_v47  ;;  %v9242_v34 = vsel %vm5776_vm5, %v9234_v54, 0.0  ;;  %v9239_v4 = vsel %vm5775_vm6, %v9231_v43, 0.0 }
 0x594   : > { %v14891_v10 = vpop.eup %14890  ;;  %v9345_v14 = vand.u32 4294901760, %v17285_v62  ;;  %v9256_v40 = vand.u32 4294901760, %v9242_v34  ;;  %v9254_v56 = vand.u32 4294901760, %v9239_v4  ;;  %v9325_v21 = vand.u32 4294901760, %v9324_v59 }
 0x595   : > { %v4541_v57 = vmul.f32 %v14891_v10, %v17062_v15  ;;  %v4542_v22 = vmul.f32 %v14891_v10, %v17064_v18  ;;  %v17300_v31 = vadd.f32 %v4564_v13, %v4555_v52  ;;  %v17302_v32 = vadd.f32 %v4564_v13, %v4556_v38  ;;  %v9227_v60 = vpop.permute.xlu1 %9226 }
 0x596   : > { %v9356_v30 = vsub.f32 %v9242_v34, %v9256_v40  ;;  %v9350_v8 = vsub.f32 %v9239_v4, %v9254_v56  ;;  %v9233_v1 = vsel %vm9230_vm11, %v9227_v60, %v9229_v26  ;;  %v14416_v50 = vpack.c.bf16 %v9256_v40, %v9252_v53 }
 0x597   : > { %v4557_v12 = vmul.f32 %v4553_v55, %v4541_v57  ;;  %v4558_v46 = vmul.f32 %v4553_v55, %v4542_v22  ;;  %v9241_v48 = vsel %vm5775_vm6, %v9233_v1, 0.0  ;;  %v9812_v15 = vadd.f32 %v17302_v32, %v17300_v31 }
 0x598   : > { %v9357_v11 = vand.u32 4294901760, %v9356_v30  ;;  %v9351_v18 = vand.u32 4294901760, %v9350_v8  ;;  %v9258_v29 = vand.u32 4294901760, %v9241_v48  ;;  %14417 = vmatprep.subr.bf16.mxu0 %v14416_v50  ;;  %v9346_v36 = vsub.f32 %v17285_v62, %v9345_v14 }
 0x599   : > { %v17310_v2 = vadd.f32 %v4569_v28, %v4557_v12  ;;  %v17312_v33 = vadd.f32 %v4569_v28, %v4558_v46  ;;  %9813 = vadd.xlane.f32.xlu0 %v9812_v15  ;;  %v14424_v19 = vpack.c.bf16 %v9356_v30, %v17285_v62 }
 0x59a   : > { %v9352_v42 = vsub.f32 %v9350_v8, %v9351_v18  ;;  %v14418_v39 = vpack.c.bf16 %v9258_v29, %v9254_v56  ;;  %v9362_v55 = vsub.f32 %v9241_v48, %v9258_v29  ;;  %v9347_v58 = vand.u32 4294901760, %v9346_v36 }
 0x59b   : > { %v9815_v9 = vadd.f32 %v17312_v33, %v17310_v2  ;;  %v9358_v51 = vsub.f32 %v9356_v30, %v9357_v11  ;;  %v14432_v49 = vpack.c.bf16 %v9357_v11, %v9345_v14 }
 0x59c   : > { %v9363_v23 = vand.u32 4294901760, %v9362_v55  ;;  %14419 = vmatpush1.bf16.msra.mxu0 %v14418_v39  ;;  %v9353_v27 = vand.u32 4294901760, %v9352_v42  ;;  %v14426_v3 = vpack.c.bf16 %v9362_v55, %v9350_v8 }
 0x59d   : > { %9816 = vadd.xlane.f32.xlu1 %v9815_v9  ;;  %v9359_v35 = vand.u32 4294901760, %v9358_v51 }
 0x59e   : > { %v9364_v6 = vsub.f32 %v9362_v55, %v9363_v23  ;;  %v14434_v53 = vpack.c.bf16 %v9363_v23, %v9351_v18 }
 0x59f   : > { %9326 = vmatmul.mubr.f32.vlgmr.msra.gmra.mrb[14].mxu0 %v9325_v21  ;;  %v14420_v28 = vpack.c.bf16 %v9359_v35, %v9347_v58 }
 0x5a0   : > { %v9365_v13 = vand.u32 4294901760, %v9364_v6  ;;  %9331 = vmatprep.mubr.f32.mxu0 %v14937_v61 }
 0x5a1   : > { %14421 = vmatprep.subr.bf16.mxu0 %v14420_v28 }
 0x5a2   : > { %v14422_v45 = vpack.c.bf16 %v9365_v13, %v9353_v27 }
 0x5a3   : > { %9337 = vmatmul.mubr.f32.gmra.mrb[16].mxu0 %v9336_v5 }
 0x5a4   : > { %14423 = vmatpush1.bf16.msra.mxu0 %v14422_v45  ;;  %9427 = vmatprep.mubr.f32.mxu0 %v14937_v61 }
 0x5a5   : > { %14425 = vmatprep.subr.bf16.mxu0 %v14424_v19  ;;  %v9835_v19 = vld [vmem:[%s17573_s12] sm:$0xff] }
 0x5a6   : > { %v10302_v45 = vsel %vm10300_vm13, %v9835_v19, 0 }
 0x5a7   : > { %9429 = vmatmul.mubr.f32.vlgmr.msra.gmra.mrb[14].mxu0 %v17265_v16 }
 0x5a8   : > { %9434 = vmatprep.mubr.f32.mxu0 %v14937_v61  ;;  %14427 = vmatpush1.bf16.msra.mxu0 %v14426_v3  ;;  %v17413_v3 = vand.u32 4294901760, %v10302_v45 }
 0x5a9   : > { %14429 = vmatprep.subr.bf16.mxu0 %v14416_v50 }
 0x5ab   : > { %9436 = vmatmul.mubr.f32.gmra.mrb[16].mxu0 %v17274_v37 }
 0x5ac   : > { %9514 = vmatprep.mubr.f32.mxu0 %v14937_v61 }
 0x5ae   : > { %9805 = vperm.xlu1 %14871, %v9797_v25   ;;  %v17416_v25 = vsub.f32 %v10302_v45, %v17413_v3 }
 0x5af   : > { %9800 = vperm.xlu0 %14870, %v9796_v63   ;;  %9517 = vmatmul.mubr.f32.vlgmr.msra.gmra.mrb[14].mxu0 %v17272_v0  ;;  %v14946_v0 = vmov 0.0|0.0  }
 0x5b0   : > { %9522 = vmatprep.mubr.f32.mxu0 %v14937_v61  ;;  %14431 = vmatpush1.bf16.msra.mxu0 %v14418_v39  ;;  %v17419_v63 = vand.u32 4294901760, %v17416_v25 }
 0x5b1   : > { %14433 = vmatprep.subr.bf16.mxu0 %v14432_v49  ;;  %14440 = vmatprep.subr.bf16.mxu1 %v14946_v0 }
 0x5b2   : > { %v10380_v49 = vsub.f32 %v17416_v25, %v17419_v63 }
 0x5b3   : > { %9525 = vmatmul.mubr.f32.gmra.mrb[16].mxu0 %v17281_v24 }
 0x5b4   : > { %9599 = vmatprep.mubr.f32.mxu0 %v14937_v61 }
 0x5b7   : > { %9603 = vmatmul.mubr.f32.vlgmr.msra.gmra.mrb[14].mxu0 %v9323_v20 }
 0x5b8   : > { %14435 = vmatpush1.bf16.msra.mxu0 %v14434_v53  ;;  %9608 = vmatprep.mubr.f32.mxu0 %v14937_v61  ;;  %v17423_v53 = vand.u32 4294901760, %v10380_v49 }
 0x5b9   : > { %14437 = vmatprep.subr.bf16.mxu0 %v14416_v50 }
 0x5bb   : > { %9612 = vmatmul.mubr.f32.gmra.mrb[16].mxu0 %v9334_v7 }
 0x5bc   : > { %9694 = vmatprep.mubr.f32.mxu0 %v14937_v61 }
 0x5bf   : > { %9696 = vmatmul.mubr.f32.vlgmr.msra.gmra.mrb[14].mxu0 %v17265_v16 }
 0x5c0   : > { %14439 = vmatpush1.bf16.msra.mxu0 %v14418_v39  ;;  %9701 = vmatprep.mubr.f32.mxu0 %v14937_v61 }
 0x5c3   : > { %9703 = vmatmul.mubr.f32.gmra.mrb[16].mxu0 %v17274_v37 }
 0x5c4   : > { %9777 = vmatprep.mubr.f32.mxu0 %v14937_v61 }
 0x5c7   : > { %9779 = vmatmul.mubr.f32.vlgmr.msra.gmra.mrb[14].mxu0 %v17265_v16 }
 0x5c8   : > { %9784 = vmatprep.mubr.f32.mxu0 %v14937_v61 }
 0x5cb   : > { %9786 = vmatmul.mubr.f32.gmra.mrb[16].mxu0 %v17274_v37  ;;  %v9837_v37 = vld [vmem:[%s17572_s11] sm:$0xf] }
 0x5cc   : > { %v9839_v4 = vsel %vm2367_vm0, %v9837_v37, 0  ;;  %v9836_v37 = vld [vmem:[%s17573_s12 + $0x8] sm:$0xff] }
 0x5cd   : > { %v17356_v40 = vand.u32 4294901760, %v9839_v4 }
 0x5cf   : > { %v17359_v56 = vsub.f32 %v9839_v4, %v17356_v40 }
 0x5d1   : > { %v17362_v7 = vand.u32 4294901760, %v17359_v56 }
 0x5d3   : > { %v9911_v30 = vsub.f32 %v17359_v56, %v17362_v7 }
 0x5d5   : > { %v17374_v46 = vand.u32 4294901760, %v9911_v30 }
 0x626   : > { %v9814_v20 = vpop.xlane.xlu0 %9813 }
 0x627   : > { %v9818_v44 = vmul.f32 0.00390625, %v9814_v20 }
 0x62a   : > { %v9817_v24 = vpop.xlane.xlu1 %9816 }
 0x62b   : > { %v9819_v47 = vmul.f32 0.00390625, %v9817_v24 }
 0x62d   : > { %v9820_v26 = vmax.f32 %v9818_v44, %v9819_v47 }
 0x62e   : > { %v9801_v55 = vpop.permute.xlu0 %9800  ;;  %v9806_v23 = vpop.permute.xlu1 %9805 }
 0x62f   : > { %v9821_v17 = vrot.slane %v9820_v26, 4 }
 0x631   : > { %v9822_v62 = vmax.f32 %v9820_v26, %v9821_v17 }
 0x633   : > { %v9823_v54 = vrot.slane %v9822_v62, 2 }
 0x635   : > { %v9824_v16 = vmax.f32 %v9822_v62, %v9823_v54 }
 0x637   : > { %v9825_v43 = vrot.slane %v9824_v16, 1 }
 0x639   : > { %v9826_v59 = vmax.f32 %v9824_v16, %v9825_v43 }
 0x63b   : > { %14846 = vpush %v9826_v59 }
 0x66c   : > { %s14847_s23 = spop %14846 }
 0x66d   : > { %v9828_v52 = vstv %s14847_s23 }
 0x66e   : > { %v9829_v38 = vsub.f32 %v9818_v44, %v9828_v52  ;;  %v9830_v34 = vsub.f32 %v9819_v47, %v9828_v52  ;;  %v10305_v52 = vsel %vm10300_vm13, %v9836_v37, 0 }
 0x670   : > { %v9831_v10 = vmul.f32 1.442695, %v9829_v38  ;;  %v9833_v14 = vmul.f32 1.442695, %v9830_v34  ;;  %v17430_v38 = vand.u32 4294901760, %v10305_v52 }
 0x672   : > { %14892 = vpow2.f32 %v9831_v10  ;;  %v17433_v34 = vsub.f32 %v10305_v52, %v17430_v38 }
 0x673   : > { %14894 = vpow2.f32 %v9833_v14 }
 0x674   : > { %v17436_v4 = vand.u32 4294901760, %v17433_v34 }
 0x676   : > { %v10390_v10 = vsub.f32 %v17433_v34, %v17436_v4 }
 0x67c   : > { %v17364_v57 = vpop.eup %14892 }
 0x67d   : > { %v17366_v22 = vpop.eup %14894  ;;  %v9842_v60 = vand.u32 4294901760, %v17364_v57 }
 0x67e   : > { %v9845_v8 = vand.u32 4294901760, %v17366_v22 }
 0x67f   : > { %v9920_v1 = vsub.f32 %v17364_v57, %v9842_v60 }
 0x680   : > { %v14441_v50 = vpack.c.bf16 %v9845_v8, %v9842_v60  ;;  %v9927_v12 = vsub.f32 %v17366_v22, %v9845_v8 }
 0x681   : > { %v9921_v48 = vand.u32 4294901760, %v9920_v1 }
 0x682   : > { %14442 = vmatpush3.bf16.msra.mxu1 %v14441_v50  ;;  %v9928_v15 = vand.u32 4294901760, %v9927_v12  ;;  %v14447_v39 = vpack.c.bf16 %v9927_v12, %v9920_v1 }
 0x683   : > { %14443 = vmatprep.subr.bf16.mxu1 %v14946_v0  ;;  %v9922_v11 = vsub.f32 %v9920_v1, %v9921_v48  ;;  %v17441_v1 = vand.u32 4294901760, %v10390_v10 }
 0x684   : > { %v9929_v18 = vsub.f32 %v9927_v12, %v9928_v15  ;;  %v14453_v51 = vpack.c.bf16 %v9928_v15, %v9921_v48 }
 0x685   : > { %13605 = vmatmul.mubr.f32.vlgmr.msra.gmra.mrb[48].mxu1 %v17374_v46  ;;  %v9923_v29 = vand.u32 4294901760, %v9922_v11 }
 0x686   : > { %v9930_v36 = vand.u32 4294901760, %v9929_v18  ;;  %13611 = vmatprep.mubr.msk.f32.mxu1 %vm14947_vm12, %v14937_v61 }
 0x688   : > { %v14444_v42 = vpack.c.bf16 %v9930_v36, %v9923_v29 }
 0x68a   : > { %14445 = vmatpush3.bf16.msra.mxu1 %v14444_v42 }
 0x68b   : > { %14446 = vmatprep.subr.bf16.mxu1 %v14946_v0 }
 0x68d   : > { %13612 = vmatmul.mubr.f32.vlgmr.msra.gmra.mrb[48].mxu1 %v17356_v40 }
 0x68e   : > { %14448 = vmatpush3.bf16.msra.mxu1 %v14447_v39  ;;  %13618 = vmatprep.mubr.msk.f32.mxu1 %vm14947_vm12, %v14937_v61 }
 0x68f   : > { %14449 = vmatprep.subr.bf16.mxu1 %v14946_v0 }
 0x695   : > { %13619 = vmatmul.mubr.f32.vlgmr.msra.gmra.mrb[48].mxu1 %v17359_v56 }
 0x696   : > { %14451 = vmatpush3.bf16.msra.mxu1 %v14441_v50  ;;  %13625 = vmatprep.mubr.msk.f32.mxu1 %vm14947_vm12, %v14937_v61 }
 0x697   : > { %14452 = vmatprep.subr.bf16.mxu1 %v14946_v0 }
 0x69a   : > { %v9780_v21 = vpop.f32.mrb[14].mxu0 }
 0x69b   : > { %v17389_v9 = vadd.f32 %v9801_v55, %v9780_v21  ;;  %v9782_v41 = vpop.f32.mrb[15].mxu0 }
 0x69c   : > { %v17391_v58 = vadd.f32 %v9801_v55, %v9782_v41 }
 0x69d   : > { %13626 = vmatmul.mubr.f32.vlgmr.msra.gmra.mrb[48].mxu1 %v17362_v7 }
 0x69e   : > { %14454 = vmatpush3.bf16.msra.mxu1 %v14453_v51  ;;  %v9787_v35 = vpop.f32.mrb[16].mxu0  ;;  %v10804_v27 = vadd.f32 %v17391_v58, %v17389_v9  ;;  %13632 = vmatprep.mubr.msk.f32.mxu1 %vm14947_vm12, %v14937_v61 }
 0x69f   : > { %v17398_v6 = vadd.f32 %v9806_v23, %v9787_v35  ;;  %v9789_v5 = vpop.f32.mrb[17].mxu0  ;;  %14455 = vmatprep.subr.bf16.mxu1 %v14946_v0 }
 0x6a0   : > { %v17401_v28 = vadd.f32 %v9806_v23, %v9789_v5  ;;  %10805 = vadd.xlane.f32.xlu0 %v10804_v27 }
 0x6a2   : > { %v10807_v13 = vadd.f32 %v17401_v28, %v17398_v6 }
 0x6a4   : > { %10808 = vadd.xlane.f32.xlu1 %v10807_v13 }
 0x6a5   : > { %13633 = vmatmul.mubr.f32.vlgmr.msra.gmra.mrb[48].mxu1 %v17356_v40 }
 0x6a6   : > { %14457 = vmatpush3.bf16.msra.mxu1 %v14441_v50  ;;  %13639 = vmatprep.mubr.msk.f32.mxu1 %vm14947_vm12, %v14937_v61 }
 0x6ad   : > { %13640 = vmatmul.mubr.f32.vlgmr.msra.gmra.mrb[48].mxu1 %v17356_v40 }
 0x6ae   : > { %13644 = vmatprep.mubr.f32.mxu1 %v17423_v53 }
 0x72d   : > { %v10806_v20 = vpop.xlane.xlu0 %10805 }
 0x72e   : > { %v10810_v44 = vmul.f32 0.00390625, %v10806_v20 }
 0x731   : > { %v10809_v24 = vpop.xlane.xlu1 %10808 }
 0x732   : > { %v10811_v47 = vmul.f32 0.00390625, %v10809_v24 }
 0x734   : > { %v10812_v26 = vmax.f32 %v10810_v44, %v10811_v47 }
 0x736   : > { %v10813_v17 = vrot.slane %v10812_v26, 4 }
 0x738   : > { %v10814_v62 = vmax.f32 %v10812_v26, %v10813_v17 }
 0x73a   : > { %v10815_v54 = vrot.slane %v10814_v62, 2 }
 0x73c   : > { %v10816_v16 = vmax.f32 %v10814_v62, %v10815_v54 }
 0x73e   : > { %v10817_v43 = vrot.slane %v10816_v16, 1 }
 0x740   : > { %v10818_v59 = vmax.f32 %v10816_v16, %v10817_v43 }
 0x742   : > { %14848 = vpush %v10818_v59 }
 0x773   : > { %s14849_s15 = spop %14848 }
 0x774   : > { %v10820_v50 = vstv %s14849_s15 }
 0x775   : > { %v10821_v15 = vsub.f32 %v10810_v44, %v10820_v50  ;;  %v10822_v11 = vsub.f32 %v10811_v47, %v10820_v50 }
 0x777   : > { %v10823_v36 = vmul.f32 1.442695, %v10821_v15  ;;  %v10825_v42 = vmul.f32 1.442695, %v10822_v11 }
 0x779   : > { %14896 = vpow2.f32 %v10823_v36 }
 0x77a   : > { %14898 = vpow2.f32 %v10825_v42 }
 0x780   : > { %v10296_v14 = vpop.f32.mrb[48].mxu1 }
 0x781   : > { %v10309_v60 = vsel %vm10307_vm14, %v10296_v14, 0  ;;  %v13641_v30 = vpop.f32.mrb[49].mxu1 }
 0x782   : > { %v10312_v8 = vand.u32 4294901760, %v10309_v60 }
 0x783   : > { %v17449_v39 = vpop.eup %14896 }
 0x784   : > { %v10399_v12 = vsub.f32 %v10309_v60, %v10312_v8  ;;  %13642 = vmatprep.subr.mxu1 %v10312_v8  ;;  %v17451_v55 = vpop.eup %14898  ;;  %v10828_v21 = vand.u32 4294901760, %v17449_v39 }
 0x785   : > { %13643 = vmatpush3.msra.mxu1 %v10312_v8  ;;  %v10831_v41 = vand.u32 4294901760, %v17451_v55 }
 0x786   : > { %13645 = vmatmul.mubr.f32.vlgmr.msra.gmra.mrb[50].mxu1 %v17441_v1  ;;  %v10400_v48 = vand.u32 4294901760, %v10399_v12  ;;  %v10906_v51 = vsub.f32 %v17449_v39, %v10828_v21 }
 0x787   : > { %13649 = vmatprep.mubr.f32.mxu1 %v17413_v3  ;;  %v10913_v23 = vsub.f32 %v17451_v55, %v10831_v41  ;;  %v14459_v19 = vpack.c.bf16 %v10831_v41, %v10828_v21 }
 0x788   : > { %v10401_v18 = vsub.f32 %v10399_v12, %v10400_v48  ;;  %v10907_v35 = vand.u32 4294901760, %v10906_v51 }
 0x789   : > { %v10914_v27 = vand.u32 4294901760, %v10913_v23  ;;  %v14465_v24 = vpack.c.bf16 %v10913_v23, %v10906_v51 }
 0x78a   : > { %v10402_v29 = vand.u32 4294901760, %v10401_v18  ;;  %v10908_v5 = vsub.f32 %v10906_v51, %v10907_v35 }
 0x78b   : > { %v10915_v13 = vsub.f32 %v10913_v23, %v10914_v27  ;;  %v14471_v44 = vpack.c.bf16 %v10914_v27, %v10907_v35 }
 0x78c   : > { %13647 = vmatprep.subr.mxu1 %v10402_v29  ;;  %v10909_v45 = vand.u32 4294901760, %v10908_v5 }
 0x78d   : > { %13648 = vmatpush3.msra.mxu1 %v10402_v29  ;;  %v10916_v49 = vand.u32 4294901760, %v10915_v13 }
 0x78e   : > { %13650 = vmatmul.mubr.f32.vlgmr.msra.gmra.mrb[50].mxu1 %v17430_v38  ;;  %13652 = vmatprep.subr.mxu1 %v10399_v12 }
 0x78f   : > { %13653 = vmatpush3.msra.mxu1 %v10399_v12  ;;  %13654 = vmatprep.mubr.f32.mxu1 %v17416_v25  ;;  %v14462_v20 = vpack.c.bf16 %v10916_v49, %v10909_v45 }
 0x790   : > { %13657 = vmatprep.subr.mxu1 %v10312_v8 }
 0x796   : > { %13655 = vmatmul.mubr.f32.vlgmr.msra.gmra.mrb[50].mxu1 %v17433_v34 }
 0x797   : > { %13658 = vmatpush3.msra.mxu1 %v10312_v8  ;;  %13659 = vmatprep.mubr.f32.mxu1 %v17419_v63 }
 0x798   : > { %13662 = vmatprep.subr.mxu1 %v10400_v48 }
 0x79e   : > { %13660 = vmatmul.mubr.f32.vlgmr.msra.gmra.mrb[50].mxu1 %v17436_v4 }
 0x79f   : > { %13663 = vmatpush3.msra.mxu1 %v10400_v48  ;;  %13664 = vmatprep.mubr.f32.mxu1 %v17413_v3 }
 0x7a0   : > { %13667 = vmatprep.subr.mxu1 %v10312_v8 }
 0x7a6   : > { %13665 = vmatmul.mubr.f32.vlgmr.msra.gmra.mrb[50].mxu1 %v17430_v38 }
 0x7a7   : > { %13668 = vmatpush3.msra.mxu1 %v10312_v8  ;;  %13669 = vmatprep.mubr.f32.mxu1 %v17413_v3 }
 0x7a8   : > { %14458 = vmatprep.subr.bf16.mxu1 %v14946_v0 }
 0x7ae   : > { %13670 = vmatmul.mubr.f32.vlgmr.msra.gmra.mrb[50].mxu1 %v17430_v38 }
 0x7af   : > { %14460 = vmatpush3.bf16.msra.mxu1 %v14459_v19  ;;  %13676 = vmatprep.mubr.msk.f32.mxu1 %vm14947_vm12, %v14937_v61 }
 0x7b0   : > { %14461 = vmatprep.subr.bf16.mxu1 %v14946_v0 }
 0x7b2   : > { %13677 = vmatmul.mubr.f32.vlgmr.msra.gmra.mrb[52].mxu1 %v17374_v46 }
 0x7b3   : > { %14463 = vmatpush3.bf16.msra.mxu1 %v14462_v20  ;;  %13683 = vmatprep.mubr.msk.f32.mxu1 %vm14947_vm12, %v14937_v61 }
 0x7b4   : > { %14464 = vmatprep.subr.bf16.mxu1 %v14946_v0 }
 0x7ba   : > { %13684 = vmatmul.mubr.f32.vlgmr.msra.gmra.mrb[52].mxu1 %v17356_v40 }
 0x7bb   : > { %14466 = vmatpush3.bf16.msra.mxu1 %v14465_v24  ;;  %13690 = vmatprep.mubr.msk.f32.mxu1 %vm14947_vm12, %v14937_v61 }
 0x7bc   : > { %14467 = vmatprep.subr.bf16.mxu1 %v14946_v0 }
 0x7c2   : > { %13691 = vmatmul.mubr.f32.vlgmr.msra.gmra.mrb[52].mxu1 %v17359_v56 }
 0x7c3   : > { %14469 = vmatpush3.bf16.msra.mxu1 %v14459_v19  ;;  %13697 = vmatprep.mubr.msk.f32.mxu1 %vm14947_vm12, %v14937_v61 }
 0x7c4   : > { %14470 = vmatprep.subr.bf16.mxu1 %v14946_v0 }
 0x7ca   : > { %13698 = vmatmul.mubr.f32.vlgmr.msra.gmra.mrb[52].mxu1 %v17362_v7 }
 0x7cb   : > { %14472 = vmatpush3.bf16.msra.mxu1 %v14471_v44  ;;  %13704 = vmatprep.mubr.msk.f32.mxu1 %vm14947_vm12, %v14937_v61 }
 0x7cc   : > { %14473 = vmatprep.subr.bf16.mxu1 %v14946_v0 }
 0x7d2   : > { %13705 = vmatmul.mubr.f32.vlgmr.msra.gmra.mrb[52].mxu1 %v17356_v40 }
 0x7d3   : > { %14475 = vmatpush3.bf16.msra.mxu1 %v14459_v19  ;;  %13711 = vmatprep.mubr.msk.f32.mxu1 %vm14947_vm12, %v14937_v61 }
 0x7da   : > { %13712 = vmatmul.mubr.f32.vlgmr.msra.gmra.mrb[52].mxu1 %v17356_v40 }
 0x7db   : > { %13716 = vmatprep.mubr.f32.mxu1 %v17423_v53 }
 0x881   : > { %v13671_v47 = vpop.f32.mrb[50].mxu1 }
 0x882   : > { %14900 = vrcp.f32 %v13671_v47  ;;  %v10790_v26 = vpop.f32.mrb[51].mxu1 }
 0x883   : > { %14902 = vrcp.f32 %v10790_v26 }
 0x88c   : > { %v14901_v17 = vpop.eup %14900 }
 0x88d   : > { %v14903_v62 = vpop.eup %14902  ;;  %v10803_v54 = vmul.f32 %v14901_v17, %v17366_v22 }
 0x88e   : > { %v10801_v0 = vmul.f32 %v14903_v62, %v17364_v57 }
 0x88f   : > { %11789 = vperm.xlu1 %14871, %v10803_v54  }
 0x890   : > { %11784 = vperm.xlu0 %14870, %v10801_v0  }
 0x8ad   : > { %v11282_v16 = vpop.f32.mrb[52].mxu1 }
 0x8ae   : > { %v11287_v43 = vsel %vm10307_vm14, %v11282_v16, 0  ;;  %v13713_v59 = vpop.f32.mrb[53].mxu1 }
 0x8af   : > { %v11290_v37 = vand.u32 4294901760, %v11287_v43 }
 0x8b1   : > { %v11377_v52 = vsub.f32 %v11287_v43, %v11290_v37  ;;  %13714 = vmatprep.subr.mxu1 %v11290_v37 }
 0x8b2   : > { %13715 = vmatpush3.msra.mxu1 %v11290_v37 }
 0x8b3   : > { %13717 = vmatmul.mubr.f32.vlgmr.msra.gmra.mrb[54].mxu1 %v17441_v1  ;;  %v11378_v10 = vand.u32 4294901760, %v11377_v52 }
 0x8b4   : > { %13721 = vmatprep.mubr.f32.mxu1 %v17413_v3 }
 0x8b5   : > { %v11379_v14 = vsub.f32 %v11377_v52, %v11378_v10 }
 0x8b7   : > { %v11380_v60 = vand.u32 4294901760, %v11379_v14 }
 0x8b9   : > { %13719 = vmatprep.subr.mxu1 %v11380_v60 }
 0x8ba   : > { %13720 = vmatpush3.msra.mxu1 %v11380_v60 }
 0x8bb   : > { %13722 = vmatmul.mubr.f32.vlgmr.msra.gmra.mrb[54].mxu1 %v17430_v38  ;;  %13724 = vmatprep.subr.mxu1 %v11377_v52 }
 0x8bc   : > { %13725 = vmatpush3.msra.mxu1 %v11377_v52  ;;  %13726 = vmatprep.mubr.f32.mxu1 %v17416_v25 }
 0x8bd   : > { %13729 = vmatprep.subr.mxu1 %v11290_v37 }
 0x8c3   : > { %13727 = vmatmul.mubr.f32.vlgmr.msra.gmra.mrb[54].mxu1 %v17433_v34 }
 0x8c4   : > { %13730 = vmatpush3.msra.mxu1 %v11290_v37  ;;  %13731 = vmatprep.mubr.f32.mxu1 %v17419_v63 }
 0x8c5   : > { %13734 = vmatprep.subr.mxu1 %v11378_v10 }
 0x8cb   : > { %13732 = vmatmul.mubr.f32.vlgmr.msra.gmra.mrb[54].mxu1 %v17436_v4 }
 0x8cc   : > { %13735 = vmatpush3.msra.mxu1 %v11378_v10  ;;  %13736 = vmatprep.mubr.f32.mxu1 %v17413_v3 }
 0x8cd   : > { %13739 = vmatprep.subr.mxu1 %v11290_v37 }
 0x8d3   : > { %13737 = vmatmul.mubr.f32.vlgmr.msra.gmra.mrb[54].mxu1 %v17430_v38 }
 0x8d4   : > { %13740 = vmatpush3.msra.mxu1 %v11290_v37  ;;  %13741 = vmatprep.mubr.f32.mxu1 %v17413_v3 }
 0x8db   : > { %13742 = vmatmul.mubr.f32.vlgmr.msra.gmra.mrb[54].mxu1 %v17430_v38 }
 0x8dc   : > { %11882 = vmatprep.mubr.f32.mxu1 %v14937_v61 }
 0x90e   : > { %v11790_v48 = vpop.permute.xlu1 %11789 }
 0x90f   : > { %v11785_v15 = vpop.permute.xlu0 %11784  ;;  %v11794_v18 = vmul.f32 %v11790_v48, %v17398_v6  ;;  %v11795_v29 = vmul.f32 %v11790_v48, %v17401_v28 }
 0x910   : > { %v11792_v41 = vmul.f32 %v11785_v15, %v17389_v9 }
 0x9ae   : > { %v13743_v57 = vpop.f32.mrb[54].mxu1 }
 0x9af   : > { %14904 = vrcp.f32 %v13743_v57  ;;  %v11768_v22 = vpop.f32.mrb[55].mxu1 }
 0x9b0   : > { %14906 = vrcp.f32 %v11768_v22 }
 0x9b9   : > { %v14905_v30 = vpop.eup %14904 }
 0x9ba   : > { %v14907_v8 = vpop.eup %14906  ;;  %v11781_v50 = vmul.f32 %v14905_v30, %v17451_v55  ;;  %v11793_v55 = vmul.f32 %v11785_v15, %v17391_v58 }
 0x9bb   : > { %v11779_v12 = vmul.f32 %v14907_v8, %v17449_v39 }
 0x9bc   : > { %11803 = vperm.xlu1 %14871, %v11781_v50  }
 0x9bd   : > { %11798 = vperm.xlu0 %14870, %v11779_v12  }
 0xa3b   : > { %v11804_v11 = vpop.permute.xlu1 %11803 }
 0xa3c   : > { %v11808_v36 = vmul.f32 %v11804_v11, %v17310_v2  ;;  %v11809_v42 = vmul.f32 %v11804_v11, %v17312_v33  ;;  %v11799_v21 = vpop.permute.xlu0 %11798 }
 0xa3d   : > { %v11806_v39 = vmul.f32 %v11799_v21, %v17300_v31  ;;  %v11807_v51 = vmul.f32 %v11799_v21, %v17302_v32 }
 0xa3e   : > { %v11812_v23 = vadd.f32 %v11808_v36, %v11794_v18  ;;  %v11813_v35 = vadd.f32 %v11809_v42, %v11795_v29 }
 0xa3f   : > { %v11810_v27 = vadd.f32 %v11806_v39, %v11792_v41  ;;  %v11811_v5 = vadd.f32 %v11807_v51, %v11793_v55 }
 0xa40   : > { %v11818_v6 = vand.u32 4294901760, %v11813_v35  ;;  %v11820_v13 = vand.u32 4294901760, %v11812_v23 }
 0xa41   : > { %v11814_v28 = vand.u32 4294901760, %v11811_v5  ;;  %v11816_v19 = vand.u32 4294901760, %v11810_v27 }
 0xa42   : > { %v11907_v2 = vsub.f32 %v11813_v35, %v11818_v6  ;;  %v11913_v45 = vsub.f32 %v11812_v23, %v11820_v13 }
 0xa43   : > { %v14478_v33 = vpack.c.bf16 %v11820_v13, %v11816_v19  ;;  %v11895_v49 = vsub.f32 %v11811_v5, %v11814_v28  ;;  %v11901_v20 = vsub.f32 %v11810_v27, %v11816_v19  ;;  %v14476_v9 = vpack.c.bf16 %v11818_v6, %v11814_v28 }
 0xa44   : > { %v11914_v24 = vand.u32 4294901760, %v11913_v45  ;;  %v11908_v58 = vand.u32 4294901760, %v11907_v2 }
 0xa45   : > { %v11902_v44 = vand.u32 4294901760, %v11901_v20  ;;  %14477 = vmatprep.subr.bf16.mxu1 %v14476_v9  ;;  %v11896_v31 = vand.u32 4294901760, %v11895_v49  ;;  %v14484_v37 = vpack.c.bf16 %v11907_v2, %v11895_v49  ;;  %v14486_v52 = vpack.c.bf16 %v11913_v45, %v11901_v20 }
 0xa46   : > { %v11915_v32 = vsub.f32 %v11913_v45, %v11914_v24  ;;  %14479 = vmatpush1.bf16.msra.mxu1 %v14478_v33  ;;  %v11909_v47 = vsub.f32 %v11907_v2, %v11908_v58 }
 0xa47   : > { %v11903_v26 = vsub.f32 %v11901_v20, %v11902_v44  ;;  %v11897_v17 = vsub.f32 %v11895_v49, %v11896_v31  ;;  %v14494_v10 = vpack.c.bf16 %v11914_v24, %v11902_v44 }
 0xa48   : > { %v11910_v62 = vand.u32 4294901760, %v11909_v47  ;;  %v11916_v54 = vand.u32 4294901760, %v11915_v32 }
 0xa49   : > { %11888 = vmatmul.mubr.f32.vlgmr.msra.gmra.mrb[56].mxu1 %v17374_v46  ;;  %v11898_v0 = vand.u32 4294901760, %v11897_v17  ;;  %v11904_v16 = vand.u32 4294901760, %v11903_v26  ;;  %v14492_v46 = vpack.c.bf16 %v11908_v58, %v11896_v31 }
 0xa4a   : > { %11978 = vmatprep.mubr.f32.mxu1 %v14937_v61 }
 0xa4b   : > { %v14480_v43 = vpack.c.bf16 %v11910_v62, %v11898_v0  ;;  %v14482_v59 = vpack.c.bf16 %v11916_v54, %v11904_v16 }
 0xa4d   : > { %14481 = vmatprep.subr.bf16.mxu1 %v14480_v43 }
 0xa4e   : > { %14483 = vmatpush1.bf16.msra.mxu1 %v14482_v59 }
 0xa4f   : > { %14485 = vmatprep.subr.bf16.mxu1 %v14484_v37 }
 0xa51   : > { %11980 = vmatmul.mubr.f32.vlgmr.msra.gmra.mrb[56].mxu1 %v17356_v40 }
 0xa52   : > { %14487 = vmatpush1.bf16.msra.mxu1 %v14486_v52  ;;  %12058 = vmatprep.mubr.f32.mxu1 %v14937_v61 }
 0xa53   : > { %14489 = vmatprep.subr.bf16.mxu1 %v14476_v9 }
 0xa59   : > { %12061 = vmatmul.mubr.f32.vlgmr.msra.gmra.mrb[56].mxu1 %v17359_v56 }
 0xa5a   : > { %14491 = vmatpush1.bf16.msra.mxu1 %v14478_v33  ;;  %12135 = vmatprep.mubr.f32.mxu1 %v14937_v61 }
 0xa5b   : > { %14493 = vmatprep.subr.bf16.mxu1 %v14492_v46 }
 0xa61   : > { %12139 = vmatmul.mubr.f32.vlgmr.msra.gmra.mrb[56].mxu1 %v17362_v7 }
 0xa62   : > { %14495 = vmatpush1.bf16.msra.mxu1 %v14494_v10  ;;  %12221 = vmatprep.mubr.f32.mxu1 %v14937_v61 }
 0xa63   : > { %14497 = vmatprep.subr.bf16.mxu1 %v14476_v9 }
 0xa69   : > { %12223 = vmatmul.mubr.f32.vlgmr.msra.gmra.mrb[56].mxu1 %v17356_v40 }
 0xa6a   : > { %14499 = vmatpush1.bf16.msra.mxu1 %v14478_v33  ;;  %12297 = vmatprep.mubr.f32.mxu1 %v14937_v61 }
 0xa71   : > { %12299 = vmatmul.mubr.f32.vlgmr.msra.gmra.mrb[56].mxu1 %v17356_v40 }
 0xa72   : > { %12389 = vmatprep.mubr.f32.mxu1 %v14937_v61 }
 0xb44   : > { %v12300_v56 = vpop.f32.mrb[56].mxu1 }
 0xb45   : > { %v12934_v14 = vmul.f32 -1.442695, %v12300_v56  ;;  %v12302_v60 = vpop.f32.mrb[57].mxu1 }
 0xb46   : > { %v12935_v57 = vmul.f32 -1.442695, %v12302_v60 }
 0xb47   : > { %14908 = vpow2.f32 %v12934_v14 }
 0xb48   : > { %14910 = vpow2.f32 %v12935_v57 }
 0xb51   : > { %v14909_v7 = vpop.eup %14908 }
 0xb52   : > { %v14911_v22 = vpop.eup %14910  ;;  %v12311_v30 = vadd.f32 1.0, %v14909_v7 }
 0xb53   : > { %v12312_v8 = vadd.f32 1.0, %v14911_v22 }
 0xb54   : > { %14912 = vrcp.f32 %v12311_v30 }
 0xb55   : > { %14914 = vrcp.f32 %v12312_v8 }
 0xb5e   : > { %v14913_v50 = vpop.eup %14912 }
 0xb5f   : > { %v14915_v12 = vpop.eup %14914  ;;  %v12318_v48 = vsel %vm10307_vm14, %v14913_v50, 0 }
 0xb60   : > { %v12321_v40 = vsel %vm10307_vm14, %v14915_v12, 0  ;;  %v12325_v15 = vand.u32 4294901760, %v12318_v48 }
 0xb61   : > { %v12323_v11 = vand.u32 4294901760, %v12321_v40 }
 0xb62   : > { %v12419_v18 = vsub.f32 %v12318_v48, %v12325_v15 }
 0xb63   : > { %12324 = vmatprep.subr.mxu1 %v12323_v11  ;;  %v12413_v29 = vsub.f32 %v12321_v40, %v12323_v11 }
 0xb64   : > { %12326 = vmatpush1.msra.mxu1 %v12325_v15  ;;  %v12420_v36 = vand.u32 4294901760, %v12419_v18 }
 0xb65   : > { %12395 = vmatmul.mubr.f32.vlgmr.msra.gmra.mrb[58].mxu1 %v17423_v53  ;;  %v12414_v42 = vand.u32 4294901760, %v12413_v29 }
 0xb66   : > { %12400 = vmatprep.mubr.f32.mxu1 %v14937_v61  ;;  %v12421_v21 = vsub.f32 %v12419_v18, %v12420_v36 }
 0xb67   : > { %v12415_v41 = vsub.f32 %v12413_v29, %v12414_v42 }
 0xb68   : > { %v12422_v39 = vand.u32 4294901760, %v12421_v21 }
 0xb69   : > { %12406 = vmatmul.mubr.f32.gmra.mrb[60].mxu1 %v17441_v1  ;;  %v12416_v55 = vand.u32 4294901760, %v12415_v41 }
 0xb6a   : > { %12486 = vmatprep.mubr.f32.mxu1 %v14937_v61 }
 0xb6b   : > { %12417 = vmatprep.subr.mxu1 %v12416_v55 }
 0xb6c   : > { %12423 = vmatpush1.msra.mxu1 %v12422_v39 }
 0xb6d   : > { %12488 = vmatmul.mubr.f32.vlgmr.msra.gmra.mrb[58].mxu1 %v17413_v3  ;;  %12503 = vmatprep.subr.mxu1 %v12413_v29 }
 0xb6e   : > { %12506 = vmatpush1.msra.mxu1 %v12419_v18  ;;  %12493 = vmatprep.mubr.f32.mxu1 %v14937_v61 }
 0xb6f   : > { %12587 = vmatprep.subr.mxu1 %v12323_v11 }
 0xb71   : > { %12495 = vmatmul.mubr.f32.gmra.mrb[60].mxu1 %v17430_v38 }
 0xb72   : > { %12569 = vmatprep.mubr.f32.mxu1 %v14937_v61 }
 0xb75   : > { %12572 = vmatmul.mubr.f32.vlgmr.msra.gmra.mrb[58].mxu1 %v17416_v25 }
 0xb76   : > { %12589 = vmatpush1.msra.mxu1 %v12325_v15  ;;  %12577 = vmatprep.mubr.f32.mxu1 %v14937_v61 }
 0xb77   : > { %12674 = vmatprep.subr.mxu1 %v12414_v42 }
 0xb79   : > { %12580 = vmatmul.mubr.f32.gmra.mrb[60].mxu1 %v17433_v34 }
 0xb7a   : > { %12652 = vmatprep.mubr.f32.mxu1 %v14937_v61 }
 0xb7d   : > { %12656 = vmatmul.mubr.f32.vlgmr.msra.gmra.mrb[58].mxu1 %v17419_v63  ;;  %v14924_v63 = vld [vmem:[%s15176_s26] sm:$0xff] }
 0xb7e   : > { %12678 = vmatpush1.msra.mxu1 %v12420_v36  ;;  %12661 = vmatprep.mubr.f32.mxu1 %v14937_v61 }
 0xb7f   : > { %12757 = vmatprep.subr.mxu1 %v12323_v11 }
 0xb81   : > { %12665 = vmatmul.mubr.f32.gmra.mrb[60].mxu1 %v17436_v4  ;;  %v14925_v4 = vld [vmem:[%s15176_s26 + $0x8] sm:$0xff] }
 0xb82   : > { %12741 = vmatprep.mubr.f32.mxu1 %v14937_v61 }
 0xb85   : > { %12743 = vmatmul.mubr.f32.vlgmr.msra.gmra.mrb[58].mxu1 %v17413_v3 }
 0xb86   : > { %12759 = vmatpush1.msra.mxu1 %v12325_v15  ;;  %12748 = vmatprep.mubr.f32.mxu1 %v14937_v61 }
 0xb89   : > { %12750 = vmatmul.mubr.f32.gmra.mrb[60].mxu1 %v17430_v38 }
 0xb8a   : > { %12822 = vmatprep.mubr.f32.mxu1 %v14937_v61 }
 0xb8d   : > { %12824 = vmatmul.mubr.f32.vlgmr.msra.gmra.mrb[58].mxu1 %v17413_v3  ;;  %v14926_v3 = vld [vmem:[%s15176_s26 + $0x10] sm:$0xff] }
 0xb8e   : > { %12829 = vmatprep.mubr.f32.mxu1 %v14937_v61  ;;  %v14927_v61 = vld [vmem:[%s15176_s26 + $0x18] sm:$0xff] }
 0xb91   : > { %12831 = vmatmul.mubr.f32.gmra.mrb[60].mxu1 %v17430_v38 }
 0xc60   : > { %v12825_v25 = vpop.f32.mrb[58].mxu1 }
 0xc61   : > { %v12837_v53 = vmul.f32 %v14924_v63, %v12825_v25  ;;  %v12827_v34 = vpop.f32.mrb[59].mxu1 }
 0xc62   : > { %v12838_v1 = vmul.f32 %v14925_v4, %v12827_v34 }
 0xc63   : > { %12841 = vst [vmem:[%s447_s19] sm:$0xff] %v12837_v53 }
 0xc64   : > { %12842 = vst [vmem:[%s447_s19 + $0x8] sm:$0xff] %v12838_v1  ;;  %v12832_v51 = vpop.f32.mrb[60].mxu1 }
 0xc65   : > { %v12839_v23 = vmul.f32 %v14926_v3, %v12832_v51  ;;  %v12834_v35 = vpop.f32.mrb[61].mxu1 }
 0xc66   : > { %v12840_v27 = vmul.f32 %v14927_v61, %v12834_v35 }
 0xc67   : > { %12843 = vst [vmem:[%s447_s19 + $0x10] sm:$0xff] %v12839_v23 }
 0xc68   : > { %12844 = vst [vmem:[%s447_s19 + $0x18] sm:$0xff] %v12840_v27 }
 0xc69 PF: > { %s23_s25 = sadd.s32 1, %s14934_s25  }
 0xc6a   : > { %p20_p4 = scmp.ge.s32.totalorder %s23_s25, 4  }
 0xc6c   :  { %22 = sbr.rel (!%p20_p4) target bundleno = 1 (0x1), region = 110 }

</bundles_post_ra>
